<compile_context>
chip_gen: v6e
topology: v6e:2x2x1
jax: 0.10.0
libtpu: 0.0.40
codegen_flags: <defaults>
</compile_context>

<pallas_src>
import jax
import jax.numpy as jnp
from jax.experimental import pallas as pl
from jax.experimental.pallas import tpu as pltpu

# ---- problem sizes ----
F = 4                     # n_fingers (Allegro)
NX = NY = NZ = 8          # NeRF density sample grid per fingertip
G = NX * NY * NZ          # 512 voxel samples per finger
GF = 7                    # per-finger grasp features
H1 = 32                   # per-finger encoder width  -> F*H1 = 128 lanes
H2 = 64                   # MLP hidden 1
H3 = 32                   # MLP hidden 2
NCLS = 2                  # (fail, success) logits
FEAT = F * H1 + F * GF    # 156 concatenated features (reference architecture)

# lane-aligned padded widths used inside the kernel (pads are zeros -> exact)
GFP = 32                  # F*GF = 28 -> 32 (block last dim == array last dim)
H2P = 128                 # H2   = 64 -> 128
H3P = 128                 # H3   = 32 -> 128


def _round_up(x, m):
    return (x + m - 1) // m * m


def _pick_tb(b, max_tb=512):
    """Grasps per grid step.

    Grows with the candidate-batch size (128-row tiles only reach ~30% of HBM
    roofline vs ~85% at 512) but keeps >= 2 grid steps whenever possible so
    ("parallel",) can shard the batch across v7x's two TensorCores, and never
    exceeds the batch itself (rounded to the 8-sublane granule).
    """
    tb = min(max_tb, max(128, _round_up(pl.cdiv(b, 2), 128)))
    return min(tb, _round_up(b, 8))


def _nerf_evaluator_kernel(x_ref, g_ref, w1_ref, b1_ref, w2h_ref, w2g_ref,
                           b2_ref, w3_ref, b3_ref, w4_ref, b4_ref, o_ref):
    # Layer 1 (dominant): f32 density tile cast to bf16 on the VPU (hidden
    # under the HBM DMA), then one K=F*G=2048, N=F*H1=128 bf16 MXU matmul with
    # f32 accumulation against the block-diagonal per-finger encoder.  Output
    # is already (TB, F*H1) -- no per-finger reshape needed.
    x = x_ref[...].astype(jnp.bfloat16)
    h = jnp.dot(x, w1_ref[...], preferred_element_type=jnp.float32)
    h = jnp.maximum(h + b1_ref[...], 0.0)                           # (TB, 128) f32

    # Layer 2: concat(h, grasp) @ w2 rewritten as two lane-aligned bf16 matmuls.
    z = (jnp.dot(h.astype(jnp.bfloat16), w2h_ref[...],
                 preferred_element_type=jnp.float32)
         + jnp.dot(g_ref[...], w2g_ref[...], preferred_element_type=jnp.float32))
    z = jnp.maximum(z + b2_ref[...], 0.0)                           # (TB, 128) f32

    # Layer 3.
    z = jnp.dot(z.astype(jnp.bfloat16), w3_ref[...],
                preferred_element_type=jnp.float32)
    z = jnp.maximum(z + b3_ref[...], 0.0)                           # (TB, 128) f32

    # Head: softmax(logits)[:, 0] == sigmoid(logit0 - logit1) with a pre-folded
    # f32 weight-difference row.  Tiny (K=128 -> 1) layer stays on VPU (mul) +
    # XLU (lane reduce): no full-tile transpose, no N=1 MXU matmul.
    ld = jnp.sum(z * w4_ref[...], axis=-1, keepdims=True)           # (TB, 1)
    t = ld + b4_ref[...]
    # 1/(1+exp(-t)) saturates to exact 0/1 for |t| > ~88 (never NaN for finite
    # t); fine for sorting by failure probability.
    o_ref[...] = 1.0 / (1.0 + jnp.exp(-t))                          # (TB, 1)


def nerf_evaluator_forward(nerf_densities, grasp_feats, packed, *, tb=None):
    """nerf_densities: (B, F, NX, NY, NZ) f32; grasp_feats: (B, F, GF) f32.

    Returns failure probabilities of shape (B,), f32 (lower is better).
    """
    b = nerf_densities.shape[0]
    if tb is None:
        tb = _pick_tb(b)
    nb = pl.cdiv(b, tb)

    # No full-batch pad/cast copy of the density slab: contiguous reshape only,
    # streamed unpadded as f32 and cast to bf16 inside the kernel.  The ragged
    # last block reads unspecified rows, but every op is row-independent and
    # those rows' outputs are dropped by the out-of-bounds masking on the
    # (tb, 1) output block.
    x = nerf_densities.reshape(b, F * G)
    g = grasp_feats.reshape(b, F * GF).astype(jnp.bfloat16)
    g = jnp.pad(g, ((0, 0), (0, GFP - F * GF)))            # 28 -> 32 lanes (tiny)

    w_args = (packed["w1bd"], packed["b1t"],
              packed["w2h"], packed["w2g"], packed["b2"],
              packed["w3"], packed["b3"],
              packed["w4d"], packed["b4d"])

    weight_bytes = sum(int(a.size) * a.dtype.itemsize for a in w_args)
    cost = pl.CostEstimate(
        flops=int(2 * b * (F * G) * (F * H1)
                  + 2 * b * (F * H1 + GFP) * H2P
                  + 2 * b * H2P * H3P
                  + 2 * b * H3P),
        transcendentals=int(b),
        bytes_accessed=int(x.size) * 4 + int(g.size) * 2
                       + weight_bytes + int(b) * 4,
    )

    out = pl.pallas_call(
        _nerf_evaluator_kernel,
        out_shape=jax.ShapeDtypeStruct((b, 1), jnp.float32),
        grid=(nb,),
        in_specs=[
            pl.BlockSpec((tb, F * G), lambda i: (i, 0)),       # density slab (f32)
            pl.BlockSpec((tb, GFP), lambda i: (i, 0)),         # grasp feats (bf16)
            pl.BlockSpec((F * G, F * H1), lambda i: (0, 0)),   # w1 block-diag (bf16)
            pl.BlockSpec((1, F * H1), lambda i: (0, 0)),       # b1 tiled (f32)
            pl.BlockSpec((F * H1, H2P), lambda i: (0, 0)),     # w2 voxel part (bf16)
            pl.BlockSpec((GFP, H2P), lambda i: (0, 0)),        # w2 grasp part (bf16)
            pl.BlockSpec((1, H2P), lambda i: (0, 0)),          # b2 (f32)
            pl.BlockSpec((H2P, H3P), lambda i: (0, 0)),        # w3 (bf16)
            pl.BlockSpec((1, H3P), lambda i: (0, 0)),          # b3 (f32)
            pl.BlockSpec((1, H3P), lambda i: (0, 0)),          # w4 diff row (f32)
            pl.BlockSpec((1, 1), lambda i: (0, 0)),            # b4 diff (f32)
        ],
        out_specs=pl.BlockSpec((tb, 1), lambda i: (i, 0)),
        compiler_params=pltpu.CompilerParams(
            dimension_semantics=("parallel",),
            vmem_limit_bytes=32 * 1024 * 1024),
        cost_estimate=cost,
    )(x, g, *w_args)
    return out.reshape(b)


def make_params(key):
    """Deterministic synthetic weights with the ORIGINAL architecture shapes."""
    ks = jax.random.split(key, 8)

    def lin(kw, kb, fan_in, fan_out):
        s = 1.0 / float(fan_in) ** 0.5
        w = jax.random.uniform(kw, (fan_in, fan_out), jnp.float32, -s, s)
        b_ = jax.random.uniform(kb, (fan_out,), jnp.float32, -s, s)
        return w, b_

    w1, b1 = lin(ks[0], ks[1], G, H1)
    w2, b2 = lin(ks[2], ks[3], FEAT, H2)
    w3, b3 = lin(ks[4], ks[5], H2, H3)
    w4, b4 = lin(ks[6], ks[7], H3, NCLS)
    return {"w1": w1, "b1": b1, "w2": w2, "b2": b2,
            "w3": w3, "b3": b3, "w4": w4, "b4": b4}


def _pad2d(w, rows, cols):
    return jnp.zeros((rows, cols), jnp.float32).at[: w.shape[0], : w.shape[1]].set(w)


def pack_params(params):
    """Restructure weights for the kernel (block-diag W1, split w2, folded w4).

    All pads are zeros, so the restructured network is numerically identical
    (up to the bf16 operand rounding also applied in the reference).
    """
    w1, b1 = params["w1"], params["b1"]
    w2, b2 = params["w2"], params["b2"]
    w3, b3 = params["w3"], params["b3"]
    w4, b4 = params["w4"], params["b4"]
    w1bd = jnp.kron(jnp.eye(F, dtype=jnp.float32), w1)   # shared encoder per finger
    return {
        "w1bd": w1bd.astype(jnp.bfloat16),
        "b1t": jnp.tile(b1, F).reshape(1, F * H1),
        "w2h": _pad2d(w2[: F * H1], F * H1, H2P).astype(jnp.bfloat16),
        "w2g": _pad2d(w2[F * H1:], GFP, H2P).astype(jnp.bfloat16),
        "b2": _pad2d(b2.reshape(1, H2), 1, H2P),
        "w3": _pad2d(w3, H2P, H3P).astype(jnp.bfloat16),
        "b3": _pad2d(b3.reshape(1, H3), 1, H3P),
        "w4d": _pad2d((w4[:, 0] - w4[:, 1]).reshape(1, H3), 1, H3P),
        "b4d": (b4[0] - b4[1]).reshape(1, 1),
    }


def _reference_forward(nerf_densities, grasp_feats, params):
    """Pure-JAX reference with the ORIGINAL (un-restructured) architecture.

    Matmul operands are rounded to bf16 (with f32 accumulation via HIGHEST
    precision) to mirror the kernel's MXU dtypes exactly.
    """
    hi = jax.lax.Precision.HIGHEST
    bf = lambda a: a.astype(jnp.bfloat16).astype(jnp.float32)
    b = nerf_densities.shape[0]
    x = bf(nerf_densities.reshape(b * F, G))
    h = jnp.maximum(jnp.dot(x, bf(params["w1"]), precision=hi) + params["b1"], 0.0)
    feat = jnp.concatenate([h.reshape(b, F * H1),
                            grasp_feats.reshape(b, F * GF)], axis=-1)
    z = jnp.maximum(jnp.dot(bf(feat), bf(params["w2"]), precision=hi) + params["b2"], 0.0)
    z = jnp.maximum(jnp.dot(bf(z), bf(params["w3"]), precision=hi) + params["b3"], 0.0)
    logits = jnp.dot(z, params["w4"], precision=hi) + params["b4"]   # head stays f32
    return jax.nn.softmax(logits, axis=-1)[:, 0]


if __name__ == "__main__":
    key = jax.random.PRNGKey(0)
    k_grid, k_grasp, k_params = jax.random.split(key, 3)

    # Synthetic "batch_data_input": NeRF densities around fingertips + grasp
    # features.  Evaluator.sort() scores many candidate grasps per call; 200
    # grasps (~1.6 MB of densities) exercises a 2-step grid AND the ragged
    # last tile (200 is not a multiple of tb=128).
    B = 200
    nerf_densities = jax.random.uniform(k_grid, (B, F, NX, NY, NZ), jnp.float32)
    grasp_feats = jax.random.normal(k_grasp, (B, F, GF), jnp.float32)
    params = make_params(k_params)
    packed = pack_params(params)

    failure_probs = nerf_evaluator_forward(nerf_densities, grasp_feats, packed)
    failure_probs = jax.block_until_ready(failure_probs)

    assert failure_probs.shape == (B,), failure_probs.shape
    ref = _reference_forward(nerf_densities, grasp_feats, params)
    assert jnp.allclose(failure_probs, ref, atol=1e-3, rtol=1e-3), (failure_probs, ref)

    print("KERNEL_OK")
</pallas_src>

<mosaic_0001>
module attributes {stable_mosaic.version = 11 : i64} {
  func.func @_nerf_evaluator_kernel(%arg0: i32, %arg1: memref<128x2048xf32, #tpu.memory_space<vmem>>, %arg2: memref<128x32xbf16, #tpu.memory_space<vmem>>, %arg3: memref<2048x128xbf16, #tpu.memory_space<vmem>>, %arg4: memref<1x128xf32, #tpu.memory_space<vmem>>, %arg5: memref<128x128xbf16, #tpu.memory_space<vmem>>, %arg6: memref<32x128xbf16, #tpu.memory_space<vmem>>, %arg7: memref<1x128xf32, #tpu.memory_space<vmem>>, %arg8: memref<128x128xbf16, #tpu.memory_space<vmem>>, %arg9: memref<1x128xf32, #tpu.memory_space<vmem>>, %arg10: memref<1x128xf32, #tpu.memory_space<vmem>>, %arg11: memref<1x1xf32, #tpu.memory_space<vmem>>, %arg12: memref<128x1xf32, #tpu.memory_space<vmem>>) attributes {dimension_semantics = [#tpu.dimension_semantics<parallel>], iteration_bounds = array<i64: 2>, scalar_prefetch = 0 : i64, scratch_operands = 0 : i64, tpu.core_type = #tpu.core_type<tc>, window_params = [{transform_indices = @transform_0, window_bounds = array<i64: 128, 2048>}, {transform_indices = @transform_1, window_bounds = array<i64: 128, 32>}, {pipeline_mode = #tpu.pipeline_mode<synchronous>, transform_indices = @transform_2, window_bounds = array<i64: 2048, 128>}, {pipeline_mode = #tpu.pipeline_mode<synchronous>, transform_indices = @transform_3, window_bounds = array<i64: 1, 128>}, {pipeline_mode = #tpu.pipeline_mode<synchronous>, transform_indices = @transform_4, window_bounds = array<i64: 128, 128>}, {pipeline_mode = #tpu.pipeline_mode<synchronous>, transform_indices = @transform_5, window_bounds = array<i64: 32, 128>}, {pipeline_mode = #tpu.pipeline_mode<synchronous>, transform_indices = @transform_6, window_bounds = array<i64: 1, 128>}, {pipeline_mode = #tpu.pipeline_mode<synchronous>, transform_indices = @transform_7, window_bounds = array<i64: 128, 128>}, {pipeline_mode = #tpu.pipeline_mode<synchronous>, transform_indices = @transform_8, window_bounds = array<i64: 1, 128>}, {pipeline_mode = #tpu.pipeline_mode<synchronous>, transform_indices = @transform_9, window_bounds = array<i64: 1, 128>}, {pipeline_mode = #tpu.pipeline_mode<synchronous>, transform_indices = @transform_10, window_bounds = array<i64: 1, 1>}, {transform_indices = @transform_11, window_bounds = array<i64: 128, 1>}]} {
    %c0 = arith.constant 0 : index
    %c0_0 = arith.constant 0 : index
    %0 = vector.load %arg1[%c0, %c0_0] : memref<128x2048xf32, #tpu.memory_space<vmem>>, vector<128x2048xf32>
    %1 = arith.truncf %0 : vector<128x2048xf32> to vector<128x2048xbf16>
    %c0_1 = arith.constant 0 : index
    %c0_2 = arith.constant 0 : index
    %2 = vector.load %arg3[%c0_1, %c0_2] : memref<2048x128xbf16, #tpu.memory_space<vmem>>, vector<2048x128xbf16>
    %cst = arith.constant dense<0.000000e+00> : vector<128x128xf32>
    %3 = tpu.matmul %1, %2, %cst {dimension_numbers = #tpu.dot_dimension_numbers<[1], [0], [0], [1], [0, 0, 1, 1], [], []>} : vector<128x2048xbf16>, vector<2048x128xbf16>, vector<128x128xf32> -> vector<128x128xf32>
    %c0_3 = arith.constant 0 : index
    %c0_4 = arith.constant 0 : index
    %4 = vector.load %arg4[%c0_3, %c0_4] : memref<1x128xf32, #tpu.memory_space<vmem>>, vector<1x128xf32>
    %5 = vector.broadcast %4 : vector<1x128xf32> to vector<128x128xf32>
    %6 = arith.addf %3, %5 : vector<128x128xf32>
    %cst_5 = arith.constant 0.000000e+00 : f32
    %7 = vector.broadcast %cst_5 : f32 to vector<128x128xf32>
    %8 = arith.maximumf %6, %7 : vector<128x128xf32>
    %9 = arith.truncf %8 : vector<128x128xf32> to vector<128x128xbf16>
    %c0_6 = arith.constant 0 : index
    %c0_7 = arith.constant 0 : index
    %10 = vector.load %arg5[%c0_6, %c0_7] : memref<128x128xbf16, #tpu.memory_space<vmem>>, vector<128x128xbf16>
    %cst_8 = arith.constant dense<0.000000e+00> : vector<128x128xf32>
    %11 = tpu.matmul %9, %10, %cst_8 {dimension_numbers = #tpu.dot_dimension_numbers<[1], [0], [0], [1], [0, 0, 1, 1], [], []>} : vector<128x128xbf16>, vector<128x128xbf16>, vector<128x128xf32> -> vector<128x128xf32>
    %c0_9 = arith.constant 0 : index
    %c0_10 = arith.constant 0 : index
    %12 = vector.load %arg2[%c0_9, %c0_10] : memref<128x32xbf16, #tpu.memory_space<vmem>>, vector<128x32xbf16>
    %c0_11 = arith.constant 0 : index
    %c0_12 = arith.constant 0 : index
    %13 = vector.load %arg6[%c0_11, %c0_12] : memref<32x128xbf16, #tpu.memory_space<vmem>>, vector<32x128xbf16>
    %cst_13 = arith.constant dense<0.000000e+00> : vector<128x128xf32>
    %14 = tpu.matmul %12, %13, %cst_13 {dimension_numbers = #tpu.dot_dimension_numbers<[1], [0], [0], [1], [0, 0, 1, 1], [], []>} : vector<128x32xbf16>, vector<32x128xbf16>, vector<128x128xf32> -> vector<128x128xf32>
    %15 = arith.addf %11, %14 : vector<128x128xf32>
    %c0_14 = arith.constant 0 : index
    %c0_15 = arith.constant 0 : index
    %16 = vector.load %arg7[%c0_14, %c0_15] : memref<1x128xf32, #tpu.memory_space<vmem>>, vector<1x128xf32>
    %17 = vector.broadcast %16 : vector<1x128xf32> to vector<128x128xf32>
    %18 = arith.addf %15, %17 : vector<128x128xf32>
    %cst_16 = arith.constant 0.000000e+00 : f32
    %19 = vector.broadcast %cst_16 : f32 to vector<128x128xf32>
    %20 = arith.maximumf %18, %19 : vector<128x128xf32>
    %21 = arith.truncf %20 : vector<128x128xf32> to vector<128x128xbf16>
    %c0_17 = arith.constant 0 : index
    %c0_18 = arith.constant 0 : index
    %22 = vector.load %arg8[%c0_17, %c0_18] : memref<128x128xbf16, #tpu.memory_space<vmem>>, vector<128x128xbf16>
    %cst_19 = arith.constant dense<0.000000e+00> : vector<128x128xf32>
    %23 = tpu.matmul %21, %22, %cst_19 {dimension_numbers = #tpu.dot_dimension_numbers<[1], [0], [0], [1], [0, 0, 1, 1], [], []>} : vector<128x128xbf16>, vector<128x128xbf16>, vector<128x128xf32> -> vector<128x128xf32>
    %c0_20 = arith.constant 0 : index
    %c0_21 = arith.constant 0 : index
    %24 = vector.load %arg9[%c0_20, %c0_21] : memref<1x128xf32, #tpu.memory_space<vmem>>, vector<1x128xf32>
    %25 = vector.broadcast %24 : vector<1x128xf32> to vector<128x128xf32>
    %26 = arith.addf %23, %25 : vector<128x128xf32>
    %cst_22 = arith.constant 0.000000e+00 : f32
    %27 = vector.broadcast %cst_22 : f32 to vector<128x128xf32>
    %28 = arith.maximumf %26, %27 : vector<128x128xf32>
    %c0_23 = arith.constant 0 : index
    %c0_24 = arith.constant 0 : index
    %29 = vector.load %arg10[%c0_23, %c0_24] : memref<1x128xf32, #tpu.memory_space<vmem>>, vector<1x128xf32>
    %30 = vector.broadcast %29 : vector<1x128xf32> to vector<128x128xf32>
    %31 = arith.mulf %28, %30 : vector<128x128xf32>
    %cst_25 = arith.constant dense<0.000000e+00> : vector<128xf32>
    %32 = vector.multi_reduction <add>, %31, %cst_25 [1] : vector<128x128xf32> to vector<128xf32>
    %33 = vector.shape_cast %32 : vector<128xf32> to vector<128x1xf32>
    %c0_26 = arith.constant 0 : index
    %c0_27 = arith.constant 0 : index
    %34 = vector.load %arg11[%c0_26, %c0_27] : memref<1x1xf32, #tpu.memory_space<vmem>>, vector<1x1xf32>
    %35 = vector.broadcast %34 : vector<1x1xf32> to vector<128x1xf32>
    %36 = arith.addf %33, %35 : vector<128x1xf32>
    %cst_28 = arith.constant 0.000000e+00 : f32
    %37 = vector.broadcast %cst_28 : f32 to vector<128x1xf32>
    %38 = arith.subf %37, %36 : vector<128x1xf32>
    %39 = math.exp %38 : vector<128x1xf32>
    %cst_29 = arith.constant 1.000000e+00 : f32
    %40 = vector.broadcast %cst_29 : f32 to vector<128x1xf32>
    %41 = arith.addf %40, %39 : vector<128x1xf32>
    %cst_30 = arith.constant 1.000000e+00 : f32
    %42 = vector.broadcast %cst_30 : f32 to vector<128x1xf32>
    %43 = arith.divf %42, %41 : vector<128x1xf32>
    %c0_31 = arith.constant 0 : index
    %c0_32 = arith.constant 0 : index
    %44 = vector.load %arg12[%c0_31, %c0_32] : memref<128x1xf32, #tpu.memory_space<vmem>>, vector<128x1xf32>
    tpu.vector_store %arg12[%c0_31, %c0_32], %43 {strides = array<i32>} : memref<128x1xf32, #tpu.memory_space<vmem>>, vector<128x1xf32>,
    return
  }
  func.func @transform_0(%arg0: i32) -> (i32, i32) {
    %c0_i32 = arith.constant 0 : i32
    %c0_i32_0 = arith.constant 0 : i32
    return %arg0, %c0_i32 : i32, i32
  }
  func.func @transform_1(%arg0: i32) -> (i32, i32) {
    %c0_i32 = arith.constant 0 : i32
    %c0_i32_0 = arith.constant 0 : i32
    return %arg0, %c0_i32 : i32, i32
  }
  func.func @transform_2(%arg0: i32) -> (i32, i32) {
    %c0_i32 = arith.constant 0 : i32
    %c0_i32_0 = arith.constant 0 : i32
    %c0_i32_1 = arith.constant 0 : i32
    return %c0_i32, %c0_i32_0 : i32, i32
  }
  func.func @transform_3(%arg0: i32) -> (i32, i32) {
    %c0_i32 = arith.constant 0 : i32
    %c0_i32_0 = arith.constant 0 : i32
    %c0_i32_1 = arith.constant 0 : i32
    return %c0_i32, %c0_i32_0 : i32, i32
  }
  func.func @transform_4(%arg0: i32) -> (i32, i32) {
    %c0_i32 = arith.constant 0 : i32
    %c0_i32_0 = arith.constant 0 : i32
    %c0_i32_1 = arith.constant 0 : i32
    return %c0_i32, %c0_i32_0 : i32, i32
  }
  func.func @transform_5(%arg0: i32) -> (i32, i32) {
    %c0_i32 = arith.constant 0 : i32
    %c0_i32_0 = arith.constant 0 : i32
    %c0_i32_1 = arith.constant 0 : i32
    return %c0_i32, %c0_i32_0 : i32, i32
  }
  func.func @transform_6(%arg0: i32) -> (i32, i32) {
    %c0_i32 = arith.constant 0 : i32
    %c0_i32_0 = arith.constant 0 : i32
    %c0_i32_1 = arith.constant 0 : i32
    return %c0_i32, %c0_i32_0 : i32, i32
  }
  func.func @transform_7(%arg0: i32) -> (i32, i32) {
    %c0_i32 = arith.constant 0 : i32
    %c0_i32_0 = arith.constant 0 : i32
    %c0_i32_1 = arith.constant 0 : i32
    return %c0_i32, %c0_i32_0 : i32, i32
  }
  func.func @transform_8(%arg0: i32) -> (i32, i32) {
    %c0_i32 = arith.constant 0 : i32
    %c0_i32_0 = arith.constant 0 : i32
    %c0_i32_1 = arith.constant 0 : i32
    return %c0_i32, %c0_i32_0 : i32, i32
  }
  func.func @transform_9(%arg0: i32) -> (i32, i32) {
    %c0_i32 = arith.constant 0 : i32
    %c0_i32_0 = arith.constant 0 : i32
    %c0_i32_1 = arith.constant 0 : i32
    return %c0_i32, %c0_i32_0 : i32, i32
  }
  func.func @transform_10(%arg0: i32) -> (i32, i32) {
    %c0_i32 = arith.constant 0 : i32
    %c0_i32_0 = arith.constant 0 : i32
    %c0_i32_1 = arith.constant 0 : i32
    return %c0_i32, %c0_i32_0 : i32, i32
  }
  func.func @transform_11(%arg0: i32) -> (i32, i32) {
    %c0_i32 = arith.constant 0 : i32
    %c0_i32_0 = arith.constant 0 : i32
    return %arg0, %c0_i32 : i32, i32
  }
}

</mosaic_0001>

<bundles_post_ra>
// kernel: tpu_custom_call.1
= control target key start
LH: loop header
LB: loop body
LE: loop exit
PB: predicated region body
PF: predicated region fallthrough
CT: control target
= control target key end

     0   :  { %s6604_s0 = inlined_call_operand.hbm [shape: f32[200,2048], index: 0, kind: input, shape index: {}]   ;;  %s6605_s1 = inlined_call_operand.vmem [shape: bf16[200,32], index: 1, kind: input, shape index: {}]   ;;  %s6606_s2 = inlined_call_operand.hbm [shape: bf16[2048,128], index: 2, kind: input, shape index: {}]   ;;  %s6607_s3 = inlined_call_operand.hbm [shape: f32[1,128], index: 3, kind: input, shape index: {}]   ;;  %s6608_s4 = inlined_call_operand.hbm [shape: bf16[128,128], index: 4, kind: input, shape index: {}]   ;;  %s6609_s5 = inlined_call_operand.hbm [shape: bf16[32,128], index: 5, kind: input, shape index: {}]   ;;  %s6610_s6 = inlined_call_operand.hbm [shape: f32[1,128], index: 6, kind: input, shape index: {}]   ;;  %s6611_s7 = inlined_call_operand.hbm [shape: bf16[128,128], index: 7, kind: input, shape index: {}]   ;;  %s6612_s8 = inlined_call_operand.hbm [shape: f32[1,128], index: 8, kind: input, shape index: {}]   ;;  %s6613_s9 = inlined_call_operand.hbm [shape: f32[1,128], index: 9, kind: input, shape index: {}]   ;;  %s6614_s10 = inlined_call_operand.<no memory space> [shape: f32[1,1], index: 10, kind: input, shape index: {}]   ;;  %s6615_s11 = inlined_call_operand.vmem [shape: f32[200,1], index: 11, kind: output, shape index: {}]  }
   0x1   :  { %v16_v0 = vstv %s6614_s10 }
   0x2   :  { %17 = vst [vmem:[#allocation2] sm:$0x1] %v16_v0 }
   0x3   :  { %18 = vsyncpa [#allocation4], 0 }
   0x4   :  { %20 = vsyncpa [#allocation4 + $0x1], 0 }
   0x5   :  { %21 = vsyncpa [#allocation6], 0 }
   0x6   :  { %22 = vsyncpa [#allocation9], 0 }
   0x7   :  { %23 = vsyncpa [#allocation12], 0 }
   0x8   :  { %24 = vsyncpa [#allocation15], 0  ;;  %s5643_s19 = smov 0   ;;  %s5645_s20 = smov 0  }
   0x9   :  { %s5647_s21 = smov 0   ;;  %s5649_s22 = smov 0  }
   0xa LB: > { %s5662_s10 = sadd.s32 4294967295, %s5533_s22   ;;  %s5665_s23 = sadd.s32 1, %s5533_s22   ;;  %s5533_s22 = sphi %s5649_s22, %s6661_s22   ;;  %s5529_s21 = sphi %s5647_s21, %s6665_s21   ;;  %s5525_s20 = sphi %s5645_s20, %s6664_s20   ;;  %s5521_s19 = sphi %s5643_s19, %s6663_s19  }
   0xb   : > { %6625 = sst [smem:[#allocation23_spill]] %s5665_s23  ;;  %s34_s24 = ssub.s32 %s5533_s22, %s5665_s23 }
   0xc   : > { %s37_s25 = sadd.s32 1, %s5529_s21  ;;  %p35_p0 = scmp.eq.s32.totalorder %s34_s24, 0 }
   0xd   : > { %p44_p1 = scmp.ne.s32.totalorder %s5529_s21, %s5525_s20  ;;  %p45_p2 = scmp.eq.s32.totalorder %s5533_s22, 0 }
   0xe   : > { %p50_p3 = scmp.ne.s32.totalorder %s5525_s20, %s5521_s19  ;;  %p6616_p5 = scmp.eq.s32.totalorder %s5662_s10, 0 }
   0xf   : > { %s5675_s26 = scalar_select %p35_p0, %s5529_s21, %s37_s25  }
  0x10   : > { %p5677_p4 = por %p45_p2, %p44_p1  ;;  %p289_p6 = scmp.eq.s32.totalorder %s5662_s10, 1 }
  0x11   : > { %6626 = sst [smem:[#allocation24_spill]] %s5675_s26  ;;  %p3941_p7 = scmp.ge.s32.totalorder %s5533_s22, 1 }
  0x12   : > { %p5686_p8 = por %p6616_p5, %p50_p3  ;;  %p302_p9 = scmp.lt.s32.totalorder %s5533_s22, 3 }
  0x13   : > { %p5691_p10 = por %p289_p6, %p44_p1  ;;  %s5567_s12 = smov [#allocation5]  }
  0x14   : > { %s6628_s28 = scalar_select %p5686_p8, 1, 0 }
  0x15   : > { %s6629_s29 = scalar_select %p5691_p10, 1, 0 }
  0x16   : > { %p5695_p11 = pnand %p3941_p7, %p302_p9  ;;  %s314_s13 = sshll.u32 %s5567_s12, 4  ;;  %s315_s13 = int_to_ptr.vmem [resolvable:$true] %s314_s13 }
  0x17   : > { %s5568_s15 = smov [#allocation8]   ;;  %s5569_s17 = smov [#allocation11]  }
  0x18   : > { %s6630_s30 = scalar_select %p5695_p11, 1, 0 }
  0x19   : > { %p4850_p12 = pneg %p5695_p11  ;;  %s338_s16 = sshll.u32 %s5568_s15, 4  ;;  %s339_s16 = int_to_ptr.vmem [resolvable:$true] %s338_s16 }
  0x1a   : > { %s365_s18 = sshll.u32 %s5569_s17, 4  ;;  %s5228_s24 = scalar_lea.vmem %s315_s13, 16384  ;;  %s366_s18 = int_to_ptr.vmem [resolvable:$true] %s365_s18 }
  0x1b   : > { %p5703_p13 = pnand %p4850_p12, %p6616_p5  ;;  %p5229_p1 = scmp.ne.s32.totalorder %s315_s13, %s5228_s24 }
  0x1c   : > { %p5236_p6 = scmp.lt.s32.totalorder %s315_s13, %s315_s13  ;;  %p5237_p7 = scmp.lt.s32.totalorder %s5228_s24, %s5228_s24 }
  0x1d   : > { %p5709_p0 = pneg %p5703_p13 }
  0x1e   : > { %p5238_p9 = por %p5237_p7, %p5236_p6 }
  0x1f   : > { %p5231_p2 = pnand %p5229_p1, %p5709_p0 }
  0x21   : > { %p5232_p3 = pneg %p5231_p2 }
  0x23   : > { %p5239_p12 = pnand %p5238_p9, %p5232_p3 }
  0x25   : > { %5242 = shalt.err (!%p5239_p12)
}
  0x26   : > { %s6619_s25 = smov 64   ;;  %s6621_s12 = smov 4  }
  0x27   : > { %4853 = dma.hbm_to_vmem [thread:$0]  (!%p5703_p13), %s6606_s2, 16384, %s315_s13, [#allocation6], %s6619_s25, %s6619_s25, %s6621_s12  }
  0x28   : > { %s5254_s26 = scalar_lea.vmem %s339_s16, 1024  ;;  %p5262_p6 = scmp.lt.s32.totalorder %s339_s16, %s339_s16 }
  0x29   : > { %p5255_p1 = scmp.ne.s32.totalorder %s339_s16, %s5254_s26  ;;  %p5263_p3 = scmp.lt.s32.totalorder %s5254_s26, %s5254_s26 }
  0x2b   : > { %p5257_p2 = pnand %p5255_p1, %p5709_p0  ;;  %p5264_p7 = por %p5263_p3, %p5262_p6 }
  0x2d   : > { %p5258_p5 = pneg %p5257_p2 }
  0x2f   : > { %p5265_p9 = pnand %p5264_p7, %p5258_p5 }
  0x31   : > { %5268 = shalt.err (!%p5265_p9)
}
  0x32   : > { %4859 = dma.hbm_to_vmem [thread:$0]  (!%p5703_p13), %s6608_s4, 1024, %s339_s16, [#allocation9], %s6619_s25, %s6619_s25, %s6621_s12  }
  0x33   : > { %s5280_s13 = scalar_lea.vmem %s366_s18, 16  ;;  %s5287_s26 = scalar_lea.vmem %s366_s18, 32 }
  0x34   : > { %p5281_p12 = scmp.ne.s32.totalorder %s366_s18, %s5280_s13  ;;  %p5288_p6 = scmp.lt.s32.totalorder %s366_s18, %s366_s18 }
  0x35   : > { %p5289_p5 = scmp.lt.s32.totalorder %s5287_s26, %s5280_s13 }
  0x36   : > { %p5283_p1 = pnand %p5281_p12, %p5709_p0 }
  0x37   : > { %p5290_p3 = por %p5289_p5, %p5288_p6 }
  0x38   : > { %p5284_p2 = pneg %p5283_p1 }
  0x3a   : > { %p5291_p7 = pnand %p5290_p3, %p5284_p2 }
  0x3c   : > { %5294 = shalt.err (!%p5291_p7)
}
  0x3d   : > { %4865 = dma.hbm_to_vmem [thread:$0]  (!%p5703_p13), %s6610_s6, 16, %s366_s18, [#allocation12]  }
  0x3e   : > { %s5572_s23 = smov [#allocation14]   ;;  %s5573_s24 = smov [#allocation7]  }
  0x3f   : > { %s389_s16 = sshll.u32 %s5572_s23, 4  ;;  %s328_s25 = sshll.u32 %s5573_s24, 4  ;;  %s390_s16 = int_to_ptr.vmem [resolvable:$true] %s389_s16  ;;  %s329_s25 = int_to_ptr.vmem [resolvable:$true] %s328_s25 }
  0x40   : > { %s5306_s12 = scalar_lea.vmem %s390_s16, 16  ;;  %s5313_s13 = scalar_lea.vmem %s390_s16, 32 }
  0x41   : > { %p5307_p9 = scmp.ne.s32.totalorder %s390_s16, %s5306_s12  ;;  %p5314_p2 = scmp.lt.s32.totalorder %s390_s16, %s390_s16 }
  0x42   : > { %p5315_p6 = scmp.lt.s32.totalorder %s5313_s13, %s5306_s12 }
  0x43   : > { %p5309_p12 = pnand %p5307_p9, %p5709_p0 }
  0x44   : > { %p5316_p5 = por %p5315_p6, %p5314_p2 }
  0x45   : > { %p5310_p1 = pneg %p5309_p12 }
  0x47   : > { %p5317_p3 = pnand %p5316_p5, %p5310_p1 }
  0x49   : > { %5320 = shalt.err (!%p5317_p3)
}
  0x4a   : > { %4871 = dma.hbm_to_vmem [thread:$0]  (!%p5703_p13), %s6612_s8, 16, %s390_s16, [#allocation15]  }
  0x4b   : > { %s5332_s15 = scalar_lea.vmem %s329_s25, 16  ;;  %s5339_s17 = scalar_lea.vmem %s329_s25, 32 }
  0x4c   : > { %p5333_p7 = scmp.ne.s32.totalorder %s329_s25, %s5332_s15  ;;  %p5340_p12 = scmp.lt.s32.totalorder %s329_s25, %s329_s25 }
  0x4d   : > { %p5341_p8 = scmp.lt.s32.totalorder %s5339_s17, %s5332_s15 }
  0x4e   : > { %p5335_p10 = pnand %p5333_p7, %p5709_p0 }
  0x4f   : > { %p5342_p11 = por %p5341_p8, %p5340_p12 }
  0x50   : > { %p5336_p9 = pneg %p5335_p10 }
  0x52   : > { %p5343_p2 = pnand %p5342_p11, %p5336_p9 }
  0x54   : > { %5346 = shalt.err (!%p5343_p2)
}
  0x55   : > { %4856 = dma.hbm_to_vmem [thread:$0]  (!%p5703_p13), %s6607_s3, 16, %s329_s25, [#allocation6]  }
  0x56   : > { %s5574_s16 = smov [#allocation10]   ;;  %s5575_s13 = smov [#allocation13]  }
  0x57   : > { %s351_s24 = sshll.u32 %s5574_s16, 4  ;;  %s375_s26 = sshll.u32 %s5575_s13, 4  ;;  %s352_s24 = int_to_ptr.vmem [resolvable:$true] %s351_s24  ;;  %s376_s26 = int_to_ptr.vmem [resolvable:$true] %s375_s26 }
  0x58   : > { %s5358_s18 = scalar_lea.vmem %s352_s24, 256  ;;  %p5366_p8 = scmp.lt.s32.totalorder %s352_s24, %s352_s24 }
  0x59   : > { %p5359_p10 = scmp.ne.s32.totalorder %s352_s24, %s5358_s18  ;;  %p5367_p11 = scmp.lt.s32.totalorder %s5358_s18, %s5358_s18 }
  0x5b   : > { %p5361_p1 = pnand %p5359_p10, %p5709_p0  ;;  %p5368_p5 = por %p5367_p11, %p5366_p8 }
  0x5d   : > { %p5362_p6 = pneg %p5361_p1 }
  0x5f   : > { %p5369_p3 = pnand %p5368_p5, %p5362_p6 }
  0x61   : > { %5372 = shalt.err (!%p5369_p3)
}
  0x62   : > { %s6633_s15 = smov 4   ;;  %s6634_s17 = smov 64  }
  0x63   : > { %4862 = dma.hbm_to_vmem [thread:$0]  (!%p5703_p13), %s6609_s5, 256, %s352_s24, [#allocation9], %s6634_s17, %s6634_s17, %s6633_s15  }
  0x64   : > { %s5384_s23 = scalar_lea.vmem %s376_s26, 1024  ;;  %p5392_p2 = scmp.lt.s32.totalorder %s376_s26, %s376_s26 }
  0x65   : > { %p5385_p7 = scmp.ne.s32.totalorder %s376_s26, %s5384_s23  ;;  %p5393_p10 = scmp.lt.s32.totalorder %s5384_s23, %s5384_s23 }
  0x67   : > { %p5387_p9 = pnand %p5385_p7, %p5709_p0  ;;  %p5394_p1 = por %p5393_p10, %p5392_p2 }
  0x69   : > { %p5388_p12 = pneg %p5387_p9 }
  0x6b   : > { %p5395_p6 = pnand %p5394_p1, %p5388_p12 }
  0x6d   : > { %5398 = shalt.err (!%p5395_p6)
}
  0x6e   : > { %4868 = dma.hbm_to_vmem [thread:$0]  (!%p5703_p13), %s6611_s7, 1024, %s376_s26, [#allocation12], %s6634_s17, %s6634_s17, %s6633_s15  }
  0x6f   : > { %s5576_s24 = smov [#allocation16]  }
  0x70   : > { %s400_s18 = sshll.u32 %s5576_s24, 4  ;;  %s401_s18 = int_to_ptr.vmem [resolvable:$true] %s400_s18 }
  0x71   : > { %s5410_s25 = scalar_lea.vmem %s401_s18, 16  ;;  %s5417_s12 = scalar_lea.vmem %s401_s18, 32 }
  0x72   : > { %p5411_p8 = scmp.ne.s32.totalorder %s401_s18, %s5410_s25  ;;  %p5418_p3 = scmp.lt.s32.totalorder %s401_s18, %s401_s18 }
  0x73   : > { %p5419_p7 = scmp.lt.s32.totalorder %s5417_s12, %s5410_s25 }
  0x74   : > { %p5413_p11 = pnand %p5411_p8, %p5709_p0 }
  0x75   : > { %p5420_p9 = por %p5419_p7, %p5418_p3 }
  0x76   : > { %p5414_p5 = pneg %p5413_p11 }
  0x78   : > { %p5421_p12 = pnand %p5420_p9, %p5414_p5 }
  0x7a   : > { %5424 = shalt.err (!%p5421_p12)
}
  0x7b   : > { %4874 = dma.hbm_to_vmem [thread:$0]  (!%p5703_p13), %s6613_s9, 16, %s401_s18, [#allocation15]  }
  0x7c   : > { %p3950_p2 = scmp.ge.s32.totalorder %s5533_s22, 2 }
  0x7e   : > { %410 = sbr.rel (%p3950_p2) target bundleno = 163 (0xa3), region = 52 }
  0x83   : > { %413 = sbr.rel (!%p5677_p4) target bundleno = 163 (0xa3), region = 56  ;;  %s414_s19 = sand.u32 (%p5677_p4), 1, %s5529_s21  }
  0x84   : > { %s3952_s26 = sshll.u32 (%p5677_p4), %s5533_s22, 4  ;;  %s3951_s15 = sshll.u32 (%p5677_p4), %s414_s19, 11 }
  0x85   : > { %s420_s17 = ssub.s32 (%p5677_p4), 25, %s3952_s26  ;;  %s5789_s24 = scalar_lea.sflag (%p5677_p4), [#allocation4], %s414_s19 }
  0x86   : > { %p421_p0 = scmp.lt.s32.totalorder (%p5677_p4), %s420_s17, 16  ;;  %s418_s18 = scalar_lea.vmem (%p5677_p4), [#allocation3], %s3951_s15 }
  0x88   : > { %s6667_s17 = smov (!%p421_p0, %s420_s17), 16 }
  0x89   : > { %s5786_s13 = sshll.u32 %s6667_s17, 11 }
  0x8a   : > { %s426_s14 = ssub.s32 32768, %s5786_s13 }
  0x8b   : > { %427 = vsyncadd %s5789_s24, %s426_s14  ;;  %p3955_p4 = scmp.ne.s32.totalorder %s5786_s13, 0  ;;  %s4159_s27 = sshll.u32 %s5533_s22, 15 }
  0x8c   : > { %s5797_s23 = scalar_lea.hbm %s6604_s0, %s4159_s27  ;;  %s433_s16 = sshll.u32 %s418_s18, 4  ;;  %s5799_s16 = int_to_ptr.vmem [resolvable:$true] %s433_s16 }
  0x8d   : > { %s5425_s19 = scalar_lea.hbm %s5797_s23, %s5786_s13  ;;  %s5429_s22 = scalar_lea.hbm %s6604_s0, 51200 }
  0x8e   : > { %p5426_p13 = scmp.ne.s32.totalorder %s5797_s23, %s5425_s19  ;;  %p5430_p6 = scmp.lt.s32.totalorder %s5797_s23, %s6604_s0 }
  0x8f   : > { %p5431_p8 = scmp.lt.s32.totalorder %s5429_s22, %s5425_s19 }
  0x90   : > { %p5427_p10 = pnand %p5426_p13, %p3955_p4 }
  0x91   : > { %p5432_p11 = por %p5431_p8, %p5430_p6 }
  0x92   : > { %p5428_p1 = pneg %p5427_p10 }
  0x94   : > { %p5433_p5 = pnand %p5432_p11, %p5428_p1 }
  0x96   : > { %5436 = shalt.err (!%p5433_p5)
}
  0x97   : > { %s5437_s18 = scalar_lea.vmem %s5799_s16, %s5786_s13  ;;  %s5577_s27 = smov [#allocation3]  }
  0x98   : > { %p5438_p3 = scmp.ne.s32.totalorder %s5799_s16, %s5437_s18  ;;  %s5441_s25 = sshll.u32 %s5577_s27, 4  ;;  %s5442_s25 = int_to_ptr.vmem [resolvable:$false] %s5441_s25 }
  0x99   : > { %s5443_s12 = scalar_lea.vmem %s5442_s25, 65536  ;;  %p5444_p12 = scmp.lt.s32.totalorder %s5799_s16, %s5442_s25 }
  0x9a   : > { %p5439_p7 = pnand %p5438_p3, %p3955_p4  ;;  %p5445_p2 = scmp.lt.s32.totalorder %s5443_s12, %s5437_s18 }
  0x9c   : > { %p5440_p9 = pneg %p5439_p7  ;;  %p5446_p0 = por %p5445_p2, %p5444_p12 }
  0x9e   : > { %p5447_p13 = pnand %p5446_p0, %p5440_p9 }
  0xa0   : > { %5450 = shalt.err (!%p5447_p13)
}
  0xa1   : > { %s5578_s19 = smov 2048   ;;  %s5579_s26 = smov 128  }
  0xa2   : > { %439 = dma.hbm_to_vmem [thread:$0]  (%p3955_p4), %s5797_s23, %s5786_s13, %s5799_s16, %s5789_s24, %s5578_s19, %s5578_s19, %s5579_s26  }
  0xa3 PF: > { %p6635_p10 = scmp.ne.s32.totalorder %s6630_s30, 0 }
  0xa5   : > { %462 = sbr.rel (%p6635_p10) target bundleno = 1312 (0x520), region = 64 }
  0xaa   : > { %s5828_s15 = sand.u32 1, %s5525_s20   ;;  %p6636_p1 = scmp.ne.s32.totalorder %s6628_s28, 0 }
  0xab   : > { %s3961_s22 = sshll.u32 %s5828_s15, 11  ;;  %s465_s17 = scalar_lea.sflag [#allocation4], %s5828_s15 }
  0xac   : > { %s5832_s14 = scalar_lea.vmem [#allocation3], %s3961_s22 }
  0xad   : > { %5500 = dma.done.wait (%p6636_p1), %s465_s17, 32768  }
  0xae   : > { %5502 = vsyncadd (%p6636_p1), %s465_s17, 4294934528  ;;  %p6637_p4 = scmp.eq.s32.totalorder %s5662_s10, 0 }
  0xb0   : > { %5504 = dma.done.wait (%p6637_p4), [#allocation6], 16400   ;;  %p6638_p6 = pmov %p6637_p4 }
  0xb1   : > { %p6639_p8 = pmov %p6637_p4 }
  0xb2   : > { %5506 = vsyncadd (%p6638_p6), [#allocation6], 4294950896 }
  0xb3   : > { %5508 = dma.done.wait (%p6639_p8), [#allocation9], 1280   ;;  %p6640_p11 = pmov %p6637_p4 }
  0xb4   : > { %p6641_p5 = pmov %p6637_p4 }
  0xb5   : > { %5510 = vsyncadd (%p6640_p11), [#allocation9], 4294966016 }
  0xb6   : > { %5512 = dma.done.wait (%p6641_p5), [#allocation12], 1040   ;;  %p6642_p3 = pmov %p6637_p4 }
  0xb8   : > { %5514 = vsyncadd (%p6642_p3), [#allocation12], 4294966256  ;;  %p6643_p7 = pmov %p6642_p3 }
  0xb9   : > { %p6644_p9 = pmov %p6642_p3 }
  0xba   : > { %5516 = dma.done.wait (%p6643_p7), [#allocation15], 32  }
  0xbb   : > { %5518 = vsyncadd (%p6644_p9), [#allocation15], 4294967264  ;;  %v4999_v1 = vld [vmem:[#allocation5 + $0x78] sm:$0xff]   ;;  %v5003_v5 = vld [vmem:[#allocation5 + $0x70] sm:$0xff]   ;;  %s6170_s28 = sshll.u32 %s5662_s10, 4  ;;  %vm2876_vm0 = vcmask 261120  }
  0xbc   : > { %v5000_v2 = vld [vmem:[#allocation5 + $0xf8] sm:$0xff]   ;;  %4163 = vmatprep.subr.bf16.mxu0 %v4999_v1  ;;  %v5004_v6 = vld [vmem:[#allocation5 + $0xf0] sm:$0xff]   ;;  %v5007_v9 = vld [vmem:[#allocation5 + $0x68] sm:$0xff]   ;;  %p558_p12 = scmp.lt.s32.totalorder %s6170_s28, 24  ;;  %s3970_s18 = sshll.u32 %s5828_s15, 7  ;;  %vm3548_vm1 = vcmask 7168  }
  0xbd   : > { %v5001_v3 = vld [vmem:[#allocation5 + $0x38] sm:$0xff]   ;;  %4227 = vmatprep.subr.bf16.mxu1 %v5000_v2  ;;  %v5005_v7 = vld [vmem:[#allocation5 + $0x30] sm:$0xff]   ;;  %v5008_v10 = vld [vmem:[#allocation5 + $0xe8] sm:$0xff]   ;;  %s6460_s27 = scalar_lea.vmem [#allocation17], %s3970_s18   ;;  %p6657_p2 = scmp.ne.s32.totalorder %s6629_s29, 0 }
  0xbe   : > { %v5002_v4 = vld [vmem:[#allocation5 + $0xb8] sm:$0xff]   ;;  %4164 = vmatpush3.bf16.msra.mxu0 %v5001_v3  ;;  %v5006_v8 = vld [vmem:[#allocation5 + $0xb0] sm:$0xff]   ;;  %v5009_v11 = vld [vmem:[#allocation5 + $0x28] sm:$0xff]   ;;  %s559_s30 = scalar_select %p558_p12, %s6170_s28, 24 }
  0xbf   : > { %4228 = vmatpush3.bf16.msra.mxu1 %v5002_v4  ;;  %4165 = vmatprep.subr.bf16.mxu0 %v5003_v5  ;;  %v5010_v12 = vld [vmem:[#allocation5 + $0xa8] sm:$0xff]   ;;  %v5011_v13 = vld [vmem:[#allocation5 + $0x60] sm:$0xff]   ;;  %v5015_v17 = vld [vmem:[#allocation5 + $0x58] sm:$0xff]   ;;  %s3573_s25 = ssub.s32 (%p6657_p2), 25, %s6170_s28  ;;  %s4160_s12 = sshll.u32 (%p6657_p2), %s5662_s10, 7 }
  0xc0   : > { %4229 = vmatprep.subr.bf16.mxu1 %v5004_v6  ;;  %v5012_v14 = vld [vmem:[#allocation5 + $0xe0] sm:$0xff]   ;;  %v5016_v18 = vld [vmem:[#allocation5 + $0xd8] sm:$0xff]   ;;  %v5019_v21 = vld [vmem:[#allocation5 + $0x50] sm:$0xff]   ;;  %s3972_s13 = sshll.u32 %s559_s30, 2  ;;  %p3574_p0 = scmp.lt.s32.totalorder (%p6657_p2), %s3573_s25, 16 }
  0xc1   : > { %v5013_v15 = vld [vmem:[#allocation5 + $0x20] sm:$0xff]   ;;  %v5017_v19 = vld [vmem:[#allocation5 + $0x18] sm:$0xff]   ;;  %v5020_v22 = vld [vmem:[#allocation5 + $0xd0] sm:$0xff]   ;;  %s6181_s16 = scalar_lea.vmem %s6605_s1, %s3972_s13  ;;  %s6508_s15 = scalar_lea.vmem (%p6657_p2), %s6615_s11, %s4160_s12  }
  0xc2   : > { %4166 = vmatpush3.bf16.msra.mxu0 %v5005_v7  ;;  %v5014_v16 = vld [vmem:[#allocation5 + $0xa0] sm:$0xff]   ;;  %v5018_v20 = vld [vmem:[#allocation5 + $0x98] sm:$0xff]   ;;  %v5021_v23 = vld [vmem:[#allocation5 + $0x10] sm:$0xff]  }
  0xc3   : > { %4230 = vmatpush3.bf16.msra.mxu1 %v5006_v8  ;;  %4167 = vmatprep.subr.bf16.mxu0 %v5007_v9  ;;  %v5022_v24 = vld [vmem:[#allocation5 + $0x90] sm:$0xff]   ;;  %v5023_v25 = vld [vmem:[#allocation5 + $0x48] sm:$0xff]   ;;  %v5027_v29 = vld [vmem:[#allocation5 + $0x40] sm:$0xff]  }
  0xc4   : > { %4231 = vmatprep.subr.bf16.mxu1 %v5008_v10  ;;  %v5024_v26 = vld [vmem:[#allocation5 + $0xc8] sm:$0xff]   ;;  %v5028_v30 = vld [vmem:[#allocation5 + $0xc0] sm:$0xff]   ;;  %v576_v35 = vld [vmem:[%s5832_s14 + $0x18] sm:$0xff] }
  0xc5   : > { %v5025_v27 = vld [vmem:[#allocation5 + $0x8] sm:$0xff]   ;;  %v5029_v31 = vld [vmem:[#allocation5] sm:$0xff]   ;;  %v592_v37 = vld [vmem:[%s5832_s14 + $0x98] sm:$0xff] }
  0xc6   : > { %4168 = vmatpush3.bf16.msra.mxu0 %v5009_v11  ;;  %v5026_v28 = vld [vmem:[#allocation5 + $0x88] sm:$0xff]   ;;  %v5030_v32 = vld [vmem:[#allocation5 + $0x80] sm:$0xff]   ;;  %v832_v40 = vpack.c.bf16 %v592_v37, %v576_v35  ;;  %v575_v42 = vld [vmem:[%s5832_s14 + $0x10] sm:$0xff] }
  0xc7   : > { %4232 = vmatpush3.bf16.msra.mxu1 %v5010_v12  ;;  %4169 = vmatprep.subr.bf16.mxu0 %v5011_v13  ;;  %v574_v33 = vld [vmem:[%s5832_s14 + $0x8] sm:$0xff]  ;;  %v573_v38 = vld [vmem:[%s5832_s14] sm:$0xff]  ;;  %v591_v43 = vld [vmem:[%s5832_s14 + $0x90] sm:$0xff] }
  0xc8   : > { %4233 = vmatprep.subr.bf16.mxu1 %v5012_v14  ;;  %v590_v34 = vld [vmem:[%s5832_s14 + $0x88] sm:$0xff]  ;;  %v589_v39 = vld [vmem:[%s5832_s14 + $0x80] sm:$0xff]  ;;  %v831_v44 = vpack.c.bf16 %v591_v43, %v575_v42  ;;  %v5031_v45 = vld [vmem:[#allocation5 + $0x178] sm:$0xff]   ;;  %2117 = vmatprep.mubr.bf16.mxu1 %v832_v40 }
  0xc9   : > { %v830_v36 = vpack.c.bf16 %v590_v34, %v574_v33  ;;  %v829_v41 = vpack.c.bf16 %v589_v39, %v573_v38  ;;  %v5032_v46 = vld [vmem:[#allocation5 + $0x138] sm:$0xff]   ;;  %v606_v49 = vld [vmem:[%s5832_s14 + $0x108] sm:$0xff]  ;;  %v605_v55 = vld [vmem:[%s5832_s14 + $0x100] sm:$0xff] }
  0xca   : > { %4170 = vmatpush3.bf16.msra.mxu0 %v5013_v15  ;;  %v5033_v47 = vld [vmem:[#allocation5 + $0x1f8] sm:$0xff]   ;;  %v622_v50 = vld [vmem:[%s5832_s14 + $0x188] sm:$0xff]  ;;  %v621_v56 = vld [vmem:[%s5832_s14 + $0x180] sm:$0xff] }
  0xcb   : > { %4234 = vmatpush3.bf16.msra.mxu1 %v5014_v16  ;;  %4171 = vmatprep.subr.bf16.mxu0 %v5015_v17  ;;  %v5034_v48 = vld [vmem:[#allocation5 + $0x1b8] sm:$0xff]   ;;  %v846_v53 = vpack.c.bf16 %v622_v50, %v606_v49  ;;  %v607_v57 = vld [vmem:[%s5832_s14 + $0x110] sm:$0xff]  ;;  %v845_v58 = vpack.c.bf16 %v621_v56, %v605_v55  ;;  %v638_v1 = vld [vmem:[%s5832_s14 + $0x208] sm:$0xff] }
  0xcc   : > { %4235 = vmatprep.subr.bf16.mxu1 %v5016_v18  ;;  %2020 = vmatprep.mubr.bf16.mxu0 %v830_v36  ;;  %v608_v51 = vld [vmem:[%s5832_s14 + $0x118] sm:$0xff]  ;;  %v623_v59 = vld [vmem:[%s5832_s14 + $0x190] sm:$0xff]  ;;  %v654_v2 = vld [vmem:[%s5832_s14 + $0x288] sm:$0xff] }
  0xcd   : > { %v624_v52 = vld [vmem:[%s5832_s14 + $0x198] sm:$0xff]  ;;  %v847_v60 = vpack.c.bf16 %v623_v59, %v607_v57  ;;  %v5035_v61 = vld [vmem:[#allocation5 + $0x170] sm:$0xff]   ;;  %v862_v3 = vpack.c.bf16 %v654_v2, %v638_v1  ;;  %v637_v6 = vld [vmem:[%s5832_s14 + $0x200] sm:$0xff] }
  0xce   : > { %4172 = vmatpush3.bf16.msra.mxu0 %v5017_v19  ;;  %v848_v54 = vpack.c.bf16 %v624_v52, %v608_v51  ;;  %v5036_v62 = vld [vmem:[#allocation5 + $0x130] sm:$0xff]   ;;  %v640_v4 = vld [vmem:[%s5832_s14 + $0x218] sm:$0xff]  ;;  %v653_v8 = vld [vmem:[%s5832_s14 + $0x280] sm:$0xff] }
  0xcf   : > { %4236 = vmatpush3.bf16.msra.mxu1 %v5018_v20  ;;  %4173 = vmatprep.subr.bf16.mxu0 %v5019_v21  ;;  %v5037_v63 = vld [vmem:[#allocation5 + $0x1f0] sm:$0xff]   ;;  %v656_v5 = vld [vmem:[%s5832_s14 + $0x298] sm:$0xff]  ;;  %v861_v11 = vpack.c.bf16 %v653_v8, %v637_v6  ;;  %v5039_v12 = vld [vmem:[#allocation5 + $0x168] sm:$0xff]  }
  0xd0   : > { %4237 = vmatprep.subr.bf16.mxu1 %v5020_v22  ;;  %v5038_v0 = vld [vmem:[#allocation5 + $0x1b0] sm:$0xff]   ;;  %v864_v7 = vpack.c.bf16 %v656_v5, %v640_v4  ;;  %v5040_v14 = vld [vmem:[#allocation5 + $0x128] sm:$0xff]   ;;  %v672_v19 = vld [vmem:[%s5832_s14 + $0x318] sm:$0xff] }
  0xd1   : > { %v639_v9 = vld [vmem:[%s5832_s14 + $0x210] sm:$0xff]  ;;  %v5041_v15 = vld [vmem:[#allocation5 + $0x1e8] sm:$0xff]   ;;  %v688_v21 = vld [vmem:[%s5832_s14 + $0x398] sm:$0xff] }
  0xd2   : > { %4174 = vmatpush3.bf16.msra.mxu0 %v5021_v23  ;;  %v655_v10 = vld [vmem:[%s5832_s14 + $0x290] sm:$0xff]  ;;  %v5042_v16 = vld [vmem:[#allocation5 + $0x1a8] sm:$0xff]   ;;  %v669_v22 = vld [vmem:[%s5832_s14 + $0x300] sm:$0xff] }
  0xd3   : > { %4238 = vmatpush3.bf16.msra.mxu1 %v5022_v24  ;;  %4175 = vmatprep.subr.bf16.mxu0 %v5023_v25  ;;  %v863_v13 = vpack.c.bf16 %v655_v10, %v639_v9  ;;  %v670_v17 = vld [vmem:[%s5832_s14 + $0x308] sm:$0xff]  ;;  %v685_v23 = vld [vmem:[%s5832_s14 + $0x380] sm:$0xff]  ;;  %v880_v24 = vpack.c.bf16 %v688_v21, %v672_v19  ;;  %v671_v25 = vld [vmem:[%s5832_s14 + $0x310] sm:$0xff] }
  0xd4   : > { %4239 = vmatprep.subr.bf16.mxu1 %v5024_v26  ;;  %v686_v18 = vld [vmem:[%s5832_s14 + $0x388] sm:$0xff]  ;;  %v687_v26 = vld [vmem:[%s5832_s14 + $0x390] sm:$0xff]  ;;  %v704_v35 = vld [vmem:[%s5832_s14 + $0x418] sm:$0xff] }
  0xd5   : > { %v878_v20 = vpack.c.bf16 %v686_v18, %v670_v17  ;;  %v702_v33 = vld [vmem:[%s5832_s14 + $0x408] sm:$0xff]  ;;  %v720_v36 = vld [vmem:[%s5832_s14 + $0x498] sm:$0xff]  ;;  %v701_v39 = vld [vmem:[%s5832_s14 + $0x400] sm:$0xff] }
  0xd6   : > { %4176 = vmatpush3.bf16.msra.mxu0 %v5025_v27  ;;  %v5043_v27 = vld [vmem:[#allocation5 + $0x160] sm:$0xff]   ;;  %v718_v34 = vld [vmem:[%s5832_s14 + $0x488] sm:$0xff]  ;;  %v896_v38 = vpack.c.bf16 %v720_v36, %v704_v35  ;;  %v719_v42 = vld [vmem:[%s5832_s14 + $0x490] sm:$0xff] }
  0xd7   : > { %4240 = vmatpush3.bf16.msra.mxu1 %v5026_v28  ;;  %4177 = vmatprep.subr.bf16.mxu0 %v5027_v29  ;;  %v877_v28 = vpack.c.bf16 %v685_v23, %v669_v22  ;;  %v5044_v29 = vld [vmem:[#allocation5 + $0x120] sm:$0xff]   ;;  %v894_v37 = vpack.c.bf16 %v718_v34, %v702_v33  ;;  %v5047_v43 = vld [vmem:[#allocation5 + $0x158] sm:$0xff]   ;;  %v734_v49 = vld [vmem:[%s5832_s14 + $0x508] sm:$0xff] }
  0xd8   : > { %4241 = vmatprep.subr.bf16.mxu1 %v5028_v30  ;;  %v879_v30 = vpack.c.bf16 %v687_v26, %v671_v25  ;;  %v717_v40 = vld [vmem:[%s5832_s14 + $0x480] sm:$0xff]  ;;  %v750_v50 = vld [vmem:[%s5832_s14 + $0x588] sm:$0xff]  ;;  %v736_v52 = vld [vmem:[%s5832_s14 + $0x518] sm:$0xff] }
  0xd9   : > { %v910_v51 = vpack.c.bf16 %v750_v50, %v734_v49  ;;  %v733_v55 = vld [vmem:[%s5832_s14 + $0x500] sm:$0xff]  ;;  %v735_v57 = vld [vmem:[%s5832_s14 + $0x510] sm:$0xff]  ;;  %v782_v1 = vld [vmem:[%s5832_s14 + $0x688] sm:$0xff] }
  0xda   : > { %4178 = vmatpush3.bf16.msra.mxu0 %v5029_v31  ;;  %v5045_v31 = vld [vmem:[#allocation5 + $0x1e0] sm:$0xff]   ;;  %v5051_v59 = vld [vmem:[#allocation5 + $0x150] sm:$0xff]   ;;  %v768_v2 = vld [vmem:[%s5832_s14 + $0x618] sm:$0xff] }
  0xdb   : > { %4242 = vmatpush3.bf16.msra.mxu1 %v5030_v32  ;;  %4291 = vmatprep.subr.bf16.mxu0 %v5031_v45  ;;  %v5046_v32 = vld [vmem:[#allocation5 + $0x1a0] sm:$0xff]   ;;  %v893_v45 = vpack.c.bf16 %v717_v40, %v701_v39  ;;  %v784_v5 = vld [vmem:[%s5832_s14 + $0x698] sm:$0xff]  ;;  %v5055_v9 = vld [vmem:[#allocation5 + $0x148] sm:$0xff]  }
  0xdc   : > { %4355 = vmatprep.subr.bf16.mxu1 %v5033_v47  ;;  %v749_v56 = vld [vmem:[%s5832_s14 + $0x580] sm:$0xff]  ;;  %v928_v6 = vpack.c.bf16 %v784_v5, %v768_v2  ;;  %v767_v10 = vld [vmem:[%s5832_s14 + $0x610] sm:$0xff]  ;;  %v800_v17 = vld [vmem:[%s5832_s14 + $0x718] sm:$0xff] }
  0xdd   : > { %2021 = vmatmul.mubr.bf16.vlgmr.msra.gmra.mxu0 %v829_v41  ;;  %v703_v41 = vld [vmem:[%s5832_s14 + $0x410] sm:$0xff]  ;;  %v781_v8 = vld [vmem:[%s5832_s14 + $0x680] sm:$0xff]  ;;  %v816_v18 = vld [vmem:[%s5832_s14 + $0x798] sm:$0xff] }
  0xde   : > { %2118 = vmatmul.mubr.bf16.vlgmr.msra.gmra.mxu1 %v831_v44  ;;  %4292 = vmatpush3.bf16.msra.mxu0 %v5032_v46  ;;  %v5048_v44 = vld [vmem:[#allocation5 + $0x118] sm:$0xff]   ;;  %v895_v47 = vpack.c.bf16 %v719_v42, %v703_v41  ;;  %v944_v22 = vpack.c.bf16 %v816_v18, %v800_v17  ;;  %v5059_v23 = vld [vmem:[#allocation5 + $0x140] sm:$0xff]   ;;  %v5071_v2 = vld [vmem:[#allocation5 + $0x268] sm:$0xff]  }
  0xdf   : > { %4356 = vmatpush3.bf16.msra.mxu1 %v5034_v48  ;;  %2028 = vmatprep.mubr.bf16.mxu0 %v846_v53  ;;  %v5049_v46 = vld [vmem:[#allocation5 + $0x1d8] sm:$0xff]   ;;  %v5060_v25 = vld [vmem:[#allocation5 + $0x100] sm:$0xff]   ;;  %v5073_v5 = vld [vmem:[#allocation5 + $0x2e8] sm:$0xff]  }
  0xe0   : > { %2125 = vmatprep.mubr.bf16.mxu1 %v848_v54  ;;  %4293 = vmatprep.subr.bf16.mxu0 %v5035_v61  ;;  %v5050_v48 = vld [vmem:[#allocation5 + $0x198] sm:$0xff]   ;;  %v5053_v61 = vld [vmem:[#allocation5 + $0x1d0] sm:$0xff]   ;;  %v5061_v26 = vld [vmem:[#allocation5 + $0x1c0] sm:$0xff]  }
  0xe1   : > { %4357 = vmatprep.subr.bf16.mxu1 %v5037_v63  ;;  %v752_v53 = vld [vmem:[%s5832_s14 + $0x598] sm:$0xff]  ;;  %v909_v63 = vpack.c.bf16 %v749_v56, %v733_v55  ;;  %v577_v41 = vld [vmem:[%s5832_s14 + $0x20] sm:$0xff] }
  0xe2   : > { %4294 = vmatpush3.bf16.msra.mxu0 %v5036_v62  ;;  %v912_v54 = vpack.c.bf16 %v752_v53, %v736_v52  ;;  %v5054_v62 = vld [vmem:[#allocation5 + $0x190] sm:$0xff]   ;;  %v580_v33 = vld [vmem:[%s5832_s14 + $0x38] sm:$0xff]  ;;  %v593_v42 = vld [vmem:[%s5832_s14 + $0xa0] sm:$0xff] }
  0xe3   : > { %4358 = vmatpush3.bf16.msra.mxu1 %v5038_v0  ;;  %4295 = vmatprep.subr.bf16.mxu0 %v5039_v12  ;;  %v766_v0 = vld [vmem:[%s5832_s14 + $0x608] sm:$0xff]  ;;  %v596_v34 = vld [vmem:[%s5832_s14 + $0xb8] sm:$0xff]  ;;  %v609_v55 = vld [vmem:[%s5832_s14 + $0x120] sm:$0xff] }
  0xe4   : > { %4359 = vmatprep.subr.bf16.mxu1 %v5041_v15  ;;  %v926_v4 = vpack.c.bf16 %v782_v1, %v766_v0  ;;  %v5056_v12 = vld [vmem:[#allocation5 + $0x108] sm:$0xff]   ;;  %v5063_v36 = vld [vmem:[#allocation5 + $0x278] sm:$0xff]   ;;  %v836_v39 = vpack.c.bf16 %v596_v34, %v580_v33  ;;  %v625_v56 = vld [vmem:[%s5832_s14 + $0x1a0] sm:$0xff] }
  0xe5   : > { %2029 = vmatmul.mubr.bf16.gmra.mxu0 %v845_v58  ;;  %v751_v58 = vld [vmem:[%s5832_s14 + $0x590] sm:$0xff]  ;;  %v798_v15 = vld [vmem:[%s5832_s14 + $0x708] sm:$0xff]  ;;  %v5065_v40 = vld [vmem:[#allocation5 + $0x2f8] sm:$0xff]  }
  0xe6   : > { %2126 = vmatmul.mubr.bf16.gmra.mxu1 %v847_v60  ;;  %2036 = vmatprep.mubr.bf16.mxu0 %v862_v3  ;;  %v5052_v60 = vld [vmem:[#allocation5 + $0x110] sm:$0xff]   ;;  %v911_v3 = vpack.c.bf16 %v751_v58, %v735_v57  ;;  %v628_v49 = vld [vmem:[%s5832_s14 + $0x1b8] sm:$0xff]  ;;  %v658_v0 = vld [vmem:[%s5832_s14 + $0x2a8] sm:$0xff] }
  0xe7   : > { %2133 = vmatprep.mubr.bf16.mxu1 %v864_v7  ;;  %4296 = vmatpush3.bf16.msra.mxu0 %v5040_v14  ;;  %v765_v7 = vld [vmem:[%s5832_s14 + $0x600] sm:$0xff]  ;;  %v5058_v14 = vld [vmem:[#allocation5 + $0x188] sm:$0xff]   ;;  %v5066_v52 = vld [vmem:[#allocation5 + $0x2b8] sm:$0xff]  }
  0xe8   : > { %4360 = vmatpush3.bf16.msra.mxu1 %v5042_v16  ;;  %4297 = vmatprep.subr.bf16.mxu0 %v5043_v27  ;;  %v814_v16 = vld [vmem:[%s5832_s14 + $0x788] sm:$0xff]  ;;  %v925_v19 = vpack.c.bf16 %v781_v8, %v765_v7  ;;  %v813_v27 = vld [vmem:[%s5832_s14 + $0x780] sm:$0xff]  ;;  %v5067_v57 = vld [vmem:[#allocation5 + $0x270] sm:$0xff]  }
  0xe9   : > { %4361 = vmatprep.subr.bf16.mxu1 %v5045_v31  ;;  %v942_v21 = vpack.c.bf16 %v814_v16, %v798_v15  ;;  %v578_v31 = vld [vmem:[%s5832_s14 + $0x28] sm:$0xff]  ;;  %v5068_v58 = vld [vmem:[#allocation5 + $0x230] sm:$0xff]   ;;  %v644_v1 = vld [vmem:[%s5832_s14 + $0x238] sm:$0xff] }
  0xea   : > { %v674_v15 = vld [vmem:[%s5832_s14 + $0x328] sm:$0xff]  ;;  %v5075_v17 = vld [vmem:[#allocation5 + $0x260] sm:$0xff]   ;;  %v676_v18 = vld [vmem:[%s5832_s14 + $0x338] sm:$0xff] }
  0xeb   : > { %4298 = vmatpush3.bf16.msra.mxu0 %v5044_v29  ;;  %v5062_v29 = vld [vmem:[#allocation5 + $0x180] sm:$0xff]   ;;  %v690_v16 = vld [vmem:[%s5832_s14 + $0x3a8] sm:$0xff]  ;;  %v5080_v33 = vld [vmem:[#allocation5 + $0x218] sm:$0xff]  }
  0xec   : > { %4362 = vmatpush3.bf16.msra.mxu1 %v5046_v32  ;;  %4299 = vmatprep.subr.bf16.mxu0 %v5047_v43  ;;  %v594_v32 = vld [vmem:[%s5832_s14 + $0xa8] sm:$0xff]  ;;  %v579_v43 = vld [vmem:[%s5832_s14 + $0x30] sm:$0xff]  ;;  %v5081_v34 = vld [vmem:[#allocation5 + $0x2d8] sm:$0xff]  }
  0xed   : > { %2037 = vmatmul.mubr.bf16.gmra.mxu0 %v861_v11  ;;  %4363 = vmatprep.subr.bf16.mxu1 %v5049_v46  ;;  %v783_v11 = vld [vmem:[%s5832_s14 + $0x690] sm:$0xff]  ;;  %v626_v46 = vld [vmem:[%s5832_s14 + $0x1a8] sm:$0xff] }
  0xee   : > { %2134 = vmatmul.mubr.bf16.gmra.mxu1 %v863_v13  ;;  %2044 = vmatprep.mubr.bf16.mxu0 %v878_v20  ;;  %v5057_v13 = vld [vmem:[#allocation5 + $0x1c8] sm:$0xff]   ;;  %v927_v20 = vpack.c.bf16 %v783_v11, %v767_v10  ;;  %v641_v10 = vld [vmem:[%s5832_s14 + $0x220] sm:$0xff] }
  0xef   : > { %2141 = vmatprep.mubr.bf16.mxu1 %v880_v24  ;;  %4300 = vmatpush3.bf16.msra.mxu0 %v5048_v44  ;;  %v797_v24 = vld [vmem:[%s5832_s14 + $0x700] sm:$0xff]  ;;  %v595_v44 = vld [vmem:[%s5832_s14 + $0xb0] sm:$0xff] }
  0xf0   : > { %4364 = vmatpush3.bf16.msra.mxu1 %v5050_v48  ;;  %4301 = vmatprep.subr.bf16.mxu0 %v5051_v59  ;;  %v941_v35 = vpack.c.bf16 %v813_v27, %v797_v24  ;;  %v833_v48 = vpack.c.bf16 %v593_v42, %v577_v41  ;;  %v835_v50 = vpack.c.bf16 %v595_v44, %v579_v43  ;;  %v5069_v59 = vld [vmem:[#allocation5 + $0x2f0] sm:$0xff]   ;;  %v657_v11 = vld [vmem:[%s5832_s14 + $0x2a0] sm:$0xff] }
  0xf1   : > { %4365 = vmatprep.subr.bf16.mxu1 %v5053_v61  ;;  %v627_v61 = vld [vmem:[%s5832_s14 + $0x1b0] sm:$0xff]  ;;  %v673_v27 = vld [vmem:[%s5832_s14 + $0x320] sm:$0xff] }
  0xf2   : > { %v5083_v43 = vld [vmem:[#allocation5 + $0x250] sm:$0xff]   ;;  %v705_v44 = vld [vmem:[%s5832_s14 + $0x420] sm:$0xff] }
  0xf3   : > { %4302 = vmatpush3.bf16.msra.mxu0 %v5052_v60  ;;  %v611_v60 = vld [vmem:[%s5832_s14 + $0x130] sm:$0xff] }
  0xf4   : > { %4366 = vmatpush3.bf16.msra.mxu1 %v5054_v62  ;;  %4303 = vmatprep.subr.bf16.mxu0 %v5055_v9  ;;  %v5070_v62 = vld [vmem:[#allocation5 + $0x2b0] sm:$0xff]   ;;  %v5072_v9 = vld [vmem:[#allocation5 + $0x228] sm:$0xff]  }
  0xf5   : > { %2045 = vmatmul.mubr.bf16.gmra.mxu0 %v877_v28  ;;  %4367 = vmatprep.subr.bf16.mxu1 %v5057_v13  ;;  %v799_v28 = vld [vmem:[%s5832_s14 + $0x710] sm:$0xff] }
  0xf6   : > { %2142 = vmatmul.mubr.bf16.gmra.mxu1 %v879_v30  ;;  %2052 = vmatprep.mubr.bf16.mxu0 %v894_v37  ;;  %v815_v30 = vld [vmem:[%s5832_s14 + $0x790] sm:$0xff] }
  0xf7   : > { %2149 = vmatprep.mubr.bf16.mxu1 %v896_v38  ;;  %4304 = vmatpush3.bf16.msra.mxu0 %v5056_v12  ;;  %v943_v37 = vpack.c.bf16 %v815_v30, %v799_v28  ;;  %v834_v38 = vpack.c.bf16 %v594_v32, %v578_v31  ;;  %v5074_v12 = vld [vmem:[#allocation5 + $0x2a8] sm:$0xff]   ;;  %v643_v13 = vld [vmem:[%s5832_s14 + $0x230] sm:$0xff]  ;;  %v689_v28 = vld [vmem:[%s5832_s14 + $0x3a0] sm:$0xff] }
  0xf8   : > { %4368 = vmatpush3.bf16.msra.mxu1 %v5058_v14  ;;  %4305 = vmatprep.subr.bf16.mxu0 %v5059_v23  ;;  %v659_v14 = vld [vmem:[%s5832_s14 + $0x2b0] sm:$0xff]  ;;  %v865_v23 = vpack.c.bf16 %v657_v11, %v641_v10  ;;  %v706_v32 = vld [vmem:[%s5832_s14 + $0x428] sm:$0xff] }
  0xf9   : > { %4369 = vmatprep.subr.bf16.mxu1 %v5061_v26  ;;  %v867_v24 = vpack.c.bf16 %v659_v14, %v643_v13  ;;  %v675_v30 = vld [vmem:[%s5832_s14 + $0x330] sm:$0xff]  ;;  %v5094_v14 = vld [vmem:[#allocation5 + $0x280] sm:$0xff]  }
  0xfa   : > { %v691_v31 = vld [vmem:[%s5832_s14 + $0x3b0] sm:$0xff] }
  0xfb   : > { %4306 = vmatpush3.bf16.msra.mxu0 %v5060_v25  ;;  %v882_v25 = vpack.c.bf16 %v690_v16, %v674_v15  ;;  %v769_v15 = vld [vmem:[%s5832_s14 + $0x620] sm:$0xff] }
  0xfc   : > { %4370 = vmatpush3.bf16.msra.mxu1 %v5062_v29  ;;  %4419 = vmatprep.subr.bf16.mxu0 %v5063_v36  ;;  %v5079_v29 = vld [vmem:[#allocation5 + $0x258] sm:$0xff]   ;;  %v785_v16 = vld [vmem:[%s5832_s14 + $0x6a0] sm:$0xff] }
  0xfd   : > { %2053 = vmatmul.mubr.bf16.gmra.mxu0 %v893_v45  ;;  %4483 = vmatprep.subr.bf16.mxu1 %v5065_v40  ;;  %v610_v45 = vld [vmem:[%s5832_s14 + $0x128] sm:$0xff]  ;;  %v5082_v36 = vld [vmem:[#allocation5 + $0x298] sm:$0xff]   ;;  %v883_v40 = vpack.c.bf16 %v691_v31, %v675_v30  ;;  %v817_v30 = vld [vmem:[%s5832_s14 + $0x7a0] sm:$0xff] }
  0xfe   : > { %2150 = vmatmul.mubr.bf16.gmra.mxu1 %v895_v47  ;;  %2060 = vmatprep.mubr.bf16.mxu0 %v910_v51  ;;  %v612_v47 = vld [vmem:[%s5832_s14 + $0x138] sm:$0xff]  ;;  %v850_v53 = vpack.c.bf16 %v626_v46, %v610_v45  ;;  %v5084_v45 = vld [vmem:[#allocation5 + $0x210] sm:$0xff]  }
  0xff   : > { %2157 = vmatprep.mubr.bf16.mxu1 %v912_v54  ;;  %v5064_v51 = vld [vmem:[#allocation5 + $0x238] sm:$0xff]   ;;  %v852_v54 = vpack.c.bf16 %v628_v49, %v612_v47  ;;  %v5085_v46 = vld [vmem:[#allocation5 + $0x2d0] sm:$0xff]   ;;  %v721_v47 = vld [vmem:[%s5832_s14 + $0x4a0] sm:$0xff] }
 0x100   : > { %v5086_v49 = vld [vmem:[#allocation5 + $0x290] sm:$0xff]  }
 0x101   : > { %v803_v31 = vld [vmem:[%s5832_s14 + $0x730] sm:$0xff] }
 0x105   : > { %2061 = vmatmul.mubr.bf16.gmra.mxu0 %v909_v63  ;;  %v642_v63 = vld [vmem:[%s5832_s14 + $0x228] sm:$0xff] }
 0x106   : > { %2158 = vmatmul.mubr.bf16.gmra.mxu1 %v911_v3  ;;  %2068 = vmatprep.mubr.bf16.mxu0 %v926_v4  ;;  %v660_v3 = vld [vmem:[%s5832_s14 + $0x2b8] sm:$0xff]  ;;  %v849_v4 = vpack.c.bf16 %v625_v56, %v609_v55  ;;  %v866_v7 = vpack.c.bf16 %v658_v0, %v642_v63  ;;  %v897_v55 = vpack.c.bf16 %v721_v47, %v705_v44  ;;  %v5087_v56 = vld [vmem:[#allocation5 + $0x248] sm:$0xff]   ;;  %v737_v63 = vld [vmem:[%s5832_s14 + $0x520] sm:$0xff] }
 0x107   : > { %2165 = vmatprep.mubr.bf16.mxu1 %v928_v6  ;;  %v851_v6 = vpack.c.bf16 %v627_v61, %v611_v60  ;;  %v868_v8 = vpack.c.bf16 %v660_v3, %v644_v1  ;;  %v5089_v61 = vld [vmem:[#allocation5 + $0x2c8] sm:$0xff]   ;;  %v753_v0 = vld [vmem:[%s5832_s14 + $0x5a0] sm:$0xff]  ;;  %v739_v1 = vld [vmem:[%s5832_s14 + $0x530] sm:$0xff] }
 0x108   : > { %v770_v3 = vld [vmem:[%s5832_s14 + $0x628] sm:$0xff]  ;;  %v599_v44 = vld [vmem:[%s5832_s14 + $0xd0] sm:$0xff] }
 0x10d   : > { %2069 = vmatmul.mubr.bf16.gmra.mxu0 %v925_v19  ;;  %v692_v19 = vld [vmem:[%s5832_s14 + $0x3b8] sm:$0xff] }
 0x10e   : > { %2166 = vmatmul.mubr.bf16.gmra.mxu1 %v927_v20  ;;  %2076 = vmatprep.mubr.bf16.mxu0 %v942_v21  ;;  %v5076_v20 = vld [vmem:[#allocation5 + $0x220] sm:$0xff]   ;;  %v884_v26 = vpack.c.bf16 %v692_v19, %v676_v18  ;;  %v787_v18 = vld [vmem:[%s5832_s14 + $0x6b0] sm:$0xff]  ;;  %v802_v19 = vld [vmem:[%s5832_s14 + $0x728] sm:$0xff] }
 0x10f   : > { %2173 = vmatprep.mubr.bf16.mxu1 %v944_v22  ;;  %v5077_v21 = vld [vmem:[#allocation5 + $0x2e0] sm:$0xff]  }
 0x110   : > { %v5078_v22 = vld [vmem:[#allocation5 + $0x2a0] sm:$0xff]  }
 0x115   : > { %2077 = vmatmul.mubr.bf16.gmra.mxu0 %v941_v35  ;;  %v722_v35 = vld [vmem:[%s5832_s14 + $0x4a8] sm:$0xff] }
 0x116   : > { %2174 = vmatmul.mubr.bf16.gmra.mxu1 %v943_v37  ;;  %2214 = vmatprep.mubr.bf16.mxu0 %v834_v38  ;;  %v708_v37 = vld [vmem:[%s5832_s14 + $0x438] sm:$0xff]  ;;  %v898_v41 = vpack.c.bf16 %v722_v35, %v706_v32  ;;  %v819_v32 = vld [vmem:[%s5832_s14 + $0x7b0] sm:$0xff] }
 0x117   : > { %2311 = vmatprep.mubr.bf16.mxu1 %v836_v39  ;;  %v724_v38 = vld [vmem:[%s5832_s14 + $0x4b8] sm:$0xff]  ;;  %v881_v39 = vpack.c.bf16 %v689_v28, %v673_v27 }
 0x118   : > { %v900_v42 = vpack.c.bf16 %v724_v38, %v708_v37  ;;  %v584_v35 = vld [vmem:[%s5832_s14 + $0x58] sm:$0xff]  ;;  %v947_v38 = vpack.c.bf16 %v819_v32, %v803_v31  ;;  %v693_v31 = vld [vmem:[%s5832_s14 + $0x3c0] sm:$0xff] }
 0x119   : > { %v5114_v32 = vld [vmem:[#allocation5 + $0x398] sm:$0xff]  }
 0x11d   : > { %2215 = vmatmul.mubr.bf16.vlgmr.msra.gmra.mxu0 %v833_v48  ;;  %v707_v48 = vld [vmem:[%s5832_s14 + $0x430] sm:$0xff] }
 0x11e   : > { %2312 = vmatmul.mubr.bf16.vlgmr.msra.gmra.mxu1 %v835_v50  ;;  %4420 = vmatpush3.bf16.msra.mxu0 %v5064_v51  ;;  %v723_v50 = vld [vmem:[%s5832_s14 + $0x4b0] sm:$0xff]  ;;  %v738_v51 = vld [vmem:[%s5832_s14 + $0x528] sm:$0xff] }
 0x11f   : > { %4484 = vmatpush3.bf16.msra.mxu1 %v5066_v52  ;;  %2222 = vmatprep.mubr.bf16.mxu0 %v850_v53  ;;  %v754_v52 = vld [vmem:[%s5832_s14 + $0x5a8] sm:$0xff]  ;;  %v740_v53 = vld [vmem:[%s5832_s14 + $0x538] sm:$0xff] }
 0x120   : > { %2319 = vmatprep.mubr.bf16.mxu1 %v852_v54  ;;  %4421 = vmatprep.subr.bf16.mxu0 %v5067_v57  ;;  %v756_v54 = vld [vmem:[%s5832_s14 + $0x5b8] sm:$0xff]  ;;  %v899_v57 = vpack.c.bf16 %v723_v50, %v707_v48 }
 0x121   : > { %4485 = vmatprep.subr.bf16.mxu1 %v5069_v59  ;;  %v5088_v59 = vld [vmem:[#allocation5 + $0x208] sm:$0xff]   ;;  %v916_v60 = vpack.c.bf16 %v756_v54, %v740_v53  ;;  %v616_v48 = vld [vmem:[%s5832_s14 + $0x158] sm:$0xff] }
 0x122   : > { %4422 = vmatpush3.bf16.msra.mxu0 %v5068_v58  ;;  %v914_v58 = vpack.c.bf16 %v754_v52, %v738_v51  ;;  %v5096_v51 = vld [vmem:[#allocation5 + $0x338] sm:$0xff]  }
 0x123   : > { %4486 = vmatpush3.bf16.msra.mxu1 %v5070_v62  ;;  %4423 = vmatprep.subr.bf16.mxu0 %v5071_v2  ;;  %v5090_v62 = vld [vmem:[#allocation5 + $0x288] sm:$0xff]   ;;  %v755_v2 = vld [vmem:[%s5832_s14 + $0x5b0] sm:$0xff]  ;;  %v5098_v52 = vld [vmem:[#allocation5 + $0x3b8] sm:$0xff]  }
 0x124   : > { %4487 = vmatprep.subr.bf16.mxu1 %v5073_v5  ;;  %v772_v5 = vld [vmem:[%s5832_s14 + $0x638] sm:$0xff]  ;;  %v915_v10 = vpack.c.bf16 %v755_v2, %v739_v1  ;;  %v5103_v1 = vld [vmem:[#allocation5 + $0x368] sm:$0xff]  }
 0x125   : > { %2223 = vmatmul.mubr.bf16.gmra.mxu0 %v849_v4  ;;  %v786_v4 = vld [vmem:[%s5832_s14 + $0x6a8] sm:$0xff]  ;;  %v648_v2 = vld [vmem:[%s5832_s14 + $0x258] sm:$0xff] }
 0x126   : > { %2320 = vmatmul.mubr.bf16.gmra.mxu1 %v851_v6  ;;  %2230 = vmatprep.mubr.bf16.mxu0 %v866_v7  ;;  %v788_v6 = vld [vmem:[%s5832_s14 + $0x6b8] sm:$0xff]  ;;  %v5091_v7 = vld [vmem:[#allocation5 + $0x240] sm:$0xff]   ;;  %v930_v11 = vpack.c.bf16 %v786_v4, %v770_v3  ;;  %v5105_v4 = vld [vmem:[#allocation5 + $0x3e8] sm:$0xff]  }
 0x127   : > { %2327 = vmatprep.mubr.bf16.mxu1 %v868_v8  ;;  %4424 = vmatpush3.bf16.msra.mxu0 %v5072_v9  ;;  %v913_v8 = vpack.c.bf16 %v753_v0, %v737_v63  ;;  %v5092_v9 = vld [vmem:[#allocation5 + $0x200] sm:$0xff]   ;;  %v932_v13 = vpack.c.bf16 %v788_v6, %v772_v5  ;;  %v646_v63 = vld [vmem:[%s5832_s14 + $0x248] sm:$0xff]  ;;  %v664_v3 = vld [vmem:[%s5832_s14 + $0x2d8] sm:$0xff] }
 0x128   : > { %4488 = vmatpush3.bf16.msra.mxu1 %v5074_v12  ;;  %4425 = vmatprep.subr.bf16.mxu0 %v5075_v17  ;;  %v5093_v12 = vld [vmem:[#allocation5 + $0x2c0] sm:$0xff]   ;;  %v771_v17 = vld [vmem:[%s5832_s14 + $0x630] sm:$0xff]  ;;  %v662_v0 = vld [vmem:[%s5832_s14 + $0x2c8] sm:$0xff] }
 0x129   : > { %4489 = vmatprep.subr.bf16.mxu1 %v5077_v21  ;;  %v804_v21 = vld [vmem:[%s5832_s14 + $0x738] sm:$0xff] }
 0x12b   : > { %4426 = vmatpush3.bf16.msra.mxu0 %v5076_v20  ;;  %v818_v20 = vld [vmem:[%s5832_s14 + $0x7a8] sm:$0xff] }
 0x12c   : > { %4490 = vmatpush3.bf16.msra.mxu1 %v5078_v22  ;;  %4427 = vmatprep.subr.bf16.mxu0 %v5079_v29  ;;  %v5095_v22 = vld [vmem:[#allocation5 + $0x378] sm:$0xff]   ;;  %v946_v27 = vpack.c.bf16 %v818_v20, %v802_v19  ;;  %v801_v29 = vld [vmem:[%s5832_s14 + $0x720] sm:$0xff] }
 0x12d   : > { %2231 = vmatmul.mubr.bf16.gmra.mxu0 %v865_v23  ;;  %4491 = vmatprep.subr.bf16.mxu1 %v5081_v34  ;;  %v820_v23 = vld [vmem:[%s5832_s14 + $0x7b8] sm:$0xff]  ;;  %v598_v34 = vld [vmem:[%s5832_s14 + $0xc8] sm:$0xff]  ;;  %v945_v37 = vpack.c.bf16 %v817_v30, %v801_v29  ;;  %v677_v30 = vld [vmem:[%s5832_s14 + $0x340] sm:$0xff] }
 0x12e   : > { %2328 = vmatmul.mubr.bf16.gmra.mxu1 %v867_v24  ;;  %2238 = vmatprep.mubr.bf16.mxu0 %v882_v25  ;;  %v929_v24 = vpack.c.bf16 %v785_v16, %v769_v15  ;;  %v5097_v25 = vld [vmem:[#allocation5 + $0x3f8] sm:$0xff]   ;;  %v948_v28 = vpack.c.bf16 %v820_v23, %v804_v21  ;;  %v663_v15 = vld [vmem:[%s5832_s14 + $0x2d0] sm:$0xff]  ;;  %v678_v16 = vld [vmem:[%s5832_s14 + $0x348] sm:$0xff] }
 0x12f   : > { %2335 = vmatprep.mubr.bf16.mxu1 %v884_v26  ;;  %4428 = vmatpush3.bf16.msra.mxu0 %v5080_v33  ;;  %v931_v26 = vpack.c.bf16 %v787_v18, %v771_v17  ;;  %v582_v33 = vld [vmem:[%s5832_s14 + $0x48] sm:$0xff]  ;;  %v5109_v17 = vld [vmem:[#allocation5 + $0x3e0] sm:$0xff]   ;;  %v680_v19 = vld [vmem:[%s5832_s14 + $0x358] sm:$0xff] }
 0x130   : > { %4492 = vmatpush3.bf16.msra.mxu1 %v5082_v36  ;;  %4429 = vmatprep.subr.bf16.mxu0 %v5083_v43  ;;  %v600_v36 = vld [vmem:[%s5832_s14 + $0xd8] sm:$0xff]  ;;  %v583_v43 = vld [vmem:[%s5832_s14 + $0x50] sm:$0xff]  ;;  %v694_v18 = vld [vmem:[%s5832_s14 + $0x3c8] sm:$0xff] }
 0x131   : > { %4493 = vmatprep.subr.bf16.mxu1 %v5085_v46  ;;  %v630_v46 = vld [vmem:[%s5832_s14 + $0x1c8] sm:$0xff]  ;;  %v839_v50 = vpack.c.bf16 %v599_v44, %v583_v43  ;;  %v696_v20 = vld [vmem:[%s5832_s14 + $0x3d8] sm:$0xff]  ;;  %v5108_v21 = vld [vmem:[#allocation5 + $0x320] sm:$0xff]   ;;  %v885_v44 = vpack.c.bf16 %v693_v31, %v677_v30 }
 0x132   : > { %v5111_v23 = vld [vmem:[#allocation5 + $0x358] sm:$0xff]   ;;  %v5119_v43 = vld [vmem:[#allocation5 + $0x348] sm:$0xff]   ;;  %v823_v30 = vld [vmem:[%s5832_s14 + $0x7d0] sm:$0xff] }
 0x133   : > { %4430 = vmatpush3.bf16.msra.mxu0 %v5084_v45  ;;  %v614_v45 = vld [vmem:[%s5832_s14 + $0x148] sm:$0xff]  ;;  %v5112_v29 = vld [vmem:[#allocation5 + $0x318] sm:$0xff]  }
 0x134   : > { %4494 = vmatpush3.bf16.msra.mxu1 %v5086_v49  ;;  %4431 = vmatprep.subr.bf16.mxu0 %v5087_v56  ;;  %v632_v49 = vld [vmem:[%s5832_s14 + $0x1d8] sm:$0xff]  ;;  %v854_v53 = vpack.c.bf16 %v630_v46, %v614_v45  ;;  %v629_v56 = vld [vmem:[%s5832_s14 + $0x1c0] sm:$0xff]  ;;  %v5121_v45 = vld [vmem:[#allocation5 + $0x3c8] sm:$0xff]  }
 0x135   : > { %2239 = vmatmul.mubr.bf16.gmra.mxu0 %v881_v39  ;;  %4495 = vmatprep.subr.bf16.mxu1 %v5089_v61  ;;  %v838_v39 = vpack.c.bf16 %v598_v34, %v582_v33  ;;  %v856_v54 = vpack.c.bf16 %v632_v49, %v616_v48  ;;  %v5100_v61 = vld [vmem:[#allocation5 + $0x330] sm:$0xff]   ;;  %v5120_v49 = vld [vmem:[#allocation5 + $0x308] sm:$0xff]  }
 0x136   : > { %2336 = vmatmul.mubr.bf16.gmra.mxu1 %v883_v40  ;;  %2246 = vmatprep.mubr.bf16.mxu0 %v898_v41  ;;  %v840_v40 = vpack.c.bf16 %v600_v36, %v584_v35  ;;  %v581_v41 = vld [vmem:[%s5832_s14 + $0x40] sm:$0xff]  ;;  %v5115_v33 = vld [vmem:[#allocation5 + $0x350] sm:$0xff]   ;;  %v710_v36 = vld [vmem:[%s5832_s14 + $0x448] sm:$0xff] }
 0x137   : > { %2343 = vmatprep.mubr.bf16.mxu1 %v900_v42  ;;  %4432 = vmatpush3.bf16.msra.mxu0 %v5088_v59  ;;  %v597_v42 = vld [vmem:[%s5832_s14 + $0xc0] sm:$0xff]  ;;  %v5101_v59 = vld [vmem:[#allocation5 + $0x3f0] sm:$0xff]   ;;  %v586_v31 = vld [vmem:[%s5832_s14 + $0x68] sm:$0xff] }
 0x138   : > { %4496 = vmatpush3.bf16.msra.mxu1 %v5090_v62  ;;  %4433 = vmatprep.subr.bf16.mxu0 %v5091_v7  ;;  %v837_v47 = vpack.c.bf16 %v597_v42, %v581_v41  ;;  %v5102_v62 = vld [vmem:[#allocation5 + $0x3b0] sm:$0xff]   ;;  %v870_v7 = vpack.c.bf16 %v662_v0, %v646_v63 }
 0x139   : > { %4497 = vmatprep.subr.bf16.mxu1 %v5093_v12  ;;  %v661_v12 = vld [vmem:[%s5832_s14 + $0x2c0] sm:$0xff]  ;;  %v679_v34 = vld [vmem:[%s5832_s14 + $0x350] sm:$0xff] }
 0x13a   : > { %v695_v35 = vld [vmem:[%s5832_s14 + $0x3d0] sm:$0xff] }
 0x13b   : > { %4434 = vmatpush3.bf16.msra.mxu0 %v5092_v9  ;;  %v872_v9 = vpack.c.bf16 %v664_v3, %v648_v2  ;;  %v5116_v41 = vld [vmem:[#allocation5 + $0x310] sm:$0xff]   ;;  %v887_v46 = vpack.c.bf16 %v695_v35, %v679_v34  ;;  %v741_v3 = vld [vmem:[%s5832_s14 + $0x540] sm:$0xff]  ;;  %v604_v34 = vld [vmem:[%s5832_s14 + $0xf8] sm:$0xff] }
 0x13c   : > { %4498 = vmatpush3.bf16.msra.mxu1 %v5094_v14  ;;  %4547 = vmatprep.subr.bf16.mxu0 %v5095_v22  ;;  %v647_v14 = vld [vmem:[%s5832_s14 + $0x250] sm:$0xff]  ;;  %v5110_v22 = vld [vmem:[#allocation5 + $0x3a0] sm:$0xff]  }
 0x13d   : > { %2247 = vmatmul.mubr.bf16.gmra.mxu0 %v897_v55  ;;  %4611 = vmatprep.subr.bf16.mxu1 %v5097_v25  ;;  %v613_v55 = vld [vmem:[%s5832_s14 + $0x140] sm:$0xff]  ;;  %v5113_v25 = vld [vmem:[#allocation5 + $0x3d8] sm:$0xff]   ;;  %v5118_v42 = vld [vmem:[#allocation5 + $0x390] sm:$0xff]  }
 0x13e   : > { %2344 = vmatmul.mubr.bf16.gmra.mxu1 %v899_v57  ;;  %2254 = vmatprep.mubr.bf16.mxu0 %v914_v58  ;;  %v5099_v57 = vld [vmem:[#allocation5 + $0x370] sm:$0xff]   ;;  %v853_v5 = vpack.c.bf16 %v629_v56, %v613_v55  ;;  %v742_v55 = vld [vmem:[%s5832_s14 + $0x548] sm:$0xff] }
 0x13f   : > { %2351 = vmatprep.mubr.bf16.mxu1 %v916_v60  ;;  %v615_v58 = vld [vmem:[%s5832_s14 + $0x150] sm:$0xff]  ;;  %v758_v56 = vld [vmem:[%s5832_s14 + $0x5c8] sm:$0xff] }
 0x140   : > { %v631_v60 = vld [vmem:[%s5832_s14 + $0x1d0] sm:$0xff] }
 0x141   : > { %v855_v6 = vpack.c.bf16 %v631_v60, %v615_v58  ;;  %v744_v58 = vld [vmem:[%s5832_s14 + $0x558] sm:$0xff]  ;;  %v5124_v60 = vld [vmem:[#allocation5 + $0x300] sm:$0xff]  }
 0x145   : > { %2255 = vmatmul.mubr.bf16.gmra.mxu0 %v913_v8  ;;  %v5104_v8 = vld [vmem:[#allocation5 + $0x328] sm:$0xff]  }
 0x146   : > { %2352 = vmatmul.mubr.bf16.gmra.mxu1 %v915_v10  ;;  %2262 = vmatprep.mubr.bf16.mxu0 %v930_v11  ;;  %v5106_v10 = vld [vmem:[#allocation5 + $0x3a8] sm:$0xff]   ;;  %v645_v11 = vld [vmem:[%s5832_s14 + $0x240] sm:$0xff] }
 0x147   : > { %2359 = vmatprep.mubr.bf16.mxu1 %v932_v13  ;;  %v5107_v13 = vld [vmem:[#allocation5 + $0x360] sm:$0xff]  }
 0x14d   : > { %2263 = vmatmul.mubr.bf16.gmra.mxu0 %v929_v24  ;;  %v869_v24 = vpack.c.bf16 %v661_v12, %v645_v11 }
 0x14e   : > { %2360 = vmatmul.mubr.bf16.gmra.mxu1 %v931_v26  ;;  %2270 = vmatprep.mubr.bf16.mxu0 %v946_v27  ;;  %v871_v26 = vpack.c.bf16 %v663_v15, %v647_v14  ;;  %v886_v27 = vpack.c.bf16 %v694_v18, %v678_v16  ;;  %v773_v15 = vld [vmem:[%s5832_s14 + $0x640] sm:$0xff]  ;;  %v791_v18 = vld [vmem:[%s5832_s14 + $0x6d0] sm:$0xff] }
 0x14f   : > { %2367 = vmatprep.mubr.bf16.mxu1 %v948_v28  ;;  %v888_v28 = vpack.c.bf16 %v696_v20, %v680_v19  ;;  %v789_v16 = vld [vmem:[%s5832_s14 + $0x6c0] sm:$0xff]  ;;  %v806_v19 = vld [vmem:[%s5832_s14 + $0x748] sm:$0xff] }
 0x150   : > { %v822_v20 = vld [vmem:[%s5832_s14 + $0x7c8] sm:$0xff] }
 0x155   : > { %2271 = vmatmul.mubr.bf16.gmra.mxu0 %v945_v37  ;;  %v726_v37 = vld [vmem:[%s5832_s14 + $0x4c8] sm:$0xff] }
 0x156   : > { %2368 = vmatmul.mubr.bf16.gmra.mxu1 %v947_v38  ;;  %2408 = vmatprep.mubr.bf16.mxu0 %v838_v39  ;;  %v5117_v38 = vld [vmem:[#allocation5 + $0x3d0] sm:$0xff]   ;;  %v712_v39 = vld [vmem:[%s5832_s14 + $0x458] sm:$0xff] }
 0x157   : > { %2505 = vmatprep.mubr.bf16.mxu1 %v840_v40  ;;  %v728_v40 = vld [vmem:[%s5832_s14 + $0x4d8] sm:$0xff] }
 0x158   : > { %v904_v48 = vpack.c.bf16 %v728_v40, %v712_v39  ;;  %v585_v39 = vld [vmem:[%s5832_s14 + $0x60] sm:$0xff] }
 0x159   : > { %v601_v40 = vld [vmem:[%s5832_s14 + $0xe0] sm:$0xff] }
 0x15d   : > { %2409 = vmatmul.mubr.bf16.vlgmr.msra.gmra.mxu0 %v837_v47  ;;  %v902_v47 = vpack.c.bf16 %v726_v37, %v710_v36 }
 0x15e   : > { %2506 = vmatmul.mubr.bf16.vlgmr.msra.gmra.mxu1 %v839_v50  ;;  %4548 = vmatpush3.bf16.msra.mxu0 %v5096_v51  ;;  %v709_v50 = vld [vmem:[%s5832_s14 + $0x440] sm:$0xff] }
 0x15f   : > { %4612 = vmatpush3.bf16.msra.mxu1 %v5098_v52  ;;  %2416 = vmatprep.mubr.bf16.mxu0 %v854_v53  ;;  %v725_v51 = vld [vmem:[%s5832_s14 + $0x4c0] sm:$0xff]  ;;  %v5122_v52 = vld [vmem:[#allocation5 + $0x388] sm:$0xff]   ;;  %v711_v53 = vld [vmem:[%s5832_s14 + $0x450] sm:$0xff] }
 0x160   : > { %2513 = vmatprep.mubr.bf16.mxu1 %v856_v54  ;;  %4549 = vmatprep.subr.bf16.mxu0 %v5099_v57  ;;  %v727_v54 = vld [vmem:[%s5832_s14 + $0x4d0] sm:$0xff]  ;;  %v5123_v57 = vld [vmem:[#allocation5 + $0x340] sm:$0xff]   ;;  %v901_v63 = vpack.c.bf16 %v725_v51, %v709_v50 }
 0x161   : > { %4613 = vmatprep.subr.bf16.mxu1 %v5101_v59  ;;  %v760_v59 = vld [vmem:[%s5832_s14 + $0x5d8] sm:$0xff]  ;;  %v903_v0 = vpack.c.bf16 %v727_v54, %v711_v53  ;;  %v617_v54 = vld [vmem:[%s5832_s14 + $0x160] sm:$0xff] }
 0x162   : > { %4550 = vmatpush3.bf16.msra.mxu0 %v5100_v61  ;;  %v5125_v61 = vld [vmem:[#allocation5 + $0x3c0] sm:$0xff]   ;;  %v920_v2 = vpack.c.bf16 %v760_v59, %v744_v58  ;;  %v635_v58 = vld [vmem:[%s5832_s14 + $0x1f0] sm:$0xff]  ;;  %v650_v59 = vld [vmem:[%s5832_s14 + $0x268] sm:$0xff] }
 0x163   : > { %4614 = vmatpush3.bf16.msra.mxu1 %v5102_v62  ;;  %4551 = vmatprep.subr.bf16.mxu0 %v5103_v1  ;;  %v5126_v62 = vld [vmem:[#allocation5 + $0x380] sm:$0xff]   ;;  %v918_v1 = vpack.c.bf16 %v758_v56, %v742_v55  ;;  %v619_v56 = vld [vmem:[%s5832_s14 + $0x170] sm:$0xff] }
 0x164   : > { %4615 = vmatprep.subr.bf16.mxu1 %v5105_v4  ;;  %v757_v4 = vld [vmem:[%s5832_s14 + $0x5c0] sm:$0xff] }
 0x165   : > { %2417 = vmatmul.mubr.bf16.gmra.mxu0 %v853_v5  ;;  %v743_v5 = vld [vmem:[%s5832_s14 + $0x550] sm:$0xff]  ;;  %v917_v11 = vpack.c.bf16 %v757_v4, %v741_v3  ;;  %v633_v55 = vld [vmem:[%s5832_s14 + $0x1e0] sm:$0xff] }
 0x166   : > { %2514 = vmatmul.mubr.bf16.gmra.mxu1 %v855_v6  ;;  %2424 = vmatprep.mubr.bf16.mxu0 %v870_v7  ;;  %v759_v6 = vld [vmem:[%s5832_s14 + $0x5d0] sm:$0xff]  ;;  %v774_v7 = vld [vmem:[%s5832_s14 + $0x648] sm:$0xff]  ;;  %v857_v3 = vpack.c.bf16 %v633_v55, %v617_v54 }
 0x167   : > { %2521 = vmatprep.mubr.bf16.mxu1 %v872_v9  ;;  %4552 = vmatpush3.bf16.msra.mxu0 %v5104_v8  ;;  %v790_v8 = vld [vmem:[%s5832_s14 + $0x6c8] sm:$0xff]  ;;  %v776_v9 = vld [vmem:[%s5832_s14 + $0x658] sm:$0xff]  ;;  %v919_v12 = vpack.c.bf16 %v759_v6, %v743_v5  ;;  %v859_v6 = vpack.c.bf16 %v635_v58, %v619_v56 }
 0x168   : > { %4616 = vmatpush3.bf16.msra.mxu1 %v5106_v10  ;;  %4553 = vmatprep.subr.bf16.mxu0 %v5107_v13  ;;  %v792_v10 = vld [vmem:[%s5832_s14 + $0x6d8] sm:$0xff]  ;;  %v934_v13 = vpack.c.bf16 %v790_v8, %v774_v7 }
 0x169   : > { %4617 = vmatprep.subr.bf16.mxu1 %v5109_v17  ;;  %v936_v14 = vpack.c.bf16 %v792_v10, %v776_v9  ;;  %v775_v17 = vld [vmem:[%s5832_s14 + $0x650] sm:$0xff]  ;;  %v716_v56 = vld [vmem:[%s5832_s14 + $0x478] sm:$0xff] }
 0x16b   : > { %4554 = vmatpush3.bf16.msra.mxu0 %v5108_v21  ;;  %v808_v21 = vld [vmem:[%s5832_s14 + $0x758] sm:$0xff] }
 0x16c   : > { %4618 = vmatpush3.bf16.msra.mxu1 %v5110_v22  ;;  %4555 = vmatprep.subr.bf16.mxu0 %v5111_v23  ;;  %v824_v22 = vld [vmem:[%s5832_s14 + $0x7d8] sm:$0xff]  ;;  %v933_v23 = vpack.c.bf16 %v789_v16, %v773_v15 }
 0x16d   : > { %2425 = vmatmul.mubr.bf16.gmra.mxu0 %v869_v24  ;;  %4619 = vmatprep.subr.bf16.mxu1 %v5113_v25  ;;  %v935_v24 = vpack.c.bf16 %v791_v18, %v775_v17  ;;  %v950_v25 = vpack.c.bf16 %v822_v20, %v806_v19  ;;  %v649_v17 = vld [vmem:[%s5832_s14 + $0x260] sm:$0xff]  ;;  %v651_v19 = vld [vmem:[%s5832_s14 + $0x270] sm:$0xff] }
 0x16e   : > { %2522 = vmatmul.mubr.bf16.gmra.mxu1 %v871_v26  ;;  %2432 = vmatprep.mubr.bf16.mxu0 %v886_v27  ;;  %v952_v26 = vpack.c.bf16 %v824_v22, %v808_v21  ;;  %v805_v27 = vld [vmem:[%s5832_s14 + $0x740] sm:$0xff]  ;;  %v667_v21 = vld [vmem:[%s5832_s14 + $0x2f0] sm:$0xff]  ;;  %v682_v22 = vld [vmem:[%s5832_s14 + $0x368] sm:$0xff] }
 0x16f   : > { %2529 = vmatprep.mubr.bf16.mxu1 %v888_v28  ;;  %4556 = vmatpush3.bf16.msra.mxu0 %v5112_v29  ;;  %v821_v28 = vld [vmem:[%s5832_s14 + $0x7c0] sm:$0xff]  ;;  %v807_v29 = vld [vmem:[%s5832_s14 + $0x750] sm:$0xff] }
 0x170   : > { %4620 = vmatpush3.bf16.msra.mxu1 %v5114_v32  ;;  %4557 = vmatprep.subr.bf16.mxu0 %v5115_v33  ;;  %v602_v32 = vld [vmem:[%s5832_s14 + $0xe8] sm:$0xff]  ;;  %v588_v33 = vld [vmem:[%s5832_s14 + $0x78] sm:$0xff]  ;;  %v949_v35 = vpack.c.bf16 %v821_v28, %v805_v27  ;;  %v951_v36 = vpack.c.bf16 %v823_v30, %v807_v29  ;;  %v665_v18 = vld [vmem:[%s5832_s14 + $0x2e0] sm:$0xff] }
 0x171   : > { %4621 = vmatprep.subr.bf16.mxu1 %v5117_v38  ;;  %v842_v37 = vpack.c.bf16 %v602_v32, %v586_v31  ;;  %v844_v38 = vpack.c.bf16 %v604_v34, %v588_v33  ;;  %v684_v27 = vld [vmem:[%s5832_s14 + $0x378] sm:$0xff]  ;;  %v873_v31 = vpack.c.bf16 %v665_v18, %v649_v17  ;;  %v875_v34 = vpack.c.bf16 %v667_v21, %v651_v19  ;;  %v762_v17 = vld [vmem:[%s5832_s14 + $0x5e8] sm:$0xff] }
 0x172   : > { %v700_v28 = vld [vmem:[%s5832_s14 + $0x3f8] sm:$0xff] }
 0x173   : > { %4558 = vmatpush3.bf16.msra.mxu0 %v5116_v41  ;;  %v587_v41 = vld [vmem:[%s5832_s14 + $0x70] sm:$0xff]  ;;  %v748_v21 = vld [vmem:[%s5832_s14 + $0x578] sm:$0xff] }
 0x174   : > { %4622 = vmatpush3.bf16.msra.mxu1 %v5118_v42  ;;  %4559 = vmatprep.subr.bf16.mxu0 %v5119_v43  ;;  %v603_v42 = vld [vmem:[%s5832_s14 + $0xf0] sm:$0xff]  ;;  %v618_v43 = vld [vmem:[%s5832_s14 + $0x168] sm:$0xff] }
 0x175   : > { %2433 = vmatmul.mubr.bf16.gmra.mxu0 %v885_v44  ;;  %4623 = vmatprep.subr.bf16.mxu1 %v5121_v45  ;;  %v634_v44 = vld [vmem:[%s5832_s14 + $0x1e8] sm:$0xff]  ;;  %v620_v45 = vld [vmem:[%s5832_s14 + $0x178] sm:$0xff] }
 0x176   : > { %2530 = vmatmul.mubr.bf16.gmra.mxu1 %v887_v46  ;;  %2440 = vmatprep.mubr.bf16.mxu0 %v902_v47  ;;  %v636_v46 = vld [vmem:[%s5832_s14 + $0x1f8] sm:$0xff]  ;;  %v841_v47 = vpack.c.bf16 %v601_v40, %v585_v39 }
 0x177   : > { %2537 = vmatprep.mubr.bf16.mxu1 %v904_v48  ;;  %4560 = vmatpush3.bf16.msra.mxu0 %v5120_v49  ;;  %v843_v48 = vpack.c.bf16 %v603_v42, %v587_v41  ;;  %v858_v49 = vpack.c.bf16 %v634_v44, %v618_v43  ;;  %v860_v50 = vpack.c.bf16 %v636_v46, %v620_v45  ;;  %v681_v45 = vld [vmem:[%s5832_s14 + $0x360] sm:$0xff] }
 0x178   : > { %4624 = vmatpush3.bf16.msra.mxu1 %v5122_v52  ;;  %4561 = vmatprep.subr.bf16.mxu0 %v5123_v57  ;;  %v6058_v52 = vld [vmem:[#allocation7] ss:$0 sm:$0xff] }
 0x179   : > { %4625 = vmatprep.subr.bf16.mxu1 %v5125_v61  ;;  %v697_v46 = vld [vmem:[%s5832_s14 + $0x3e0] sm:$0xff] }
 0x17b   : > { %4562 = vmatpush3.bf16.msra.mxu0 %v5124_v60  ;;  %v666_v60 = vld [vmem:[%s5832_s14 + $0x2e8] sm:$0xff] }
 0x17c   : > { %4626 = vmatpush3.bf16.msra.mxu1 %v5126_v62  ;;  %v874_v7 = vpack.c.bf16 %v666_v60, %v650_v59  ;;  %v889_v60 = vpack.c.bf16 %v697_v46, %v681_v45  ;;  %v763_v45 = vld [vmem:[%s5832_s14 + $0x5f0] sm:$0xff]  ;;  %v778_v46 = vld [vmem:[%s5832_s14 + $0x668] sm:$0xff] }
 0x17d   : > { %2441 = vmatmul.mubr.bf16.gmra.mxu0 %v901_v63  ;;  %v652_v63 = vld [vmem:[%s5832_s14 + $0x278] sm:$0xff] }
 0x17e   : > { %2538 = vmatmul.mubr.bf16.gmra.mxu1 %v903_v0  ;;  %2448 = vmatprep.mubr.bf16.mxu0 %v918_v1  ;;  %v668_v0 = vld [vmem:[%s5832_s14 + $0x2f8] sm:$0xff] }
 0x17f   : > { %2545 = vmatprep.mubr.bf16.mxu1 %v920_v2  ;;  %v876_v9 = vpack.c.bf16 %v668_v0, %v652_v63 }
 0x185   : > { %2449 = vmatmul.mubr.bf16.gmra.mxu0 %v917_v11 }
 0x186   : > { %2546 = vmatmul.mubr.bf16.gmra.mxu1 %v919_v12  ;;  %2456 = vmatprep.mubr.bf16.mxu0 %v934_v13 }
 0x187   : > { %2553 = vmatprep.mubr.bf16.mxu1 %v936_v14 }
 0x18d   : > { %2457 = vmatmul.mubr.bf16.gmra.mxu0 %v933_v23  ;;  %v698_v23 = vld [vmem:[%s5832_s14 + $0x3e8] sm:$0xff] }
 0x18e   : > { %2554 = vmatmul.mubr.bf16.gmra.mxu1 %v935_v24  ;;  %2464 = vmatprep.mubr.bf16.mxu0 %v950_v25 }
 0x18f   : > { %2561 = vmatprep.mubr.bf16.mxu1 %v952_v26 }
 0x195   : > { %2465 = vmatmul.mubr.bf16.gmra.mxu0 %v949_v35  ;;  %v890_v35 = vpack.c.bf16 %v698_v23, %v682_v22  ;;  %v764_v22 = vld [vmem:[%s5832_s14 + $0x5f8] sm:$0xff] }
 0x196   : > { %2562 = vmatmul.mubr.bf16.gmra.mxu1 %v951_v36  ;;  %2602 = vmatprep.mubr.bf16.mxu0 %v842_v37  ;;  %v892_v37 = vpack.c.bf16 %v700_v28, %v684_v27 }
 0x197   : > { %2699 = vmatprep.mubr.bf16.mxu1 %v844_v38 }
 0x19d   : > { %v4179_v51 = vpop.f32.mrf.mxu0  ;;  %2603 = vmatmul.mubr.bf16.vlgmr.msra.gmra.mxu0 %v841_v47  ;;  %v683_v47 = vld [vmem:[%s5832_s14 + $0x370] sm:$0xff] }
 0x19e   : > { %v4243_v53 = vpop.f32.mrf.mxu1  ;;  %2700 = vmatmul.mubr.bf16.vlgmr.msra.gmra.mxu1 %v843_v48  ;;  %2610 = vmatprep.mubr.bf16.mxu0 %v858_v49  ;;  %v699_v49 = vld [vmem:[%s5832_s14 + $0x3f0] sm:$0xff] }
 0x19f   : > { %v4180_v57 = vpop.f32.mrf.mxu0  ;;  %2707 = vmatprep.mubr.bf16.mxu1 %v860_v50  ;;  %v714_v50 = vld [vmem:[%s5832_s14 + $0x468] sm:$0xff]  ;;  %v891_v63 = vpack.c.bf16 %v699_v49, %v683_v47 }
 0x1a0   : > { %v4181_v61 = vadd.f32 %v4180_v57, %v4179_v51  ;;  %v4244_v62 = vpop.f32.mrf.mxu1  ;;  %v730_v51 = vld [vmem:[%s5832_s14 + $0x4e8] sm:$0xff]  ;;  %v732_v57 = vld [vmem:[%s5832_s14 + $0x4f8] sm:$0xff] }
 0x1a1   : > { %v4245_v1 = vadd.f32 %v4244_v62, %v4243_v53  ;;  %v4182_v2 = vpop.f32.mrf.mxu0  ;;  %v906_v0 = vpack.c.bf16 %v730_v51, %v714_v50  ;;  %v794_v47 = vld [vmem:[%s5832_s14 + $0x6e8] sm:$0xff]  ;;  %v780_v51 = vld [vmem:[%s5832_s14 + $0x678] sm:$0xff] }
 0x1a2   : > { %v2023_v4 = vadd.f32 %v4181_v61, %v6058_v52  ;;  %v4246_v5 = vpop.f32.mrf.mxu1 }
 0x1a3   : > { %v4183_v8 = vpop.f32.mrf.mxu0 }
 0x1a4   : > { %v6069_v10 = vadd.f32 %v4245_v1, %v2023_v4  ;;  %v4184_v11 = vadd.f32 %v4183_v8, %v4182_v2  ;;  %v4247_v12 = vpop.f32.mrf.mxu1  ;;  %v908_v2 = vpack.c.bf16 %v732_v57, %v716_v56 }
 0x1a5   : > { %v4248_v13 = vadd.f32 %v4247_v12, %v4246_v5  ;;  %v4185_v14 = vpop.f32.mrf.mxu0  ;;  %2611 = vmatmul.mubr.bf16.gmra.mxu0 %v857_v3  ;;  %v729_v12 = vld [vmem:[%s5832_s14 + $0x4e0] sm:$0xff] }
 0x1a6   : > { %v2026_v15 = vadd.f32 %v4184_v11, %v6058_v52  ;;  %v4249_v16 = vpop.f32.mrf.mxu1  ;;  %2708 = vmatmul.mubr.bf16.gmra.mxu1 %v859_v6  ;;  %2618 = vmatprep.mubr.bf16.mxu0 %v874_v7  ;;  %v713_v11 = vld [vmem:[%s5832_s14 + $0x460] sm:$0xff] }
 0x1a7   : > { %v4186_v20 = vpop.f32.mrf.mxu0  ;;  %2715 = vmatprep.mubr.bf16.mxu1 %v876_v9 }
 0x1a8   : > { %v6078_v24 = vadd.f32 %v4248_v13, %v2026_v15  ;;  %v4187_v25 = vadd.f32 %v4186_v20, %v4185_v14  ;;  %v4250_v26 = vpop.f32.mrf.mxu1  ;;  %v715_v13 = vld [vmem:[%s5832_s14 + $0x470] sm:$0xff] }
 0x1a9   : > { %v4251_v29 = vadd.f32 %v4250_v26, %v4249_v16  ;;  %v4188_v30 = vpop.f32.mrf.mxu0  ;;  %v731_v15 = vld [vmem:[%s5832_s14 + $0x4f0] sm:$0xff]  ;;  %v746_v16 = vld [vmem:[%s5832_s14 + $0x568] sm:$0xff]  ;;  %v905_v26 = vpack.c.bf16 %v729_v12, %v713_v11 }
 0x1aa   : > { %v2031_v32 = vadd.f32 %v4187_v25, %v6058_v52  ;;  %v4252_v33 = vpop.f32.mrf.mxu1  ;;  %v779_v11 = vld [vmem:[%s5832_s14 + $0x670] sm:$0xff] }
 0x1ab   : > { %v4189_v36 = vpop.f32.mrf.mxu0 }
 0x1ac   : > { %v6083_v38 = vadd.f32 %v4251_v29, %v2031_v32  ;;  %v4190_v39 = vadd.f32 %v4189_v36, %v4188_v30  ;;  %v4253_v40 = vpop.f32.mrf.mxu1  ;;  %v907_v29 = vpack.c.bf16 %v731_v15, %v715_v13  ;;  %v922_v30 = vpack.c.bf16 %v762_v17, %v746_v16  ;;  %v795_v13 = vld [vmem:[%s5832_s14 + $0x6f0] sm:$0xff]  ;;  %v826_v15 = vld [vmem:[%s5832_s14 + $0x7e8] sm:$0xff] }
 0x1ad   : > { %v4254_v41 = vadd.f32 %v4253_v40, %v4252_v33  ;;  %v4191_v42 = vpop.f32.mrf.mxu0  ;;  %2619 = vmatmul.mubr.bf16.gmra.mxu0 %v873_v31  ;;  %v924_v32 = vpack.c.bf16 %v764_v22, %v748_v21  ;;  %v828_v21 = vld [vmem:[%s5832_s14 + $0x7f8] sm:$0xff] }
 0x1ae   : > { %v2034_v43 = vadd.f32 %v4190_v39, %v6058_v52  ;;  %v4255_v44 = vpop.f32.mrf.mxu1  ;;  %2716 = vmatmul.mubr.bf16.gmra.mxu1 %v875_v34  ;;  %2626 = vmatprep.mubr.bf16.mxu0 %v890_v35 }
 0x1af   : > { %v4192_v48 = vpop.f32.mrf.mxu0  ;;  %2723 = vmatprep.mubr.bf16.mxu1 %v892_v37 }
 0x1b0   : > { %v6092_v53 = vadd.f32 %v4254_v41, %v2034_v43  ;;  %v4193_v54 = vadd.f32 %v4192_v48, %v4191_v42  ;;  %v4256_v55 = vpop.f32.mrf.mxu1  ;;  %v745_v41 = vld [vmem:[%s5832_s14 + $0x560] sm:$0xff]  ;;  %v747_v43 = vld [vmem:[%s5832_s14 + $0x570] sm:$0xff] }
 0x1b1   : > { %v4257_v58 = vadd.f32 %v4256_v55, %v4255_v44  ;;  %v4194_v59 = vpop.f32.mrf.mxu0  ;;  %v761_v42 = vld [vmem:[%s5832_s14 + $0x5e0] sm:$0xff] }
 0x1b2   : > { %v2039_v61 = vadd.f32 %v4193_v54, %v6058_v52  ;;  %v4258_v62 = vpop.f32.mrf.mxu1  ;;  %v796_v54 = vld [vmem:[%s5832_s14 + $0x6f8] sm:$0xff]  ;;  %v921_v57 = vpack.c.bf16 %v761_v42, %v745_v41  ;;  %v809_v41 = vld [vmem:[%s5832_s14 + $0x760] sm:$0xff] }
 0x1b3   : > { %v4195_v1 = vpop.f32.mrf.mxu0  ;;  %v825_v42 = vld [vmem:[%s5832_s14 + $0x7e0] sm:$0xff] }
 0x1b4   : > { %v6097_v3 = vadd.f32 %v4257_v58, %v2039_v61  ;;  %v4196_v4 = vadd.f32 %v4195_v1, %v4194_v59  ;;  %v4259_v5 = vpop.f32.mrf.mxu1  ;;  %v938_v61 = vpack.c.bf16 %v794_v47, %v778_v46 }
 0x1b5   : > { %v4260_v6 = vadd.f32 %v4259_v5, %v4258_v62  ;;  %v4197_v7 = vpop.f32.mrf.mxu0  ;;  %2627 = vmatmul.mubr.bf16.gmra.mxu0 %v889_v60  ;;  %v923_v60 = vpack.c.bf16 %v763_v45, %v747_v43  ;;  %v827_v45 = vld [vmem:[%s5832_s14 + $0x7f0] sm:$0xff] }
 0x1b6   : > { %v2042_v8 = vadd.f32 %v4196_v4, %v6058_v52  ;;  %v4261_v9 = vpop.f32.mrf.mxu1  ;;  %2724 = vmatmul.mubr.bf16.gmra.mxu1 %v891_v63  ;;  %2634 = vmatprep.mubr.bf16.mxu0 %v906_v0  ;;  %v940_v63 = vpack.c.bf16 %v796_v54, %v780_v51  ;;  %v5128_v51 = vld [vmem:[#allocation8 + $0x38] sm:$0xff]  }
 0x1b7   : > { %v4198_v14 = vpop.f32.mrf.mxu0  ;;  %2731 = vmatprep.mubr.bf16.mxu1 %v908_v2  ;;  %4737 = vmatprep.subr.bf16.mxu1 %v5128_v51 }
 0x1b8   : > { %v6106_v18 = vadd.f32 %v4260_v6, %v2042_v8  ;;  %v4199_v19 = vadd.f32 %v4198_v14, %v4197_v7  ;;  %v4262_v20 = vpop.f32.mrf.mxu1  ;;  %v777_v8 = vld [vmem:[%s5832_s14 + $0x660] sm:$0xff]  ;;  %v810_v14 = vld [vmem:[%s5832_s14 + $0x768] sm:$0xff]  ;;  %4738 = vmatpush3.bf16.msra.mxu1 %v5128_v51 }
 0x1b9   : > { %v4263_v23 = vadd.f32 %v4262_v20, %v4261_v9  ;;  %v4200_v25 = vpop.f32.mrf.mxu0  ;;  %v793_v9 = vld [vmem:[%s5832_s14 + $0x6e0] sm:$0xff]  ;;  %v812_v20 = vld [vmem:[%s5832_s14 + $0x778] sm:$0xff] }
 0x1ba   : > { %v2047_v27 = vadd.f32 %v4199_v19, %v6058_v52  ;;  %v4264_v28 = vpop.f32.mrf.mxu1 }
 0x1bb   : > { %v4201_v31 = vpop.f32.mrf.mxu0 }
 0x1bc   : > { %v6111_v33 = vadd.f32 %v4263_v23, %v2047_v27  ;;  %v4202_v34 = vadd.f32 %v4201_v31, %v4200_v25  ;;  %v4265_v35 = vpop.f32.mrf.mxu1  ;;  %v937_v25 = vpack.c.bf16 %v793_v9, %v777_v8  ;;  %v956_v31 = vpack.c.bf16 %v828_v21, %v812_v20 }
 0x1bd   : > { %v4266_v36 = vadd.f32 %v4265_v35, %v4264_v28  ;;  %v4203_v37 = vpop.f32.mrf.mxu0  ;;  %2635 = vmatmul.mubr.bf16.gmra.mxu0 %v905_v26  ;;  %v939_v28 = vpack.c.bf16 %v795_v13, %v779_v11  ;;  %v5129_v11 = vld [vmem:[#allocation8 + $0x30] sm:$0xff]  }
 0x1be   : > { %v2050_v39 = vadd.f32 %v4202_v34, %v6058_v52  ;;  %v4267_v40 = vpop.f32.mrf.mxu1  ;;  %2732 = vmatmul.mubr.bf16.gmra.mxu1 %v907_v29  ;;  %2642 = vmatprep.mubr.bf16.mxu0 %v922_v30  ;;  %v954_v29 = vpack.c.bf16 %v826_v15, %v810_v14 }
 0x1bf   : > { %v4204_v44 = vpop.f32.mrf.mxu0  ;;  %2739 = vmatprep.mubr.bf16.mxu1 %v924_v32  ;;  %4739 = vmatprep.subr.bf16.mxu1 %v5129_v11 }
 0x1c0   : > { %v6120_v48 = vadd.f32 %v4266_v36, %v2050_v39  ;;  %v4205_v49 = vadd.f32 %v4204_v44, %v4203_v37  ;;  %v4268_v50 = vpop.f32.mrf.mxu1  ;;  %v811_v44 = vld [vmem:[%s5832_s14 + $0x770] sm:$0xff]  ;;  %4740 = vmatpush3.bf16.msra.mxu1 %v5129_v11 }
 0x1c1   : > { %v4269_v55 = vadd.f32 %v4268_v50, %v4267_v40  ;;  %v4206_v56 = vpop.f32.mrf.mxu0  ;;  %v5127_v50 = vld [vmem:[#allocation10 + $0x8] sm:$0xff]  }
 0x1c2   : > { %v2055_v58 = vadd.f32 %v4205_v49, %v6058_v52  ;;  %v4270_v59 = vpop.f32.mrf.mxu1  ;;  %4717 = vmatprep.subr.bf16.mxu0 %v5127_v50 }
 0x1c3   : > { %v4207_v62 = vpop.f32.mrf.mxu0  ;;  %4718 = vmatpush3.bf16.msra.mxu0 %v5127_v50 }
 0x1c4   : > { %v6125_v0 = vadd.f32 %v4269_v55, %v2055_v58  ;;  %v4208_v1 = vadd.f32 %v4207_v62, %v4206_v56  ;;  %v4271_v2 = vpop.f32.mrf.mxu1  ;;  %v953_v56 = vpack.c.bf16 %v825_v42, %v809_v41 }
 0x1c5   : > { %v4209_v4 = vpop.f32.mrf.mxu0  ;;  %2643 = vmatmul.mubr.bf16.gmra.mxu0 %v921_v57  ;;  %v4272_v6 = vadd.f32 %v4271_v2, %v4270_v59  ;;  %v955_v59 = vpack.c.bf16 %v827_v45, %v811_v44  ;;  %v5132_v44 = vld [vmem:[#allocation8 + $0x18] sm:$0xff]  }
 0x1c6   : > { %v2058_v5 = vadd.f32 %v4208_v1, %v6058_v52  ;;  %v4273_v7 = vpop.f32.mrf.mxu1  ;;  %2740 = vmatmul.mubr.bf16.gmra.mxu1 %v923_v60  ;;  %2650 = vmatprep.mubr.bf16.mxu0 %v938_v61 }
 0x1c7   : > { %v4210_v12 = vpop.f32.mrf.mxu0  ;;  %2747 = vmatprep.mubr.bf16.mxu1 %v940_v63 }
 0x1c8   : > { %v6134_v16 = vadd.f32 %v4272_v6, %v2058_v5  ;;  %v4211_v17 = vadd.f32 %v4210_v12, %v4209_v4  ;;  %v4274_v19 = vpop.f32.mrf.mxu1 }
 0x1c9   : > { %v4275_v22 = vadd.f32 %v4274_v19, %v4273_v7  ;;  %v4212_v23 = vpop.f32.mrf.mxu0 }
 0x1ca   : > { %v2063_v26 = vadd.f32 %v4211_v17, %v6058_v52  ;;  %v4276_v27 = vpop.f32.mrf.mxu1 }
 0x1cb   : > { %v4213_v30 = vpop.f32.mrf.mxu0 }
 0x1cc   : > { %v6139_v32 = vadd.f32 %v4275_v22, %v2063_v26  ;;  %v4214_v34 = vadd.f32 %v4213_v30, %v4212_v23  ;;  %v4277_v35 = vpop.f32.mrf.mxu1  ;;  %v5130_v23 = vld [vmem:[#allocation8 + $0x28] sm:$0xff]  }
 0x1cd   : > { %v4215_v36 = vpop.f32.mrf.mxu0  ;;  %2651 = vmatmul.mubr.bf16.gmra.mxu0 %v937_v25  ;;  %v4278_v39 = vadd.f32 %v4277_v35, %v4276_v27  ;;  %4741 = vmatprep.subr.bf16.mxu1 %v5130_v23 }
 0x1ce   : > { %v2066_v37 = vadd.f32 %v4214_v34, %v6058_v52  ;;  %v4279_v40 = vpop.f32.mrf.mxu1  ;;  %2748 = vmatmul.mubr.bf16.gmra.mxu1 %v939_v28  ;;  %2658 = vmatprep.mubr.bf16.mxu0 %v954_v29 }
 0x1cf   : > { %v4216_v43 = vpop.f32.mrf.mxu0  ;;  %2755 = vmatprep.mubr.bf16.mxu1 %v956_v31  ;;  %4742 = vmatpush3.bf16.msra.mxu1 %v5130_v23 }
 0x1d0   : > { %v6146_v46 = vadd.f32 %v4278_v39, %v2066_v37  ;;  %v4217_v47 = vadd.f32 %v4216_v43, %v4215_v36  ;;  %v4280_v49 = vpop.f32.mrf.mxu1  ;;  %v5131_v36 = vld [vmem:[#allocation8 + $0x20] sm:$0xff]  }
 0x1d1   : > { %v4281_v54 = vadd.f32 %v4280_v49, %v4279_v40  ;;  %v4218_v55 = vpop.f32.mrf.mxu0  ;;  %4743 = vmatprep.subr.bf16.mxu1 %v5131_v36 }
 0x1d2   : > { %v2071_v57 = vadd.f32 %v4217_v47, %v6058_v52  ;;  %v4282_v58 = vpop.f32.mrf.mxu1 }
 0x1d3   : > { %v4219_v60 = vpop.f32.mrf.mxu0  ;;  %4744 = vmatpush3.bf16.msra.mxu1 %v5131_v36 }
 0x1d4   : > { %v6149_v61 = vadd.f32 %v4281_v54, %v2071_v57  ;;  %v4220_v62 = vadd.f32 %v4219_v60, %v4218_v55  ;;  %v4283_v63 = vpop.f32.mrf.mxu1  ;;  %4745 = vmatprep.subr.bf16.mxu1 %v5132_v44  ;;  %v5133_v57 = vld [vmem:[#allocation8 + $0x10] sm:$0xff]  }
 0x1d5   : > { %v4221_v1 = vpop.f32.mrf.mxu0  ;;  %2659 = vmatmul.mubr.bf16.gmra.mxu0 %v953_v56  ;;  %v4284_v4 = vadd.f32 %v4283_v63, %v4282_v58 }
 0x1d6   : > { %v2074_v2 = vadd.f32 %v4220_v62, %v6058_v52  ;;  %v4285_v5 = vpop.f32.mrf.mxu1  ;;  %2756 = vmatmul.mubr.bf16.gmra.mxu1 %v955_v59 }
 0x1d7   : > { %v4222_v6 = vpop.f32.mrf.mxu0  ;;  %4746 = vmatpush3.bf16.msra.mxu1 %v5132_v44 }
 0x1d8   : > { %v6152_v7 = vadd.f32 %v4284_v4, %v2074_v2  ;;  %v4223_v8 = vadd.f32 %v4222_v6, %v4221_v1  ;;  %v4286_v9 = vpop.f32.mrf.mxu1  ;;  %4747 = vmatprep.subr.bf16.mxu1 %v5133_v57  ;;  %v5135_v2 = vld [vmem:[#allocation8 + $0x8] sm:$0xff]  }
 0x1d9   : > { %v4287_v12 = vadd.f32 %v4286_v9, %v4285_v5  ;;  %v4224_v13 = vpop.f32.mrf.mxu0 }
 0x1da   : > { %v2079_v14 = vadd.f32 %v4223_v8, %v6058_v52  ;;  %v4288_v15 = vpop.f32.mrf.mxu1 }
 0x1db   : > { %v4225_v17 = vpop.f32.mrf.mxu0  ;;  %4748 = vmatpush3.bf16.msra.mxu1 %v5133_v57 }
 0x1dc   : > { %v6155_v19 = vadd.f32 %v4287_v12, %v2079_v14  ;;  %v4226_v20 = vadd.f32 %v4225_v17, %v4224_v13  ;;  %v4289_v21 = vpop.f32.mrf.mxu1  ;;  %4749 = vmatprep.subr.bf16.mxu1 %v5135_v2  ;;  %v5134_v14 = vld [vmem:[#allocation10] sm:$0xff]  }
 0x1dd   : > { %v4307_v22 = vpop.f32.mrf.mxu0  ;;  %v4290_v26 = vadd.f32 %v4289_v21, %v4288_v15  ;;  %v5136_v15 = vld [vmem:[#allocation8] sm:$0xff]   ;;  %4719 = vmatprep.subr.bf16.mxu0 %v5134_v14 }
 0x1de   : > { %v2082_v25 = vadd.f32 %v4226_v20, %v6058_v52  ;;  %v4371_v27 = vpop.f32.mrf.mxu1  ;;  %4720 = vmatpush3.bf16.msra.mxu0 %v5134_v14 }
 0x1df   : > { %v4308_v28 = vpop.f32.mrf.mxu0  ;;  %4750 = vmatpush3.bf16.msra.mxu1 %v5135_v2  ;;  %v5139_v2 = vld [vmem:[%s6181_s16 + $0x10] sm:$0xff]  }
 0x1e0   : > { %v6158_v29 = vadd.f32 %v4290_v26, %v2082_v25  ;;  %v4309_v30 = vadd.f32 %v4308_v28, %v4307_v22  ;;  %v4372_v31 = vpop.f32.mrf.mxu1  ;;  %4751 = vmatprep.subr.bf16.mxu1 %v5136_v15  ;;  %v5137_v25 = vld [vmem:[%s6181_s16] sm:$0xff]  }
 0x1e1   : > { %v4373_v34 = vadd.f32 %v4372_v31, %v4371_v27  ;;  %v4310_v35 = vpop.f32.mrf.mxu0  ;;  %v5138_v27 = vld [vmem:[%s6181_s16 + $0x8] sm:$0xff]   ;;  %4721 = vmatprep.mubr.msk.bf16.mxu0 %vm2876_vm0, %v5137_v25 }
 0x1e2   : > { %v2217_v37 = vadd.f32 %v4309_v30, %v6069_v10  ;;  %v4374_v39 = vpop.f32.mrf.mxu1  ;;  %4722 = vmatmul.mubr.msk.bf16.vlgmr.msra.gmra.mxu0 %vm2876_vm0, %v5138_v27 }
 0x1e3   : > { %v4311_v40 = vpop.f32.mrf.mxu0  ;;  %4752 = vmatpush3.bf16.msra.mxu1 %v5136_v15  ;;  %4725 = vmatprep.mubr.msk.bf16.mxu0 %vm2876_vm0, %v5139_v2 }
 0x1e4   : > { %v6161_v41 = vadd.f32 %v4373_v34, %v2217_v37  ;;  %v4312_v52 = vadd.f32 %v4311_v40, %v4310_v35  ;;  %v4375_v42 = vpop.f32.mrf.mxu1 }
 0x1e5   : > { %v4313_v43 = vpop.f32.mrf.mxu0  ;;  %v4376_v47 = vadd.f32 %v4375_v42, %v4374_v39 }
 0x1e6   : > { %v2220_v45 = vadd.f32 %v4312_v52, %v6078_v24  ;;  %v4377_v49 = vpop.f32.mrf.mxu1 }
 0x1e7   : > { %v4314_v50 = vpop.f32.mrf.mxu0 }
 0x1e8   : > { %v6164_v51 = vadd.f32 %v4376_v47, %v2220_v45  ;;  %v4315_v54 = vadd.f32 %v4314_v50, %v4313_v43  ;;  %v4378_v10 = vpop.f32.mrf.mxu1 }
 0x1e9   : > { %v4379_v55 = vadd.f32 %v4378_v10, %v4377_v49  ;;  %v4316_v56 = vpop.f32.mrf.mxu0 }
 0x1ea   : > { %v2225_v58 = vadd.f32 %v4315_v54, %v6083_v38  ;;  %v4380_v59 = vpop.f32.mrf.mxu1 }
 0x1eb   : > { %v4317_v60 = vpop.f32.mrf.mxu0 }
 0x1ec   : > { %v6167_v62 = vadd.f32 %v4379_v55, %v2225_v58  ;;  %v4318_v24 = vadd.f32 %v4317_v60, %v4316_v56  ;;  %v4381_v63 = vpop.f32.mrf.mxu1 }
 0x1ed   : > { %v4319_v1 = vpop.f32.mrf.mxu0  ;;  %v4382_v5 = vadd.f32 %v4381_v63, %v4380_v59 }
 0x1ee   : > { %v2228_v4 = vadd.f32 %v4318_v24, %v6092_v53  ;;  %v4383_v6 = vpop.f32.mrf.mxu1 }
 0x1ef   : > { %v4320_v38 = vpop.f32.mrf.mxu0 }
 0x1f0   : > { %v6174_v8 = vadd.f32 %v4382_v5, %v2228_v4  ;;  %v4321_v9 = vadd.f32 %v4320_v38, %v4319_v1  ;;  %v4384_v11 = vpop.f32.mrf.mxu1  ;;  %v5140_v5 = vld [vmem:[%s6181_s16 + $0x18] sm:$0xff]  }
 0x1f1   : > { %v4385_v12 = vadd.f32 %v4384_v11, %v4383_v6  ;;  %v4322_v13 = vpop.f32.mrf.mxu0  ;;  %4726 = vmatmul.mubr.msk.bf16.gmra.mxu0 %vm2876_vm0, %v5140_v5  ;;  %v5143_v5 = vld [vmem:[%s6181_s16 + $0x30] sm:$0xff]  }
 0x1f2   : > { %v2233_v17 = vadd.f32 %v4321_v9, %v6097_v3  ;;  %v4386_v20 = vpop.f32.mrf.mxu1 }
 0x1f3   : > { %v4323_v53 = vpop.f32.mrf.mxu0 }
 0x1f4   : > { %v6183_v21 = vadd.f32 %v4385_v12, %v2233_v17  ;;  %v4324_v22 = vadd.f32 %v4323_v53, %v4322_v13  ;;  %v4387_v23 = vpop.f32.mrf.mxu1 }
 0x1f5   : > { %v4388_v3 = vadd.f32 %v4387_v23, %v4386_v20  ;;  %v4325_v26 = vpop.f32.mrf.mxu0 }
 0x1f6   : > { %v2236_v28 = vadd.f32 %v4324_v22, %v6106_v18  ;;  %v4389_v30 = vpop.f32.mrf.mxu1 }
 0x1f7   : > { %v4326_v31 = vpop.f32.mrf.mxu0 }
 0x1f8   : > { %v6190_v34 = vadd.f32 %v4388_v3, %v2236_v28  ;;  %v4327_v35 = vadd.f32 %v4326_v31, %v4325_v26  ;;  %v4390_v36 = vpop.f32.mrf.mxu1 }
 0x1f9   : > { %v4391_v37 = vadd.f32 %v4390_v36, %v4389_v30  ;;  %v4328_v39 = vpop.f32.mrf.mxu0 }
 0x1fa   : > { %v2241_v40 = vadd.f32 %v4327_v35, %v6111_v33  ;;  %v4392_v52 = vpop.f32.mrf.mxu1 }
 0x1fb   : > { %v4329_v42 = vpop.f32.mrf.mxu0 }
 0x1fc   : > { %v6193_v43 = vadd.f32 %v4391_v37, %v2241_v40  ;;  %v4330_v44 = vadd.f32 %v4329_v42, %v4328_v39  ;;  %v4393_v18 = vpop.f32.mrf.mxu1 }
 0x1fd   : > { %v4394_v45 = vadd.f32 %v4393_v18, %v4392_v52  ;;  %v4331_v47 = vpop.f32.mrf.mxu0 }
 0x1fe   : > { %v2244_v49 = vadd.f32 %v4330_v44, %v6120_v48  ;;  %v4395_v50 = vpop.f32.mrf.mxu1  ;;  %v5141_v44 = vld [vmem:[%s6181_s16 + $0x20] sm:$0xff]  }
 0x1ff   : > { %v4332_v54 = vpop.f32.mrf.mxu0  ;;  %4729 = vmatprep.mubr.msk.bf16.mxu0 %vm2876_vm0, %v5141_v44  ;;  %v6268_v44 = vld [vmem:[#allocation13 + $0x20] sm:$0xff]  }
 0x200   : > { %v6196_v10 = vadd.f32 %v4394_v45, %v2244_v49  ;;  %v4333_v55 = vadd.f32 %v4332_v54, %v4331_v47  ;;  %v4396_v56 = vpop.f32.mrf.mxu1  ;;  %v5142_v45 = vld [vmem:[%s6181_s16 + $0x28] sm:$0xff]  }
 0x201   : > { %v4397_v57 = vadd.f32 %v4396_v56, %v4395_v50  ;;  %v4334_v33 = vpop.f32.mrf.mxu0  ;;  %4730 = vmatmul.mubr.msk.bf16.gmra.mxu0 %vm2876_vm0, %v5142_v45 }
 0x202   : > { %v2249_v58 = vadd.f32 %v4333_v55, %v6125_v0  ;;  %v4398_v59 = vpop.f32.mrf.mxu1  ;;  %4733 = vmatprep.mubr.msk.bf16.mxu0 %vm2876_vm0, %v5143_v5 }
 0x203   : > { %v4335_v60 = vpop.f32.mrf.mxu0 }
 0x204   : > { %v6199_v24 = vadd.f32 %v4397_v57, %v2249_v58  ;;  %v4336_v63 = vadd.f32 %v4335_v60, %v4334_v33  ;;  %v4399_v1 = vpop.f32.mrf.mxu1 }
 0x205   : > { %v4400_v4 = vadd.f32 %v4399_v1, %v4398_v59  ;;  %v4337_v48 = vpop.f32.mrf.mxu0 }
 0x206   : > { %v2252_v6 = vadd.f32 %v4336_v63, %v6134_v16  ;;  %v4401_v38 = vpop.f32.mrf.mxu1 }
 0x207   : > { %v4338_v9 = vpop.f32.mrf.mxu0 }
 0x208   : > { %v6206_v11 = vadd.f32 %v4400_v4, %v2252_v6  ;;  %v4339_v0 = vadd.f32 %v4338_v9, %v4337_v48  ;;  %v4402_v12 = vpop.f32.mrf.mxu1 }
 0x209   : > { %v4403_v13 = vadd.f32 %v4402_v12, %v4401_v38  ;;  %v4340_v14 = vpop.f32.mrf.mxu0  ;;  %v5144_v38 = vld [vmem:[%s6181_s16 + $0x38] sm:$0xff]  }
 0x20a   : > { %v2257_v15 = vadd.f32 %v4339_v0, %v6139_v32  ;;  %v4404_v17 = vpop.f32.mrf.mxu1  ;;  %4734 = vmatmul.mubr.msk.bf16.gmra.mxu0 %vm2876_vm0, %v5144_v38 }
 0x20b   : > { %v4341_v20 = vpop.f32.mrf.mxu0 }
 0x20c   : > { %v6209_v53 = vadd.f32 %v4403_v13, %v2257_v15  ;;  %v4342_v22 = vadd.f32 %v4341_v20, %v4340_v14  ;;  %v4405_v16 = vpop.f32.mrf.mxu1 }
 0x20d   : > { %v4406_v23 = vadd.f32 %v4405_v16, %v4404_v17  ;;  %v4343_v25 = vpop.f32.mrf.mxu0 }
 0x20e   : > { %v2260_v3 = vadd.f32 %v4342_v22, %v6146_v46  ;;  %v4407_v26 = vpop.f32.mrf.mxu1 }
 0x20f   : > { %v4344_v27 = vpop.f32.mrf.mxu0 }
 0x210   : > { %v6212_v28 = vadd.f32 %v4406_v23, %v2260_v3  ;;  %v4345_v30 = vadd.f32 %v4344_v27, %v4343_v25  ;;  %v4408_v31 = vpop.f32.mrf.mxu1  ;;  %v6245_v23 = vld [vmem:[#allocation13 + $0x38] sm:$0xff]   ;;  %v6247_v25 = vld [vmem:[#allocation13 + $0x30] sm:$0xff]  }
 0x211   : > { %v4409_v35 = vadd.f32 %v4408_v31, %v4407_v26  ;;  %v4346_v32 = vpop.f32.mrf.mxu0  ;;  %4769 = vmatprep.subr.bf16.mxu0 %v6245_v23  ;;  %4801 = vmatprep.subr.bf16.mxu1 %v6245_v23 }
 0x212   : > { %v2265_v36 = vadd.f32 %v4345_v30, %v6149_v61  ;;  %v4410_v37 = vpop.f32.mrf.mxu1  ;;  %4770 = vmatpush3.bf16.msra.mxu0 %v6245_v23 }
 0x213   : > { %v4347_v39 = vpop.f32.mrf.mxu0  ;;  %4771 = vmatprep.subr.bf16.mxu0 %v6247_v25 }
 0x214   : > { %v6215_v40 = vadd.f32 %v4409_v35, %v2265_v36  ;;  %v4348_v52 = vadd.f32 %v4347_v39, %v4346_v32  ;;  %v4411_v42 = vpop.f32.mrf.mxu1  ;;  %v6258_v32 = vld [vmem:[#allocation13 + $0x28] sm:$0xff]  }
 0x215   : > { %v4412_v18 = vadd.f32 %v4411_v42, %v4410_v37  ;;  %v4349_v46 = vpop.f32.mrf.mxu0 }
 0x216   : > { %v2268_v47 = vadd.f32 %v4348_v52, %v6152_v7  ;;  %v4413_v49 = vpop.f32.mrf.mxu1  ;;  %4772 = vmatpush3.bf16.msra.mxu0 %v6247_v25 }
 0x217   : > { %v4350_v50 = vpop.f32.mrf.mxu0  ;;  %4773 = vmatprep.subr.bf16.mxu0 %v6258_v32 }
 0x218   : > { %v6222_v61 = vadd.f32 %v4412_v18, %v2268_v47  ;;  %v4351_v54 = vadd.f32 %v4350_v50, %v4349_v46  ;;  %v4414_v55 = vpop.f32.mrf.mxu1 }
 0x219   : > { %v4415_v56 = vadd.f32 %v4414_v55, %v4413_v49  ;;  %v4352_v57 = vpop.f32.mrf.mxu0 }
 0x21a   : > { %v2273_v33 = vadd.f32 %v4351_v54, %v6155_v19  ;;  %v4416_v58 = vpop.f32.mrf.mxu1  ;;  %4774 = vmatpush3.bf16.msra.mxu0 %v6258_v32 }
 0x21b   : > { %v4353_v59 = vpop.f32.mrf.mxu0  ;;  %4775 = vmatprep.subr.bf16.mxu0 %v6268_v44 }
 0x21c   : > { %v6225_v60 = vadd.f32 %v4415_v56, %v2273_v33  ;;  %v4354_v7 = vadd.f32 %v4353_v59, %v4352_v57  ;;  %v4417_v63 = vpop.f32.mrf.mxu1 }
 0x21d   : > { %v4418_v1 = vadd.f32 %v4417_v63, %v4416_v58  ;;  %v4435_v2 = vpop.f32.mrf.mxu0 }
 0x21e   : > { %v2276_v4 = vadd.f32 %v4354_v7, %v6158_v29  ;;  %v4499_v48 = vpop.f32.mrf.mxu1  ;;  %4776 = vmatpush3.bf16.msra.mxu0 %v6268_v44 }
 0x21f   : > { %v4436_v6 = vpop.f32.mrf.mxu0 }
 0x220   : > { %v6230_v9 = vadd.f32 %v4418_v1, %v2276_v4  ;;  %v4437_v0 = vadd.f32 %v4436_v6, %v4435_v2  ;;  %v4500_v12 = vpop.f32.mrf.mxu1 }
 0x221   : > { %v4501_v19 = vadd.f32 %v4500_v12, %v4499_v48  ;;  %v6233_v13 = vpop.f32.mrf.mxu0 }
 0x222   : > { %6645 = vst [vmem:[#allocation25_spill] sm:$0xff] %v6230_v9  ;;  %v2411_v14 = vadd.f32 %v4437_v0, %v6161_v41  ;;  %v6237_v15 = vpop.f32.mrf.mxu1 }
 0x223   : > { %v6239_v29 = vpop.f32.mrf.mxu0 }
 0x224   : > { %v6241_v17 = vadd.f32 %v4501_v19, %v2411_v14  ;;  %v6243_v20 = vpop.f32.mrf.mxu1 }
 0x225   : > { %v4441_v22 = vpop.f32.mrf.mxu0 }
 0x226   : > { %v4505_v16 = vpop.f32.mrf.mxu1 }
 0x227   : > { %v4442_v3 = vpop.f32.mrf.mxu0 }
 0x228   : > { %v4443_v26 = vadd.f32 %v4442_v3, %v4441_v22  ;;  %v4506_v27 = vpop.f32.mrf.mxu1 }
 0x229   : > { %v4507_v41 = vadd.f32 %v4506_v27, %v4505_v16  ;;  %v6251_v30 = vpop.f32.mrf.mxu0 }
 0x22a   : > { %v2419_v31 = vadd.f32 %v4443_v26, %v6167_v62  ;;  %v6255_v35 = vpop.f32.mrf.mxu1 }
 0x22b   : > { %v6260_v36 = vpop.f32.mrf.mxu0 }
 0x22c   : > { %v6262_v37 = vadd.f32 %v4507_v41, %v2419_v31  ;;  %v6264_v39 = vpop.f32.mrf.mxu1 }
 0x22d   : > { %v4447_v52 = vpop.f32.mrf.mxu0 }
 0x22e   : > { %v4511_v42 = vpop.f32.mrf.mxu1 }
 0x22f   : > { %v4448_v62 = vpop.f32.mrf.mxu0 }
 0x230   : > { %v4449_v18 = vadd.f32 %v4448_v62, %v4447_v52  ;;  %v4512_v46 = vpop.f32.mrf.mxu1 }
 0x231   : > { %v4513_v45 = vadd.f32 %v4512_v46, %v4511_v42  ;;  %v6270_v47 = vpop.f32.mrf.mxu0 }
 0x232   : > { %v2427_v49 = vadd.f32 %v4449_v18, %v6183_v21  ;;  %v6274_v50 = vpop.f32.mrf.mxu1 }
 0x233   : > { %v6277_v54 = vpop.f32.mrf.mxu0 }
 0x234   : > { %v6279_v55 = vadd.f32 %v4513_v45, %v2427_v49  ;;  %v6281_v56 = vpop.f32.mrf.mxu1 }
 0x235   : > { %v4453_v57 = vpop.f32.mrf.mxu0 }
 0x236   : > { %v4517_v33 = vpop.f32.mrf.mxu1 }
 0x237   : > { %v4454_v58 = vpop.f32.mrf.mxu0 }
 0x238   : > { %v4455_v59 = vadd.f32 %v4454_v58, %v4453_v57  ;;  %v4518_v7 = vpop.f32.mrf.mxu1 }
 0x239   : > { %v4519_v63 = vadd.f32 %v4518_v7, %v4517_v33  ;;  %v6284_v1 = vpop.f32.mrf.mxu0 }
 0x23a   : > { %v2435_v21 = vadd.f32 %v4455_v59, %v6193_v43  ;;  %v6287_v2 = vpop.f32.mrf.mxu1 }
 0x23b   : > { %v6289_v4 = vpop.f32.mrf.mxu0 }
 0x23c   : > { %v6291_v48 = vadd.f32 %v4519_v63, %v2435_v21  ;;  %v6293_v5 = vpop.f32.mrf.mxu1 }
 0x23d   : > { %v4459_v6 = vpop.f32.mrf.mxu0 }
 0x23e   : > { %v4523_v38 = vpop.f32.mrf.mxu1 }
 0x23f   : > { %v4460_v0 = vpop.f32.mrf.mxu0 }
 0x240   : > { %v4461_v12 = vadd.f32 %v4460_v0, %v4459_v6  ;;  %v4524_v19 = vpop.f32.mrf.mxu1 }
 0x241   : > { %v4525_v14 = vadd.f32 %v4524_v19, %v4523_v38  ;;  %v6295_v22 = vpop.f32.mrf.mxu0 }
 0x242   : > { %v2443_v16 = vadd.f32 %v4461_v12, %v6199_v24  ;;  %v6298_v3 = vpop.f32.mrf.mxu1 }
 0x243   : > { %v6300_v43 = vpop.f32.mrf.mxu0 }
 0x244   : > { %v6302_v26 = vadd.f32 %v4525_v14, %v2443_v16  ;;  %v6304_v27 = vpop.f32.mrf.mxu1 }
 0x245   : > { %v4465_v41 = vpop.f32.mrf.mxu0 }
 0x246   : > { %v4529_v31 = vpop.f32.mrf.mxu1 }
 0x247   : > { %v4466_v52 = vpop.f32.mrf.mxu0 }
 0x248   : > { %v4467_v42 = vadd.f32 %v4466_v52, %v4465_v41  ;;  %v4530_v62 = vpop.f32.mrf.mxu1 }
 0x249   : > { %v4531_v18 = vadd.f32 %v4530_v62, %v4529_v31  ;;  %v6306_v46 = vpop.f32.mrf.mxu0 }
 0x24a   : > { %v2451_v45 = vadd.f32 %v4467_v42, %v6209_v53  ;;  %v6309_v49 = vpop.f32.mrf.mxu1 }
 0x24b   : > { %v6311_v24 = vpop.f32.mrf.mxu0 }
 0x24c   : > { %v6313_v57 = vadd.f32 %v4531_v18, %v2451_v45  ;;  %v6315_v33 = vpop.f32.mrf.mxu1 }
 0x24d   : > { %v4471_v58 = vpop.f32.mrf.mxu0 }
 0x24e   : > { %v4535_v59 = vpop.f32.mrf.mxu1 }
 0x24f   : > { %v4472_v7 = vpop.f32.mrf.mxu0 }
 0x250   : > { %v4473_v63 = vadd.f32 %v4472_v7, %v4471_v58  ;;  %v4536_v21 = vpop.f32.mrf.mxu1 }
 0x251   : > { %v4537_v6 = vadd.f32 %v4536_v21, %v4535_v59  ;;  %v6317_v38 = vpop.f32.mrf.mxu0  ;;  %v4440_v59 = vadd.f32 %v6239_v29, %v6233_v13  ;;  %v4446_v29 = vadd.f32 %v6260_v36, %v6251_v30 }
 0x252   : > { %v2459_v0 = vadd.f32 %v4473_v63, %v6215_v40  ;;  %v6320_v12 = vpop.f32.mrf.mxu1 }
 0x253   : > { %v6322_v53 = vpop.f32.mrf.mxu0 }
 0x254   : > { %v6324_v19 = vadd.f32 %v4537_v6, %v2459_v0  ;;  %v6326_v14 = vpop.f32.mrf.mxu1 }
 0x255   : > { %v4477_v16 = vpop.f32.mrf.mxu0 }
 0x256   : > { %v4541_v41 = vpop.f32.mrf.mxu1 }
 0x257   : > { %v4478_v31 = vpop.f32.mrf.mxu0 }
 0x258   : > { %v4479_v52 = vadd.f32 %v4478_v31, %v4477_v16  ;;  %v4542_v42 = vpop.f32.mrf.mxu1  ;;  %v2414_v16 = vadd.f32 %v4440_v59, %v6164_v51 }
 0x259   : > { %v4543_v62 = vadd.f32 %v4542_v42, %v4541_v41  ;;  %v6328_v18 = vpop.f32.mrf.mxu0 }
 0x25a   : > { %6646 = vst [vmem:[#allocation26_spill] sm:$0xff] %v6328_v18  ;;  %v2467_v45 = vadd.f32 %v4479_v52, %v6225_v60  ;;  %v6331_v58 = vpop.f32.mrf.mxu1  ;;  %v4504_v60 = vadd.f32 %v6243_v20, %v6237_v15  ;;  %v2422_v18 = vadd.f32 %v4446_v29, %v6174_v8 }
 0x25b   : > { %6647 = vst [vmem:[#allocation27_spill] sm:$0xff] %v6331_v58  ;;  %v6333_v40 = vpop.f32.mrf.mxu0 }
 0x25c   : > { %6648 = vst [vmem:[#allocation28_spill] sm:$0xff] %v6333_v40  ;;  %v6337_v7 = vadd.f32 %v4543_v62, %v2467_v45  ;;  %v6339_v63 = vpop.f32.mrf.mxu1  ;;  %v2511_v13 = vadd.f32 %v4504_v60, %v2414_v16  ;;  %v4510_v16 = vadd.f32 %v6264_v39, %v6255_v35 }
 0x25d   : > { %6650 = vst [vmem:[#allocation30_spill] sm:$0xff] %v6339_v63  ;;  %v4563_v21 = vpop.f32.mrf.mxu0 }
 0x25e   : > { %6649 = vst [vmem:[#allocation29_spill] sm:$0xff] %v6337_v7  ;;  %v4627_v6 = vpop.f32.mrf.mxu1 }
 0x25f   : > { %v4564_v0 = vpop.f32.mrf.mxu0 }
 0x260   : > { %v4565_v41 = vadd.f32 %v4564_v0, %v4563_v21  ;;  %v4628_v31 = vpop.f32.mrf.mxu1 }
 0x261   : > { %v4566_v42 = vpop.f32.mrf.mxu0  ;;  %v4629_v62 = vadd.f32 %v4628_v31, %v4627_v6  ;;  %v4452_v6 = vadd.f32 %v6277_v54, %v6270_v47  ;;  %v4516_v47 = vadd.f32 %v6281_v56, %v6274_v50 }
 0x262   : > { %v2605_v52 = vadd.f32 %v4565_v41, %v6241_v17  ;;  %v4630_v58 = vpop.f32.mrf.mxu1 }
 0x263   : > { %v4567_v9 = vpop.f32.mrf.mxu0  ;;  %v2430_v35 = vadd.f32 %v4452_v6, %v6190_v34 }
 0x264   : > { %v4568_v45 = vadd.f32 %v4567_v9, %v4566_v42  ;;  %v4631_v7 = vpop.f32.mrf.mxu1  ;;  %v2702_v40 = vadd.f32 %v4629_v62, %v2605_v52 }
 0x265   : > { %v4569_v63 = vpop.f32.mrf.mxu0  ;;  %v4632_v59 = vadd.f32 %v4631_v7, %v4630_v58  ;;  %v2519_v7 = vadd.f32 %v4510_v16, %v2422_v18 }
 0x266   : > { %v2608_v51 = vadd.f32 %v4568_v45, %v2511_v13  ;;  %v4633_v21 = vpop.f32.mrf.mxu1  ;;  %v2764_v60 = vmax.f32 %v2702_v40, 0.0 }
 0x267   : > { %v4570_v0 = vpop.f32.mrf.mxu0 }
 0x268   : > { %v2705_v15 = vadd.f32 %v4632_v59, %v2608_v51  ;;  %v4571_v20 = vadd.f32 %v4570_v0, %v4569_v63  ;;  %v4634_v17 = vpop.f32.mrf.mxu1 }
 0x269   : > { %v4572_v41 = vpop.f32.mrf.mxu0  ;;  %v4635_v31 = vadd.f32 %v4634_v17, %v4633_v21  ;;  %v4458_v17 = vadd.f32 %v6289_v4, %v6284_v1  ;;  %v4522_v4 = vadd.f32 %v6293_v5, %v6287_v2 }
 0x26a   : > { %v2765_v30 = vmax.f32 %v2705_v15, 0.0  ;;  %v2613_v9 = vadd.f32 %v4571_v20, %v6262_v37  ;;  %v4636_v36 = vpop.f32.mrf.mxu1  ;;  %v2527_v15 = vadd.f32 %v4516_v47, %v2430_v35  ;;  %v4528_v47 = vadd.f32 %v6304_v27, %v6298_v3 }
 0x26b   : > { %v4573_v58 = vpop.f32.mrf.mxu0 }
 0x26c   : > { %v4574_v42 = vadd.f32 %v4573_v58, %v4572_v41  ;;  %v4637_v8 = vpop.f32.mrf.mxu1  ;;  %v2780_v52 = vpack.c.bf16 %v2765_v30, %v2764_v60  ;;  %v2710_v13 = vadd.f32 %v4635_v31, %v2613_v9 }
 0x26d   : > { %v4575_v63 = vpop.f32.mrf.mxu0  ;;  %v4638_v62 = vadd.f32 %v4637_v8, %v4636_v36 }
 0x26e   : > { %v2616_v29 = vadd.f32 %v4574_v42, %v2519_v7  ;;  %v4639_v45 = vpop.f32.mrf.mxu1  ;;  %4753 = vmatprep.mubr.bf16.mxu1 %v2780_v52  ;;  %v2766_v18 = vmax.f32 %v2710_v13, 0.0  ;;  %v4464_v13 = vadd.f32 %v6300_v43, %v6295_v22 }
 0x26f   : > { %v4576_v39 = vpop.f32.mrf.mxu0 }
 0x270   : > { %v2713_v37 = vadd.f32 %v4638_v62, %v2616_v29  ;;  %v4577_v40 = vadd.f32 %v4576_v39, %v4575_v63  ;;  %v4640_v51 = vpop.f32.mrf.mxu1 }
 0x271   : > { %v4578_v54 = vpop.f32.mrf.mxu0  ;;  %v4641_v34 = vadd.f32 %v4640_v51, %v4639_v45 }
 0x272   : > { %v2767_v59 = vmax.f32 %v2713_v37, 0.0  ;;  %v2621_v21 = vadd.f32 %v4577_v40, %v6279_v55  ;;  %v4642_v0 = vpop.f32.mrf.mxu1  ;;  %v2438_v55 = vadd.f32 %v4458_v17, %v6196_v10 }
 0x273   : > { %v4579_v20 = vpop.f32.mrf.mxu0 }
 0x274   : > { %v2781_v41 = vpack.c.bf16 %v2767_v59, %v2766_v18  ;;  %v4580_v16 = vadd.f32 %v4579_v20, %v4578_v54  ;;  %v4643_v60 = vpop.f32.mrf.mxu1  ;;  %v2718_v9 = vadd.f32 %v4641_v34, %v2621_v21  ;;  %v2535_v10 = vadd.f32 %v4522_v4, %v2438_v55 }
 0x275   : > { %v4581_v30 = vpop.f32.mrf.mxu0  ;;  %v4644_v6 = vadd.f32 %v4643_v60, %v4642_v0 }
 0x276   : > { %v2624_v36 = vadd.f32 %v4580_v16, %v2527_v15  ;;  %v4645_v50 = vpop.f32.mrf.mxu1  ;;  %4754 = vmatmul.mubr.bf16.vlgmr.msra.gmra.mxu1 %v2781_v41  ;;  %v2768_v42 = vmax.f32 %v2718_v9, 0.0 }
 0x277   : > { %v4582_v56 = vpop.f32.mrf.mxu0  ;;  %4809 = vmatpush3.bf16.msra.mxu1 %v6245_v23 }
 0x278   : > { %v2721_v58 = vadd.f32 %v4644_v6, %v2624_v36  ;;  %v4583_v7 = vadd.f32 %v4582_v56, %v4581_v30  ;;  %v4646_v31 = vpop.f32.mrf.mxu1  ;;  %4802 = vmatprep.subr.bf16.mxu1 %v6247_v25 }
 0x279   : > { %v4584_v1 = vpop.f32.mrf.mxu0  ;;  %v4647_v29 = vadd.f32 %v4646_v31, %v4645_v50 }
 0x27a   : > { %v2769_v8 = vmax.f32 %v2721_v58, 0.0  ;;  %v2629_v52 = vadd.f32 %v4583_v7, %v6291_v48  ;;  %v4648_v63 = vpop.f32.mrf.mxu1  ;;  %v2446_v48 = vadd.f32 %v4464_v13, %v6206_v11  ;;  %v4470_v11 = vadd.f32 %v6311_v24, %v6306_v46 }
 0x27b   : > { %v4585_v23 = vpop.f32.mrf.mxu0  ;;  %4810 = vmatpush3.bf16.msra.mxu1 %v6247_v25  ;;  %v4534_v46 = vadd.f32 %v6315_v33, %v6309_v49  ;;  %v4476_v7 = vadd.f32 %v6322_v53, %v6317_v38  ;;  %v4540_v38 = vadd.f32 %v6326_v14, %v6320_v12 }
 0x27c   : > { %v4586_v62 = vadd.f32 %v4585_v23, %v4584_v1  ;;  %v4649_v45 = vpop.f32.mrf.mxu1  ;;  %v2782_v35 = vpack.c.bf16 %v2769_v8, %v2768_v42  ;;  %4803 = vmatprep.subr.bf16.mxu1 %v6258_v32  ;;  %v2726_v2 = vadd.f32 %v4647_v29, %v2629_v52  ;;  %v2543_v15 = vadd.f32 %v4528_v47, %v2446_v48  ;;  %v6652_v48 = vld [vmem:[#allocation28_spill] sm:$0xff] }
 0x27d   : > { %v4587_v39 = vpop.f32.mrf.mxu0  ;;  %v4650_v37 = vadd.f32 %v4649_v45, %v4648_v63  ;;  %v2462_v49 = vadd.f32 %v4476_v7, %v6222_v61 }
 0x27e   : > { %v2632_v5 = vadd.f32 %v4586_v62, %v2535_v10  ;;  %v4651_v40 = vpop.f32.mrf.mxu1  ;;  %4757 = vmatprep.mubr.bf16.mxu1 %v2782_v35  ;;  %v2770_v18 = vmax.f32 %v2726_v2, 0.0 }
 0x27f   : > { %v4588_v51 = vpop.f32.mrf.mxu0  ;;  %4811 = vmatpush3.bf16.msra.mxu1 %v6258_v32 }
 0x280   : > { %v2729_v22 = vadd.f32 %v4650_v37, %v2632_v5  ;;  %v4589_v25 = vadd.f32 %v4588_v51, %v4587_v39  ;;  %v4652_v43 = vpop.f32.mrf.mxu1  ;;  %4804 = vmatprep.subr.bf16.mxu1 %v6268_v44  ;;  %v2559_v5 = vadd.f32 %v4540_v38, %v2462_v49 }
 0x281   : > { %v4590_v54 = vpop.f32.mrf.mxu0  ;;  %v4653_v17 = vadd.f32 %v4652_v43, %v4651_v40  ;;  %v6651_v40 = vld [vmem:[#allocation26_spill] sm:$0xff] }
 0x282   : > { %v2771_v59 = vmax.f32 %v2729_v22, 0.0  ;;  %v2637_v21 = vadd.f32 %v4589_v25, %v6302_v26  ;;  %v4654_v0 = vpop.f32.mrf.mxu1  ;;  %v2454_v26 = vadd.f32 %v4470_v11, %v6212_v28  ;;  %v4482_v51 = vadd.f32 %v6652_v48, %v6651_v40 }
 0x283   : > { %v4591_v20 = vpop.f32.mrf.mxu0  ;;  %4812 = vmatpush3.bf16.msra.mxu1 %v6268_v44 }
 0x284   : > { %v2783_v32 = vpack.c.bf16 %v2771_v59, %v2770_v18  ;;  %v4592_v41 = vadd.f32 %v4591_v20, %v4590_v54  ;;  %v4655_v34 = vpop.f32.mrf.mxu1  ;;  %v2734_v60 = vadd.f32 %v4653_v17, %v2637_v21  ;;  %v2551_v1 = vadd.f32 %v4534_v46, %v2454_v26  ;;  %v6653_v21 = vld [vmem:[#allocation25_spill] sm:$0xff]  ;;  %v6655_v17 = vld [vmem:[#allocation30_spill] sm:$0xff] }
 0x285   : > { %v4593_v16 = vpop.f32.mrf.mxu0  ;;  %v4656_v27 = vadd.f32 %v4655_v34, %v4654_v0  ;;  %v2470_v0 = vadd.f32 %v4482_v51, %v6653_v21 }
 0x286   : > { %v2640_v3 = vadd.f32 %v4592_v41, %v2543_v15  ;;  %v4657_v30 = vpop.f32.mrf.mxu1  ;;  %4758 = vmatmul.mubr.bf16.gmra.mxu1 %v2783_v32  ;;  %v2772_v24 = vmax.f32 %v2734_v60, 0.0  ;;  %v6654_v32 = vld [vmem:[#allocation27_spill] sm:$0xff]  ;;  %v6656_v60 = vld [vmem:[#allocation29_spill] sm:$0xff] }
 0x287   : > { %v4594_v9 = vpop.f32.mrf.mxu0  ;;  %v4546_v41 = vadd.f32 %v6655_v17, %v6654_v32 }
 0x288   : > { %v2737_v36 = vadd.f32 %v4656_v27, %v2640_v3  ;;  %v4595_v6 = vadd.f32 %v4594_v9, %v4593_v16  ;;  %v4658_v50 = vpop.f32.mrf.mxu1 }
 0x289   : > { %v4596_v44 = vpop.f32.mrf.mxu0  ;;  %v4659_v4 = vadd.f32 %v4658_v50, %v4657_v30  ;;  %v2567_v9 = vadd.f32 %v4546_v41, %v2470_v0 }
 0x28a   : > { %v2773_v56 = vmax.f32 %v2737_v36, 0.0  ;;  %v2645_v55 = vadd.f32 %v4595_v6, %v6313_v57  ;;  %v4660_v58 = vpop.f32.mrf.mxu1 }
 0x28b   : > { %v4597_v31 = vpop.f32.mrf.mxu0 }
 0x28c   : > { %v4598_v42 = vadd.f32 %v4597_v31, %v4596_v44  ;;  %v4661_v28 = vpop.f32.mrf.mxu1  ;;  %v2784_v8 = vpack.c.bf16 %v2773_v56, %v2772_v24  ;;  %v2742_v63 = vadd.f32 %v4659_v4, %v2645_v55  ;;  %v5149_v31 = vld [vmem:[#allocation13 + $0x18] sm:$0xff]   ;;  %v5151_v4 = vld [vmem:[#allocation13 + $0x8] sm:$0xff]  }
 0x28d   : > { %v4599_v52 = vpop.f32.mrf.mxu0  ;;  %v4662_v23 = vadd.f32 %v4661_v28, %v4660_v58  ;;  %4777 = vmatprep.subr.bf16.mxu0 %v5149_v31  ;;  %4805 = vmatprep.subr.bf16.mxu1 %v5149_v31 }
 0x28e   : > { %v2648_v13 = vadd.f32 %v4598_v42, %v2551_v1  ;;  %v4663_v10 = vpop.f32.mrf.mxu1  ;;  %4761 = vmatprep.mubr.bf16.mxu1 %v2784_v8  ;;  %v2774_v45 = vmax.f32 %v2742_v63, 0.0  ;;  %4778 = vmatpush3.bf16.msra.mxu0 %v5149_v31  ;;  %v5150_v1 = vld [vmem:[#allocation13 + $0x10] sm:$0xff]   ;;  %v5152_v42 = vld [vmem:[#allocation13] sm:$0xff]  }
 0x28f   : > { %v4600_v33 = vpop.f32.mrf.mxu0  ;;  %4813 = vmatpush3.bf16.msra.mxu1 %v5149_v31  ;;  %4779 = vmatprep.subr.bf16.mxu0 %v5150_v1 }
 0x290   : > { %v2745_v57 = vadd.f32 %v4662_v23, %v2648_v13  ;;  %v4601_v29 = vadd.f32 %v4600_v33, %v4599_v52  ;;  %v4664_v62 = vpop.f32.mrf.mxu1  ;;  %4806 = vmatprep.subr.bf16.mxu1 %v5150_v1 }
 0x291   : > { %v4602_v53 = vpop.f32.mrf.mxu0  ;;  %v4665_v61 = vadd.f32 %v4664_v62, %v4663_v10 }
 0x292   : > { %v2775_v35 = vmax.f32 %v2745_v57, 0.0  ;;  %v2653_v39 = vadd.f32 %v4601_v29, %v6324_v19  ;;  %v4666_v2 = vpop.f32.mrf.mxu1  ;;  %4780 = vmatpush3.bf16.msra.mxu0 %v5150_v1  ;;  %v6394_v57 = vld [vmem:[#allocation11] ss:$0 sm:$0xff] }
 0x293   : > { %v4603_v37 = vpop.f32.mrf.mxu0  ;;  %4814 = vmatpush3.bf16.msra.mxu1 %v5150_v1  ;;  %4781 = vmatprep.subr.bf16.mxu0 %v5151_v4 }
 0x294   : > { %v2785_v22 = vpack.c.bf16 %v2775_v35, %v2774_v45  ;;  %v4604_v25 = vadd.f32 %v4603_v37, %v4602_v53  ;;  %v4667_v43 = vpop.f32.mrf.mxu1  ;;  %v2750_v54 = vadd.f32 %v4665_v61, %v2653_v39  ;;  %4807 = vmatprep.subr.bf16.mxu1 %v5151_v4 }
 0x295   : > { %v4605_v47 = vpop.f32.mrf.mxu0  ;;  %v4668_v59 = vadd.f32 %v4667_v43, %v4666_v2 }
 0x296   : > { %v2656_v18 = vadd.f32 %v4604_v25, %v2559_v5  ;;  %v4669_v12 = vpop.f32.mrf.mxu1  ;;  %4762 = vmatmul.mubr.bf16.gmra.mxu1 %v2785_v22  ;;  %v2776_v34 = vmax.f32 %v2750_v54, 0.0  ;;  %4782 = vmatpush3.bf16.msra.mxu0 %v5151_v4 }
 0x297   : > { %v4606_v14 = vpop.f32.mrf.mxu0  ;;  %4815 = vmatpush3.bf16.msra.mxu1 %v5151_v4  ;;  %4783 = vmatprep.subr.bf16.mxu0 %v5152_v42 }
 0x298   : > { %v2753_v19 = vadd.f32 %v4668_v59, %v2656_v18  ;;  %v4607_v15 = vadd.f32 %v4606_v14, %v4605_v47  ;;  %v4670_v20 = vpop.f32.mrf.mxu1  ;;  %4808 = vmatprep.subr.bf16.mxu1 %v5152_v42 }
 0x299   : > { %v4608_v11 = vpop.f32.mrf.mxu0  ;;  %v4671_v26 = vadd.f32 %v4670_v20, %v4669_v12 }
 0x29a   : > { %v2777_v16 = vmax.f32 %v2753_v19, 0.0  ;;  %v2661_v3 = vadd.f32 %v4607_v15, %v6656_v60  ;;  %v4672_v27 = vpop.f32.mrf.mxu1  ;;  %4784 = vmatpush3.bf16.msra.mxu0 %v5152_v42 }
 0x29b   : > { %v4609_v30 = vpop.f32.mrf.mxu0  ;;  %4816 = vmatpush3.bf16.msra.mxu1 %v5152_v42 }
 0x29c   : > { %v4610_v36 = vadd.f32 %v4609_v30, %v4608_v11  ;;  %v4673_v6 = vpop.f32.mrf.mxu1  ;;  %v2786_v50 = vpack.c.bf16 %v2777_v16, %v2776_v34  ;;  %v2758_v44 = vadd.f32 %v4671_v26, %v2661_v3 }
 0x29d   : > { %v4674_v24 = vadd.f32 %v4673_v6, %v4672_v27 }
 0x29e   : > { %v2664_v46 = vadd.f32 %v4610_v36, %v2567_v9  ;;  %4765 = vmatprep.mubr.bf16.mxu1 %v2786_v50  ;;  %v2778_v55 = vmax.f32 %v2758_v44, 0.0 }
 0x2a0   : > { %v2761_v56 = vadd.f32 %v4674_v24, %v2664_v46 }
 0x2a2   : > { %v2779_v58 = vmax.f32 %v2761_v56, 0.0  ;;  %v4723_v28 = vpop.f32.mrf.mxu0 }
 0x2a4   : > { %v2787_v7 = vpack.c.bf16 %v2779_v58, %v2778_v55  ;;  %v2935_v8 = vpop.f32.mrf.mxu0 }
 0x2a6   : > { %4766 = vmatmul.mubr.bf16.gmra.mxu1 %v2787_v7  ;;  %v4724_v63 = vpop.f32.mrf.mxu0 }
 0x2a8   : > { %v2938_v33 = vpop.f32.mrf.mxu0 }
 0x2b1   : > { %v4727_v39 = vpop.f32.mrf.mxu0 }
 0x2b3   : > { %v2951_v51 = vpop.f32.mrf.mxu0 }
 0x2b5   : > { %v4728_v43 = vpop.f32.mrf.mxu0 }
 0x2b7   : > { %v2954_v12 = vpop.f32.mrf.mxu0 }
 0x2c1   : > { %v4731_v11 = vpop.f32.mrf.mxu0 }
 0x2c3   : > { %v2967_v60 = vpop.f32.mrf.mxu0 }
 0x2c5   : > { %v4732_v9 = vpop.f32.mrf.mxu0 }
 0x2c7   : > { %v2970_v44 = vpop.f32.mrf.mxu0 }
 0x2ca   : > { %v4735_v4 = vpop.f32.mrf.mxu0 }
 0x336   : > { %v4755_v52 = vpop.f32.mrf.mxu1 }
 0x337   : > { %v3089_v10 = vadd.f32 %v4755_v52, %v4723_v28 }
 0x338   : > { %v3080_v13 = vpop.f32.mrf.mxu1 }
 0x339   : > { %v3081_v23 = vadd.f32 %v3080_v13, %v2935_v8  ;;  %v3152_v35 = vadd.f32 %v6394_v57, %v3089_v10  ;;  %v2983_v13 = vpop.f32.mrf.mxu0 }
 0x33a   : > { %v4756_v49 = vpop.f32.mrf.mxu1 }
 0x33b   : > { %v3092_v29 = vadd.f32 %v4756_v49, %v4724_v63  ;;  %v3150_v38 = vadd.f32 %v6394_v57, %v3081_v23  ;;  %v3168_v48 = vmax.f32 %v3152_v35, 0.0  ;;  %v4736_v10 = vpop.f32.mrf.mxu0 }
 0x33c   : > { %v3083_v62 = vpop.f32.mrf.mxu1 }
 0x33d   : > { %v3153_v53 = vadd.f32 %v6394_v57, %v3092_v29  ;;  %v3084_v45 = vadd.f32 %v3083_v62, %v2938_v33  ;;  %v3166_v37 = vmax.f32 %v3150_v38, 0.0 }
 0x33f   : > { %v3151_v2 = vadd.f32 %v6394_v57, %v3084_v45  ;;  %v3169_v5 = vmax.f32 %v3153_v53, 0.0  ;;  %v2986_v53 = vpop.f32.mrf.mxu0 }
 0x341   : > { %v3167_v40 = vmax.f32 %v3151_v2, 0.0  ;;  %v3183_v61 = vpack.c.bf16 %v3169_v5, %v3168_v48 }
 0x343   : > { %v3182_v22 = vpack.c.bf16 %v3167_v40, %v3166_v37 }
 0x345   : > { %4785 = vmatprep.mubr.bf16.mxu0 %v3182_v22 }
 0x346   : > { %v4759_v25 = vpop.f32.mrf.mxu1  ;;  %4786 = vmatmul.mubr.bf16.vlgmr.msra.gmra.mxu0 %v3183_v61 }
 0x347   : > { %v3105_v18 = vadd.f32 %v4759_v25, %v4727_v39 }
 0x348   : > { %v3096_v47 = vpop.f32.mrf.mxu1 }
 0x349   : > { %v3097_v54 = vadd.f32 %v3096_v47, %v2951_v51  ;;  %v3156_v20 = vadd.f32 %v6394_v57, %v3105_v18 }
 0x34a   : > { %v4760_v59 = vpop.f32.mrf.mxu1 }
 0x34b   : > { %v3108_v14 = vadd.f32 %v4760_v59, %v4728_v43  ;;  %v3154_v0 = vadd.f32 %v6394_v57, %v3097_v54  ;;  %v3172_v16 = vmax.f32 %v3156_v20, 0.0  ;;  %v6412_v43 = vld [vmem:[#allocation14] ss:$0 sm:$0xff]  ;;  %v6415_v59 = vld [vmem:[#allocation16] ss:$0 sm:$0xff] }
 0x34c   : > { %v3099_v21 = vpop.f32.mrf.mxu1 }
 0x34d   : > { %v3157_v19 = vadd.f32 %v6394_v57, %v3108_v14  ;;  %v3100_v15 = vadd.f32 %v3099_v21, %v2954_v12  ;;  %v3170_v41 = vmax.f32 %v3154_v0, 0.0 }
 0x34f   : > { %v3155_v32 = vadd.f32 %v6394_v57, %v3100_v15  ;;  %v3173_v17 = vmax.f32 %v3157_v19, 0.0 }
 0x351   : > { %v3171_v34 = vmax.f32 %v3155_v32, 0.0  ;;  %v3185_v27 = vpack.c.bf16 %v3173_v17, %v3172_v16 }
 0x353   : > { %v3184_v3 = vpack.c.bf16 %v3171_v34, %v3170_v41 }
 0x355   : > { %4789 = vmatprep.mubr.bf16.mxu0 %v3184_v3 }
 0x356   : > { %v4763_v30 = vpop.f32.mrf.mxu1  ;;  %4790 = vmatmul.mubr.bf16.gmra.mxu0 %v3185_v27 }
 0x357   : > { %v3121_v6 = vadd.f32 %v4763_v30, %v4731_v11 }
 0x358   : > { %v3112_v26 = vpop.f32.mrf.mxu1 }
 0x359   : > { %v3113_v36 = vadd.f32 %v3112_v26, %v2967_v60  ;;  %v3160_v7 = vadd.f32 %v6394_v57, %v3121_v6 }
 0x35a   : > { %v4764_v50 = vpop.f32.mrf.mxu1 }
 0x35b   : > { %v3124_v46 = vadd.f32 %v4764_v50, %v4732_v9  ;;  %v3158_v56 = vadd.f32 %v6394_v57, %v3113_v36  ;;  %v3176_v8 = vmax.f32 %v3160_v7, 0.0 }
 0x35c   : > { %v3115_v24 = vpop.f32.mrf.mxu1 }
 0x35d   : > { %v3161_v55 = vadd.f32 %v6394_v57, %v3124_v46  ;;  %v3116_v58 = vadd.f32 %v3115_v24, %v2970_v44  ;;  %v3174_v42 = vmax.f32 %v3158_v56, 0.0 }
 0x35f   : > { %v3159_v31 = vadd.f32 %v6394_v57, %v3116_v58  ;;  %v3177_v1 = vmax.f32 %v3161_v55, 0.0 }
 0x361   : > { %v3175_v28 = vmax.f32 %v3159_v31, 0.0  ;;  %v3187_v63 = vpack.c.bf16 %v3177_v1, %v3176_v8 }
 0x363   : > { %v3186_v52 = vpack.c.bf16 %v3175_v28, %v3174_v42 }
 0x365   : > { %4793 = vmatprep.mubr.bf16.mxu1 %v3186_v52 }
 0x366   : > { %v4767_v23 = vpop.f32.mrf.mxu1  ;;  %4794 = vmatmul.mubr.bf16.vlgmr.msra.gmra.mxu1 %v3187_v63 }
 0x367   : > { %v3137_v29 = vadd.f32 %v4767_v23, %v4735_v4 }
 0x368   : > { %v3128_v49 = vpop.f32.mrf.mxu1 }
 0x369   : > { %v3129_v33 = vadd.f32 %v3128_v49, %v2983_v13  ;;  %v3164_v5 = vadd.f32 %v6394_v57, %v3137_v29 }
 0x36a   : > { %v4768_v62 = vpop.f32.mrf.mxu1 }
 0x36b   : > { %v3140_v38 = vadd.f32 %v4768_v62, %v4736_v10  ;;  %v3162_v35 = vadd.f32 %v6394_v57, %v3129_v33  ;;  %v3180_v22 = vmax.f32 %v3164_v5, 0.0 }
 0x36c   : > { %v3131_v45 = vpop.f32.mrf.mxu1 }
 0x36d   : > { %v3165_v39 = vadd.f32 %v6394_v57, %v3140_v38  ;;  %v3132_v2 = vadd.f32 %v3131_v45, %v2986_v53  ;;  %v3178_v48 = vmax.f32 %v3162_v35, 0.0 }
 0x36f   : > { %v3163_v37 = vadd.f32 %v6394_v57, %v3132_v2  ;;  %v3181_v40 = vmax.f32 %v3165_v39, 0.0 }
 0x371   : > { %v3179_v51 = vmax.f32 %v3163_v37, 0.0  ;;  %v3189_v25 = vpack.c.bf16 %v3181_v40, %v3180_v22 }
 0x373   : > { %v3188_v61 = vpack.c.bf16 %v3179_v51, %v3178_v48 }
 0x375   : > { %4797 = vmatprep.mubr.bf16.mxu1 %v3188_v61 }
 0x376   : > { %4798 = vmatmul.mubr.bf16.gmra.mxu1 %v3189_v25 }
 0x406   : > { %v4787_v47 = vpop.f32.mrf.mxu0 }
 0x407   : > { %v3304_v54 = vadd.f32 %v4787_v47, %v6412_v43 }
 0x408   : > { %v3295_v18 = vpop.f32.mrf.mxu0 }
 0x409   : > { %v3360_v12 = vmax.f32 %v3304_v54, 0.0  ;;  %v3296_v14 = vadd.f32 %v6412_v43, %v3295_v18  ;;  %v6448_v18 = vld [vmem:[#allocation2] ss:$0 sm:$0xff] }
 0x40a   : > { %v4788_v57 = vpop.f32.mrf.mxu0 }
 0x40b   : > { %v3358_v21 = vmax.f32 %v3296_v14, 0.0  ;;  %v3307_v0 = vadd.f32 %v4788_v57, %v6412_v43  ;;  %v3383_v19 = vmul.f32 %v6415_v59, %v3360_v12 }
 0x40c   : > { %v3298_v15 = vpop.f32.mrf.mxu0 }
 0x40d   : > { %v3361_v20 = vmax.f32 %v3307_v0, 0.0  ;;  %v3299_v11 = vadd.f32 %v6412_v43, %v3298_v15  ;;  %3401 = vadd.xlane.f32.xlu1 %v3383_v19  ;;  %v3381_v32 = vmul.f32 %v6415_v59, %v3358_v21 }
 0x40f   : > { %v3359_v17 = vmax.f32 %v3299_v11, 0.0  ;;  %3397 = vadd.xlane.f32.xlu0 %v3381_v32  ;;  %v3384_v41 = vmul.f32 %v6415_v59, %v3361_v20 }
 0x411   : > { %3403 = vadd.xlane.f32.xlu1 %v3384_v41  ;;  %v3382_v34 = vmul.f32 %v6415_v59, %v3359_v17 }
 0x413   : > { %3399 = vadd.xlane.f32.xlu0 %v3382_v34 }
 0x416   : > { %v4791_v16 = vpop.f32.mrf.mxu0 }
 0x417   : > { %v3320_v60 = vadd.f32 %v4791_v16, %v6412_v43 }
 0x418   : > { %v3311_v3 = vpop.f32.mrf.mxu0 }
 0x419   : > { %v3364_v27 = vmax.f32 %v3320_v60, 0.0  ;;  %v3312_v30 = vadd.f32 %v6412_v43, %v3311_v3 }
 0x41a   : > { %v4792_v9 = vpop.f32.mrf.mxu0 }
 0x41b   : > { %v3362_v26 = vmax.f32 %v3312_v30, 0.0  ;;  %v3323_v36 = vadd.f32 %v4792_v9, %v6412_v43  ;;  %v3387_v6 = vmul.f32 %v6415_v59, %v3364_v27 }
 0x41c   : > { %v3314_v50 = vpop.f32.mrf.mxu0 }
 0x41d   : > { %v3365_v44 = vmax.f32 %v3323_v36, 0.0  ;;  %v3315_v46 = vadd.f32 %v6412_v43, %v3314_v50  ;;  %3409 = vadd.xlane.f32.xlu0 %v3387_v6  ;;  %v3385_v55 = vmul.f32 %v6415_v59, %v3362_v26 }
 0x41f   : > { %v3363_v24 = vmax.f32 %v3315_v46, 0.0  ;;  %v3388_v56 = vmul.f32 %v6415_v59, %v3365_v44 }
 0x421   : > { %3411 = vadd.xlane.f32.xlu1 %v3388_v56  ;;  %3405 = vadd.xlane.f32.xlu0 %v3385_v55  ;;  %v3386_v58 = vmul.f32 %v6415_v59, %v3363_v24 }
 0x425   : > { %3407 = vadd.xlane.f32.xlu1 %v3386_v58 }
 0x426   : > { %v4795_v7 = vpop.f32.mrf.mxu1 }
 0x427   : > { %v3336_v31 = vadd.f32 %v4795_v7, %v6412_v43 }
 0x428   : > { %v3327_v1 = vpop.f32.mrf.mxu1 }
 0x429   : > { %v3368_v4 = vmax.f32 %v3336_v31, 0.0  ;;  %v3328_v42 = vadd.f32 %v6412_v43, %v3327_v1 }
 0x42a   : > { %v4796_v28 = vpop.f32.mrf.mxu1 }
 0x42b   : > { %v3366_v8 = vmax.f32 %v3328_v42, 0.0  ;;  %v3339_v52 = vadd.f32 %v4796_v28, %v6412_v43  ;;  %v3391_v63 = vmul.f32 %v6415_v59, %v3368_v4 }
 0x42c   : > { %v3330_v13 = vpop.f32.mrf.mxu1 }
 0x42d   : > { %v3369_v23 = vmax.f32 %v3339_v52, 0.0  ;;  %v3331_v10 = vadd.f32 %v6412_v43, %v3330_v13  ;;  %3417 = vadd.xlane.f32.xlu0 %v3391_v63  ;;  %v3389_v29 = vmul.f32 %v6415_v59, %v3366_v8 }
 0x42f   : > { %v3367_v49 = vmax.f32 %v3331_v10, 0.0  ;;  %v3392_v33 = vmul.f32 %v6415_v59, %v3369_v23 }
 0x431   : > { %3419 = vadd.xlane.f32.xlu1 %v3392_v33  ;;  %3413 = vadd.xlane.f32.xlu0 %v3389_v29  ;;  %v3390_v62 = vmul.f32 %v6415_v59, %v3367_v49 }
 0x435   : > { %3415 = vadd.xlane.f32.xlu1 %v3390_v62 }
 0x436   : > { %v4799_v38 = vpop.f32.mrf.mxu1 }
 0x437   : > { %v3352_v45 = vadd.f32 %v4799_v38, %v6412_v43 }
 0x438   : > { %v3343_v53 = vpop.f32.mrf.mxu1 }
 0x439   : > { %v3344_v35 = vadd.f32 %v6412_v43, %v3343_v53  ;;  %v3372_v37 = vmax.f32 %v3352_v45, 0.0 }
 0x43a   : > { %v4800_v39 = vpop.f32.mrf.mxu1 }
 0x43b   : > { %v3370_v2 = vmax.f32 %v3344_v35, 0.0  ;;  %v3355_v40 = vadd.f32 %v4800_v39, %v6412_v43  ;;  %v3395_v47 = vmul.f32 %v6415_v59, %v3372_v37 }
 0x43c   : > { %v3346_v5 = vpop.f32.mrf.mxu1 }
 0x43d   : > { %v3347_v48 = vadd.f32 %v6412_v43, %v3346_v5  ;;  %v3393_v51 = vmul.f32 %v6415_v59, %v3370_v2  ;;  %v3373_v61 = vmax.f32 %v3355_v40, 0.0 }
 0x43f   : > { %v3371_v22 = vmax.f32 %v3347_v48, 0.0  ;;  %3421 = vadd.xlane.f32.xlu0 %v3393_v51  ;;  %v3396_v54 = vmul.f32 %v6415_v59, %v3373_v61 }
 0x441   : > { %v3394_v25 = vmul.f32 %v6415_v59, %v3371_v22 }
 0x443   : > { %3423 = vadd.xlane.f32.xlu1 %v3394_v25  ;;  %3425 = vadd.xlane.f32.xlu0 %v3395_v47 }
 0x447   : > { %3427 = vadd.xlane.f32.xlu1 %v3396_v54 }
 0x496   : > { %v3402_v12 = vpop.xlane.xlu1 %3401 }
 0x497   : > { %v3438_v14 = vadd.f32 %v6448_v18, %v3402_v12 }
 0x498   : > { %v3398_v43 = vpop.xlane.xlu0 %3397 }
 0x499   : > { %v3454_v57 = vsub.f32 0.0, %v3438_v14  ;;  %v3436_v21 = vadd.f32 %v6448_v18, %v3398_v43 }
 0x49a   : > { %v3404_v0 = vpop.xlane.xlu1 %3403 }
 0x49b   : > { %v3472_v19 = vmul.f32 1.442695, %v3454_v57  ;;  %v3452_v15 = vsub.f32 0.0, %v3436_v21  ;;  %v3439_v20 = vadd.f32 %v6448_v18, %v3404_v0 }
 0x49c   : > { %v3400_v11 = vpop.xlane.xlu0 %3399 }
 0x49d   : > { %5153 = vpow2.f32 %v3472_v19  ;;  %v3468_v32 = vmul.f32 1.442695, %v3452_v15  ;;  %v3455_v17 = vsub.f32 0.0, %v3439_v20  ;;  %v3437_v59 = vadd.f32 %v6448_v18, %v3400_v11 }
 0x49f   : > { %5155 = vpow2.f32 %v3468_v32  ;;  %v3474_v41 = vmul.f32 1.442695, %v3455_v17  ;;  %v3453_v34 = vsub.f32 0.0, %v3437_v59 }
 0x4a1   : > { %5157 = vpow2.f32 %v3474_v41  ;;  %v3470_v16 = vmul.f32 1.442695, %v3453_v34 }
 0x4a3   : > { %5159 = vpow2.f32 %v3470_v16 }
 0x4a6   : > { %v3410_v60 = vpop.xlane.xlu0 %3409 }
 0x4a7   : > { %v3442_v3 = vadd.f32 %v6448_v18, %v3410_v60 }
 0x4a9   : > { %v3458_v27 = vsub.f32 0.0, %v3442_v3 }
 0x4aa   : > { %v5154_v30 = vpop.eup %5153  ;;  %v3412_v9 = vpop.xlane.xlu1 %3411 }
 0x4ab   : > { %v3406_v26 = vpop.xlane.xlu0 %3405  ;;  %v3502_v36 = vadd.f32 1.0, %v5154_v30  ;;  %v3480_v6 = vmul.f32 1.442695, %v3458_v27  ;;  %v3443_v50 = vadd.f32 %v6448_v18, %v3412_v9 }
 0x4ac   : > { %v3440_v44 = vadd.f32 %v6448_v18, %v3406_v26  ;;  %v5156_v46 = vpop.eup %5155 }
 0x4ad   : > { %5161 = vrcp.f32 %v3502_v36  ;;  %v3500_v24 = vadd.f32 1.0, %v5156_v46  ;;  %v3459_v56 = vsub.f32 0.0, %v3443_v50 }
 0x4ae   : > { %v3456_v55 = vsub.f32 0.0, %v3440_v44  ;;  %v5158_v58 = vpop.eup %5157  ;;  %5163 = vpow2.f32 %v3480_v6  ;;  %v3408_v7 = vpop.xlane.xlu1 %3407 }
 0x4af   : > { %5165 = vrcp.f32 %v3500_v24  ;;  %v3503_v31 = vadd.f32 1.0, %v5158_v58  ;;  %v3482_v1 = vmul.f32 1.442695, %v3459_v56  ;;  %v3441_v28 = vadd.f32 %v6448_v18, %v3408_v7 }
 0x4b0   : > { %v5160_v4 = vpop.eup %5159  ;;  %v3476_v42 = vmul.f32 1.442695, %v3456_v55 }
 0x4b1   : > { %5167 = vrcp.f32 %v3503_v31  ;;  %v3501_v8 = vadd.f32 1.0, %v5160_v4  ;;  %v3457_v52 = vsub.f32 0.0, %v3441_v28 }
 0x4b2   : > { %5169 = vpow2.f32 %v3482_v1 }
 0x4b3   : > { %5171 = vrcp.f32 %v3501_v8  ;;  %v3478_v63 = vmul.f32 1.442695, %v3457_v52 }
 0x4b4   : > { %5173 = vpow2.f32 %v3476_v42 }
 0x4b5   : > { %5175 = vpow2.f32 %v3478_v63 }
 0x4b6   : > { %v3418_v13 = vpop.xlane.xlu0 %3417 }
 0x4b7   : > { %v3446_v23 = vadd.f32 %v6448_v18, %v3418_v13 }
 0x4b9   : > { %v3462_v10 = vsub.f32 0.0, %v3446_v23 }
 0x4ba   : > { %v5162_v49 = vpop.eup %5161  ;;  %v3420_v33 = vpop.xlane.xlu1 %3419 }
 0x4bb   : > { %v3414_v29 = vpop.xlane.xlu0 %3413  ;;  %v5164_v62 = vpop.eup %5163  ;;  %3551 = vst.msk [vmem:[%s6460_s27 + $0x10] sm:$0xff] %vm3548_vm1, %v5162_v49  ;;  %v3488_v38 = vmul.f32 1.442695, %v3462_v10  ;;  %v3447_v53 = vadd.f32 %v6448_v18, %v3420_v33 }
 0x4bc   : > { %v3444_v45 = vadd.f32 %v6448_v18, %v3414_v29  ;;  %v5166_v35 = vpop.eup %5165  ;;  %v3506_v39 = vadd.f32 1.0, %v5164_v62 }
 0x4bd   : > { %3549 = vst.msk [vmem:[%s6460_s27] sm:$0xff] %vm3548_vm1, %v5166_v35  ;;  %5177 = vpow2.f32 %v3488_v38  ;;  %v3463_v2 = vsub.f32 0.0, %v3447_v53 }
 0x4be   : > { %v3460_v5 = vsub.f32 0.0, %v3444_v45  ;;  %v5168_v37 = vpop.eup %5167  ;;  %5179 = vrcp.f32 %v3506_v39  ;;  %v3416_v40 = vpop.xlane.xlu1 %3415 }
 0x4bf   : > { %v5170_v48 = vpop.eup %5169  ;;  %3552 = vst.msk [vmem:[%s6460_s27 + $0x18] sm:$0xff] %vm3548_vm1, %v5168_v37  ;;  %v3490_v51 = vmul.f32 1.442695, %v3463_v2  ;;  %v3445_v61 = vadd.f32 %v6448_v18, %v3416_v40 }
 0x4c0   : > { %v3484_v22 = vmul.f32 1.442695, %v3460_v5  ;;  %v5172_v25 = vpop.eup %5171  ;;  %v3507_v47 = vadd.f32 1.0, %v5170_v48 }
 0x4c1   : > { %v5174_v54 = vpop.eup %5173  ;;  %3550 = vst.msk [vmem:[%s6460_s27 + $0x8] sm:$0xff] %vm3548_vm1, %v5172_v25  ;;  %5181 = vpow2.f32 %v3490_v51  ;;  %v3461_v12 = vsub.f32 0.0, %v3445_v61 }
 0x4c2   : > { %5183 = vrcp.f32 %v3507_v47  ;;  %v3504_v14 = vadd.f32 1.0, %v5174_v54  ;;  %v5176_v43 = vpop.eup %5175 }
 0x4c3   : > { %5185 = vpow2.f32 %v3484_v22  ;;  %v3486_v57 = vmul.f32 1.442695, %v3461_v12  ;;  %v3505_v21 = vadd.f32 1.0, %v5176_v43 }
 0x4c4   : > { %5187 = vrcp.f32 %v3504_v14 }
 0x4c5   : > { %5189 = vpow2.f32 %v3486_v57 }
 0x4c6   : > { %5191 = vrcp.f32 %v3505_v21 }
 0x4c8   : > { %v3422_v0 = vpop.xlane.xlu0 %3421 }
 0x4c9   : > { %v3448_v19 = vadd.f32 %v6448_v18, %v3422_v0 }
 0x4ca   : > { %v5178_v15 = vpop.eup %5177 }
 0x4cb   : > { %v5180_v20 = vpop.eup %5179  ;;  %v3510_v11 = vadd.f32 1.0, %v5178_v15  ;;  %v3464_v32 = vsub.f32 0.0, %v3448_v19 }
 0x4cc   : > { %3555 = vst.msk [vmem:[%s6460_s27 + $0x30] sm:$0xff] %vm3548_vm1, %v5180_v20  ;;  %v3424_v17 = vpop.xlane.xlu1 %3423  ;;  %v3426_v59 = vpop.xlane.xlu0 %3425 }
 0x4cd   : > { %5193 = vrcp.f32 %v3510_v11  ;;  %v3492_v41 = vmul.f32 1.442695, %v3464_v32  ;;  %v3449_v34 = vadd.f32 %v6448_v18, %v3424_v17  ;;  %v3450_v16 = vadd.f32 %v6448_v18, %v3426_v59 }
 0x4ce   : > { %v5182_v60 = vpop.eup %5181 }
 0x4cf   : > { %v5184_v3 = vpop.eup %5183  ;;  %v3511_v27 = vadd.f32 1.0, %v5182_v60  ;;  %5195 = vpow2.f32 %v3492_v41  ;;  %v3465_v30 = vsub.f32 0.0, %v3449_v34  ;;  %v3466_v9 = vsub.f32 0.0, %v3450_v16 }
 0x4d0   : > { %v5186_v26 = vpop.eup %5185  ;;  %3556 = vst.msk [vmem:[%s6460_s27 + $0x38] sm:$0xff] %vm3548_vm1, %v5184_v3  ;;  %v3428_v36 = vpop.xlane.xlu1 %3427 }
 0x4d1   : > { %v5188_v6 = vpop.eup %5187  ;;  %5197 = vrcp.f32 %v3511_v27  ;;  %v3508_v50 = vadd.f32 1.0, %v5186_v26  ;;  %v3494_v44 = vmul.f32 1.442695, %v3465_v30  ;;  %v3496_v24 = vmul.f32 1.442695, %v3466_v9 }
 0x4d2   : > { %v5190_v46 = vpop.eup %5189  ;;  %3553 = vst.msk [vmem:[%s6460_s27 + $0x20] sm:$0xff] %vm3548_vm1, %v5188_v6  ;;  %v3451_v56 = vadd.f32 %v6448_v18, %v3428_v36 }
 0x4d3   : > { %v5192_v55 = vpop.eup %5191  ;;  %5199 = vrcp.f32 %v3508_v50  ;;  %v3509_v58 = vadd.f32 1.0, %v5190_v46 }
 0x4d4   : > { %3554 = vst.msk [vmem:[%s6460_s27 + $0x28] sm:$0xff] %vm3548_vm1, %v5192_v55  ;;  %5201 = vpow2.f32 %v3494_v44  ;;  %v3467_v7 = vsub.f32 0.0, %v3451_v56 }
 0x4d5   : > { %5203 = vrcp.f32 %v3509_v58 }
 0x4d6   : > { %5205 = vpow2.f32 %v3496_v24  ;;  %v3498_v31 = vmul.f32 1.442695, %v3467_v7 }
 0x4d8   : > { %5207 = vpow2.f32 %v3498_v31 }
 0x4da   : > { %v5194_v1 = vpop.eup %5193 }
 0x4db   : > { %3559 = vst.msk [vmem:[%s6460_s27 + $0x50] sm:$0xff] %vm3548_vm1, %v5194_v1 }
 0x4dc   : > { %v5196_v4 = vpop.eup %5195 }
 0x4dd   : > { %v3512_v42 = vadd.f32 1.0, %v5196_v4 }
 0x4de   : > { %v5198_v18 = vpop.eup %5197 }
 0x4df   : > { %3560 = vst.msk [vmem:[%s6460_s27 + $0x58] sm:$0xff] %vm3548_vm1, %v5198_v18  ;;  %5209 = vrcp.f32 %v3512_v42 }
 0x4e0   : > { %v5200_v28 = vpop.eup %5199 }
 0x4e1   : > { %v5202_v8 = vpop.eup %5201  ;;  %3557 = vst.msk [vmem:[%s6460_s27 + $0x40] sm:$0xff] %vm3548_vm1, %v5200_v28 }
 0x4e2   : > { %v5204_v52 = vpop.eup %5203  ;;  %v3513_v63 = vadd.f32 1.0, %v5202_v8 }
 0x4e3   : > { %v5206_v13 = vpop.eup %5205  ;;  %3558 = vst.msk [vmem:[%s6460_s27 + $0x48] sm:$0xff] %vm3548_vm1, %v5204_v52 }
 0x4e4   : > { %5211 = vrcp.f32 %v3513_v63  ;;  %v3514_v23 = vadd.f32 1.0, %v5206_v13 }
 0x4e5   : > { %v5208_v10 = vpop.eup %5207 }
 0x4e6   : > { %5213 = vrcp.f32 %v3514_v23  ;;  %v3515_v49 = vadd.f32 1.0, %v5208_v10 }
 0x4e8   : > { %5215 = vrcp.f32 %v3515_v49 }
 0x4ec   : > { %v5210_v33 = vpop.eup %5209 }
 0x4ed   : > { %3561 = vst.msk [vmem:[%s6460_s27 + $0x60] sm:$0xff] %vm3548_vm1, %v5210_v33 }
 0x4f1   : > { %v5212_v29 = vpop.eup %5211 }
 0x4f2   : > { %3562 = vst.msk [vmem:[%s6460_s27 + $0x68] sm:$0xff] %vm3548_vm1, %v5212_v29  ;;  %3571 = sbr.rel (!%p6657_p2) target bundleno = 1312 (0x520), region = 104 }
 0x4f3   : > { %v5214_v62 = vpop.eup %5213 }
 0x4f4   : > { %3563 = vst.msk [vmem:[%s6460_s27 + $0x70] sm:$0xff] %vm3548_vm1, %v5214_v62 }
 0x4f5   : > { %v5216_v38 = vpop.eup %5215 }
 0x4f6   : > { %3564 = vst.msk [vmem:[%s6460_s27 + $0x78] sm:$0xff] %vm3548_vm1, %v5216_v38 }
 0x4f7   : > { %s6669_s25 = smov (!%p3574_p0, %s3573_s25), 16 }
 0x4f8   : > { %s4142_s22 = sshll.u32 %s6669_s25, 7 }
 0x4f9   : > { %p4145_p13 = scmp.eq.s32.totalorder %s4142_s22, 0 }
 0x4fa   : > { %s6514_s17 = sshrl.u32 (!%p4145_p13), %s6669_s25, 4 }
 0x4fb   : > { %3582 = sbr.rel (%p4145_p13) target bundleno = 1312 (0x520), region = 108  ;;  %p4146_p10 = scmp.le.s32.totalorder (!%p4145_p13), %s6514_s17, 0 }
 0x500   : > { %3815 = sbr.rel (%p4146_p10) target bundleno = 1295 (0x50f), region = 193  ;;  %s6658_s10 = smov (!%p4146_p10), %s6508_s15 }
 0x501   : > { %s6659_s29 = smov (!%p4146_p10), %s6460_s27  ;;  %s6523_s14 = smov (!%p4146_p10), 0  }
 0x502   : > { %s6525_s28 = smov (!%p4146_p10), 0  }
 0x505 LB: >> { %v3675_v53 = vld [vmem:[%s5541_s29] sm:$0xff]  ;;  %v3677_v45 = vld [vmem:[%s5541_s29 + $0x8] sm:$0xff]  ;;  %v3679_v35 = vld [vmem:[%s5541_s29 + $0x10] sm:$0xff]  ;;  %s3707_s30 = sadd.s32 1, %s5545_s14  ;;  %s3669_s28 = sadd.s32 1, %s5549_s28   ;;  %s5549_s28 = sphi %s6525_s28, %s3669_s28   ;;  %s5545_s14 = sphi %s6523_s14, %s6660_s14   ;;  %s5541_s29 = sphi %s6659_s29, %s3712_s29   ;;  %s5537_s10 = sphi %s6658_s10, %s3713_s10  }
 0x506   : >> { %3676 = vst [vmem:[%s5537_s10] sm:$0xff] %v3675_v53  ;;  %3678 = vst [vmem:[%s5537_s10 + $0x8] sm:$0xff] %v3677_v45  ;;  %v3681_v39 = vld [vmem:[%s5541_s29 + $0x18] sm:$0xff]  ;;  %v3683_v2 = vld [vmem:[%s5541_s29 + $0x20] sm:$0xff]  ;;  %p3708_p1 = scmp.ge.s32.totalorder %s3707_s30, %s6514_s17  ;;  %p3668_p4 = scmp.ge.s32.totalorder %s3669_s28, %s6514_s17 }
 0x507   : >> { %3680 = vst [vmem:[%s5537_s10 + $0x10] sm:$0xff] %v3679_v35  ;;  %v3685_v5 = vld [vmem:[%s5541_s29 + $0x28] sm:$0xff]  ;;  %3682 = vst [vmem:[%s5537_s10 + $0x18] sm:$0xff] %v3681_v39  ;;  %v3687_v37 = vld [vmem:[%s5541_s29 + $0x30] sm:$0xff] }
 0x508   : >> { %3684 = vst [vmem:[%s5537_s10 + $0x20] sm:$0xff] %v3683_v2  ;;  %3686 = vst [vmem:[%s5537_s10 + $0x28] sm:$0xff] %v3685_v5  ;;  %v3689_v40 = vld [vmem:[%s5541_s29 + $0x38] sm:$0xff]  ;;  %v3691_v48 = vld [vmem:[%s5541_s29 + $0x40] sm:$0xff]  ;;  %s6671_s30 = smov (%p3708_p1, %s3707_s30), 0 }
 0x509   : >> { %3688 = vst [vmem:[%s5537_s10 + $0x30] sm:$0xff] %v3687_v37  ;;  %3690 = vst [vmem:[%s5537_s10 + $0x38] sm:$0xff] %v3689_v40  ;;  %v3693_v51 = vld [vmem:[%s5541_s29 + $0x48] sm:$0xff]  ;;  %v3695_v22 = vld [vmem:[%s5541_s29 + $0x50] sm:$0xff]  ;;  %s4147_s13 = sshll.u32 %s6671_s30, 7  ;;  %s6660_s14 = smov %s6671_s30 }
 0x50a   : >> { %3692 = vst [vmem:[%s5537_s10 + $0x40] sm:$0xff] %v3691_v48  ;;  %v3697_v61 = vld [vmem:[%s5541_s29 + $0x58] sm:$0xff]  ;;  %3694 = vst [vmem:[%s5537_s10 + $0x48] sm:$0xff] %v3693_v51  ;;  %v3699_v25 = vld [vmem:[%s5541_s29 + $0x60] sm:$0xff]  ;;  %3671 = sbr.rel (!%p3668_p4) target bundleno = 1285 (0x505), region = 199 }
 0x50b   : >> { %3696 = vst [vmem:[%s5537_s10 + $0x50] sm:$0xff] %v3695_v22  ;;  %3698 = vst [vmem:[%s5537_s10 + $0x58] sm:$0xff] %v3697_v61  ;;  %v3701_v47 = vld [vmem:[%s5541_s29 + $0x68] sm:$0xff]  ;;  %v3703_v54 = vld [vmem:[%s5541_s29 + $0x70] sm:$0xff] }
 0x50c   : >> { %3700 = vst [vmem:[%s5537_s10 + $0x60] sm:$0xff] %v3699_v25  ;;  %3702 = vst [vmem:[%s5537_s10 + $0x68] sm:$0xff] %v3701_v47  ;;  %v3705_v12 = vld [vmem:[%s5541_s29 + $0x78] sm:$0xff]  ;;  %s3712_s29 = scalar_lea.vmem %s6460_s27, %s4147_s13 [#allocation17]  }
 0x50d   : >> { %3704 = vst [vmem:[%s5537_s10 + $0x70] sm:$0xff] %v3703_v54  ;;  %3706 = vst [vmem:[%s5537_s10 + $0x78] sm:$0xff] %v3705_v12  ;;  %s3713_s10 = scalar_lea.vmem %s6508_s15, %s4147_s13  }
 0x50f PF: > { %s6583_s24 = sand.u32 15, %s6669_s25   ;;  %s4161_s23 = sshll.u32 %s6514_s17, 7 }
 0x510   : > { %s3718_s16 = scalar_lea.vmem %s6460_s27, %s4161_s23 [#allocation17]   ;;  %s3720_s18 = scalar_lea.vmem %s6508_s15, %s4161_s23  }
 0x511   : > { %p4152_p6 = scmp.le.s32.totalorder %s6583_s24, 0 }
 0x512   : > { %s5551_s12 = smov (!%p4152_p6), %s3720_s18   ;;  %s5555_s19 = smov (!%p4152_p6), %s3718_s16  }
 0x513   : > { %3829 = sbr.rel (%p4152_p6) target bundleno = 1312 (0x520), region = 204  ;;  %s5559_s26 = smov (!%p4152_p6), 0  }
 0x514   : > { %s5563_s22 = smov (!%p4152_p6), 0  }
 0x518 LB: >> { %v3730_v14 = vld [vmem:[%s5557_s19] sm:$0xff]  ;;  %s3732_s25 = sadd.s32 1, %s5561_s26  ;;  %s3724_s22 = sadd.s32 1, %s5565_s22   ;;  %s5565_s22 = sphi %s5563_s22, %s3724_s22   ;;  %s5561_s26 = sphi %s5559_s26, %s5560_s26   ;;  %s5557_s19 = sphi %s5555_s19, %s3737_s19   ;;  %s5553_s12 = sphi %s5551_s12, %s3738_s12  }
 0x519   : >> { %3731 = vst [vmem:[%s5553_s12] sm:$0xff] %v3730_v14  ;;  %p3733_p8 = scmp.ge.s32.totalorder %s3732_s25, %s6583_s24  ;;  %p3723_p11 = scmp.ge.s32.totalorder %s3724_s22, %s6583_s24 }
 0x51b   : >> { %s6673_s25 = smov (%p3733_p8, %s3732_s25), 0  ;;  %3726 = sbr.rel (!%p3723_p11) target bundleno = 1304 (0x518), region = 210 }
 0x51c   : >> { %s4153_s27 = sshll.u32 %s6673_s25, 3  ;;  %s5560_s26 = smov %s6673_s25  }
 0x51d   : >> { %s3737_s19 = scalar_lea.vmem %s3718_s16, %s4153_s27 [#allocation17]   ;;  %s3738_s12 = scalar_lea.vmem %s3720_s18, %s4153_s27  }
 0x520 PF: > { %s6661_s22 = sld [smem:[#allocation23_spill]]  ;;  %s6663_s19 = smov %s5525_s20 }
 0x521   : > { %s6662_s15 = sld [smem:[#allocation24_spill]]  ;;  %s6664_s20 = smov %s5529_s21 }
 0x526   : > { %p27_p5 = scmp.ge.s32.totalorder %s6661_s22, 4  }
 0x527   : > { %s6665_s21 = smov %s6662_s15 }
 0x528   :  { %29 = sbr.rel (!%p27_p5) target bundleno = 10 (0xa), region = 221 }
 0x52d   :  { %3754 = vsyncpa [#allocation4], 1 }
 0x52e   :  { %3756 = vsyncpa [#allocation4 + $0x1], 1 }
 0x52f   :  { %3757 = vsyncpa [#allocation6], 1 }
 0x530   :  { %3758 = vsyncpa [#allocation9], 1 }
 0x531   :  { %3759 = vsyncpa [#allocation12], 1 }
 0x532   :  { %3760 = vsyncpa [#allocation15], 1 }

</bundles_post_ra>
